<compile_context>
chip_gen: v7x
topology: tpu7x:2x2x1
jax: 0.10.0
libtpu: 0.0.40
codegen_flags: <defaults>
</compile_context>

<pallas_src>
import math
from functools import partial

import jax
import jax.numpy as jnp
import numpy as np
from jax.experimental import pallas as pl
from jax.experimental.pallas import tpu as pltpu


def _round_up(x, m):
    return ((x + m - 1) // m) * m


# ----------------------------------------------------------------------------
# Kernel 1: fused matmul + bias (+ReLU).  Used for every conv layer via im2col.
# Weights/bias stay resident in VMEM; x rows are tiled over a "parallel" M grid.
# ----------------------------------------------------------------------------
def _matmul_bias_act_kernel(x_ref, w_ref, b_ref, o_ref, *, relu):
    acc = jnp.dot(x_ref[...].astype(jnp.bfloat16), w_ref[...],
                  preferred_element_type=jnp.float32)
    acc = acc + b_ref[...]
    if relu:
        acc = jnp.maximum(acc, 0.0)
    o_ref[...] = acc.astype(o_ref.dtype)


def matmul_bias_act(x, w, b, *, relu, out_dtype=jnp.bfloat16, tm=256):
    """y = relu?(x @ w + b).  x:(M,K), w:(K,N) bf16, b:(1,N) f32 -> (M,N) out_dtype."""
    M, K = x.shape
    N = w.shape[1]
    tm = min(tm, _round_up(M, 8))
    cost = pl.CostEstimate(
        flops=2 * M * K * N, transcendentals=0,
        bytes_accessed=M * K * x.dtype.itemsize + 2 * K * N + M * N * 2)
    return pl.pallas_call(
        partial(_matmul_bias_act_kernel, relu=relu),
        grid=(pl.cdiv(M, tm),),
        in_specs=[
            pl.BlockSpec((tm, K), lambda i: (i, 0)),
            pl.BlockSpec((K, N), lambda i: (0, 0)),
            pl.BlockSpec((1, N), lambda i: (0, 0)),
        ],
        out_specs=pl.BlockSpec((tm, N), lambda i: (i, 0)),
        out_shape=jax.ShapeDtypeStruct((M, N), out_dtype),
        compiler_params=pltpu.CompilerParams(dimension_semantics=("parallel",)),
        cost_estimate=cost,
    )(x, w, b)


# ----------------------------------------------------------------------------
# Kernel 2: the whole 3-layer MLP head fused into one pallas_call.
# Linear(in,128) -> ReLU -> Linear(128,128) -> ReLU -> Linear(128, A_pad)
# ----------------------------------------------------------------------------
def _mlp3_kernel(x_ref, w1_ref, b1_ref, w2_ref, b2_ref, w3_ref, b3_ref, o_ref):
    h = jnp.dot(x_ref[...].astype(jnp.bfloat16), w1_ref[...],
                preferred_element_type=jnp.float32) + b1_ref[...]
    h = jnp.maximum(h, 0.0).astype(jnp.bfloat16)
    h = jnp.dot(h, w2_ref[...], preferred_element_type=jnp.float32) + b2_ref[...]
    h = jnp.maximum(h, 0.0).astype(jnp.bfloat16)
    o_ref[...] = (jnp.dot(h, w3_ref[...], preferred_element_type=jnp.float32)
                  + b3_ref[...]).astype(o_ref.dtype)


def mlp3(x, params, *, tm=512):
    (w1, b1), (w2, b2), (w3, b3) = params
    M, K = x.shape
    H1, H2, NP = w1.shape[1], w2.shape[1], w3.shape[1]
    tm = min(tm, _round_up(M, 8))
    cost = pl.CostEstimate(
        flops=2 * M * (K * H1 + H1 * H2 + H2 * NP), transcendentals=0,
        bytes_accessed=M * K * x.dtype.itemsize
        + 2 * (w1.size + w2.size + w3.size) + 4 * M * NP)
    return pl.pallas_call(
        _mlp3_kernel,
        grid=(pl.cdiv(M, tm),),
        in_specs=[
            pl.BlockSpec((tm, K), lambda i: (i, 0)),
            pl.BlockSpec((K, H1), lambda i: (0, 0)),
            pl.BlockSpec((1, H1), lambda i: (0, 0)),
            pl.BlockSpec((H1, H2), lambda i: (0, 0)),
            pl.BlockSpec((1, H2), lambda i: (0, 0)),
            pl.BlockSpec((H2, NP), lambda i: (0, 0)),
            pl.BlockSpec((1, NP), lambda i: (0, 0)),
        ],
        out_specs=pl.BlockSpec((tm, NP), lambda i: (i, 0)),
        out_shape=jax.ShapeDtypeStruct((M, NP), jnp.float32),
        compiler_params=pltpu.CompilerParams(dimension_semantics=("parallel",)),
        cost_estimate=cost,
    )(x, w1, b1, w2, b2, w3, b3)


# ----------------------------------------------------------------------------
# Kernel 3: conv-path FC tail fused: FC(3200p,512) [K-tiled, f32 VMEM accumulator]
# -> ReLU -> FC(512, A_pad).  Weight of FC1 streams through double-buffered
# (tk, 512) tiles so its DMA overlaps the MXU.
# ----------------------------------------------------------------------------
def _fc_tail_kernel(x_ref, w1_ref, b1_ref, w2_ref, b2_ref, o_ref, acc_ref):
    k = pl.program_id(1)

    @pl.when(k == 0)
    def _():
        acc_ref[...] = jnp.zeros_like(acc_ref)

    acc_ref[...] += jnp.dot(x_ref[...].astype(jnp.bfloat16), w1_ref[...],
                            preferred_element_type=jnp.float32)

    @pl.when(k == pl.num_programs(1) - 1)
    def _():
        h = jnp.maximum(acc_ref[...] + b1_ref[...], 0.0).astype(jnp.bfloat16)
        o_ref[...] = (jnp.dot(h, w2_ref[...], preferred_element_type=jnp.float32)
                      + b2_ref[...]).astype(o_ref.dtype)


def fc_tail(x, w1, b1, w2, b2, *, tm=256, tk=640):
    M, K1 = x.shape
    H = w1.shape[1]
    NP = w2.shape[1]
    assert K1 % tk == 0, "FC1 K must be pre-padded to a multiple of the K tile"
    tm = min(tm, _round_up(M, 8))
    cost = pl.CostEstimate(
        flops=2 * M * (K1 * H + H * NP), transcendentals=0,
        bytes_accessed=M * K1 * x.dtype.itemsize + 2 * (w1.size + w2.size) + 4 * M * NP)
    return pl.pallas_call(
        _fc_tail_kernel,
        grid=(pl.cdiv(M, tm), K1 // tk),
        in_specs=[
            pl.BlockSpec((tm, tk), lambda i, k: (i, k)),
            pl.BlockSpec((tk, H), lambda i, k: (k, 0)),
            pl.BlockSpec((1, H), lambda i, k: (0, 0)),
            pl.BlockSpec((H, NP), lambda i, k: (0, 0)),
            pl.BlockSpec((1, NP), lambda i, k: (0, 0)),
        ],
        out_specs=pl.BlockSpec((tm, NP), lambda i, k: (i, 0)),
        out_shape=jax.ShapeDtypeStruct((M, NP), jnp.float32),
        scratch_shapes=[pltpu.VMEM((tm, H), jnp.float32)],
        compiler_params=pltpu.CompilerParams(
            dimension_semantics=("parallel", "arbitrary")),
        cost_estimate=cost,
    )(x, w1, b1, w2, b2)


# ------------------------------ XLA glue -------------------------------------
def im2col_nhwc(x, k, stride):
    """x: (N, H, W, C) -> cols: (N*OH*OW, k*k*C). Feature order (kh, kw, C)."""
    N, H, W, C = x.shape
    OH = (H - k) // stride + 1
    OW = (W - k) // stride + 1
    patches = []
    for i in range(k):
        for j in range(k):
            patches.append(x[:, i:i + stride * (OH - 1) + 1:stride,
                             j:j + stride * (OW - 1) + 1:stride, :])
    cols = jnp.concatenate(patches, axis=-1)          # (N, OH, OW, k*k*C)
    return cols.reshape(N * OH * OW, k * k * C), OH, OW


def _uniform(key, shape, bound):
    return jax.random.uniform(key, shape, jnp.float32, -bound, bound)


class DQN:
    """JAX/Pallas port of the PyTorch DQN module (deterministic synthetic init)."""

    def __init__(self, num_actions, input_shape, key):
        self.num_actions = num_actions
        self.input_shape = tuple(input_shape)
        self.is_mlp = len(input_shape) == 1
        self.linears = []          # canonical f32 params (PyTorch layout), used by reference
        n_pad = _round_up(num_actions, 128)

        if self.is_mlp:
            for fi, fo in [(input_shape[0], 128), (128, 128), (128, num_actions)]:
                key, kw_, kb_ = jax.random.split(key, 3)
                bound = 1.0 / math.sqrt(fi)
                self.linears.append((_uniform(kw_, (fi, fo), bound),
                                     _uniform(kb_, (fo,), bound)))
            # Prepped kernel params: bf16 weights, f32 (1,N) biases, last N padded to 128.
            prepped = []
            for idx, (w, b) in enumerate(self.linears):
                if idx == len(self.linears) - 1:
                    w = jnp.pad(w, ((0, 0), (0, n_pad - w.shape[1])))
                    b = jnp.pad(b, (0, n_pad - b.shape[0]))
                prepped.append((w.astype(jnp.bfloat16),
                                b.reshape(1, -1).astype(jnp.float32)))
            self._mlp_params = prepped
        else:
            # Conv(C,32,8,4) -> Conv(32,64,4,2) -> Conv(64,64,3,1) -> FC(3136,512) -> FC(512,A)
            self.convs = []
            for ci, co, k, s in [(input_shape[0], 32, 8, 4), (32, 64, 4, 2), (64, 64, 3, 1)]:
                key, kw_, kb_ = jax.random.split(key, 3)
                bound = 1.0 / math.sqrt(ci * k * k)
                self.convs.append((_uniform(kw_, (co, ci, k, k), bound),
                                   _uniform(kb_, (co,), bound), k, s))
            for fi, fo in [(64 * 7 * 7, 512), (512, num_actions)]:
                key, kw_, kb_ = jax.random.split(key, 3)
                bound = 1.0 / math.sqrt(fi)
                self.linears.append((_uniform(kw_, (fi, fo), bound),
                                     _uniform(kb_, (fo,), bound)))
            # Conv weights pre-flattened once to (kh*kw*in_c, out_c) in (kh,kw,C) order, bf16.
            self._conv_params = []
            for w, b, k, s in self.convs:
                wf = jnp.transpose(w, (2, 3, 1, 0)).reshape(-1, w.shape[0])
                self._conv_params.append((wf.astype(jnp.bfloat16),
                                          b.reshape(1, -1).astype(jnp.float32), k, s))
            # FC1: permute rows from PyTorch NCHW-flatten order (c,h,w) to NHWC order (h,w,c)
            # and zero-pad K 3136 -> 3200 so the K grid (tk=640) divides evenly.
            w1, b1 = self.linears[0]
            w1_hwc = w1.reshape(64, 7, 7, 512).transpose(1, 2, 0, 3).reshape(3136, 512)
            self._fc1_k_pad = 3200
            w1p = jnp.pad(w1_hwc, ((0, self._fc1_k_pad - 3136), (0, 0))).astype(jnp.bfloat16)
            # FC2: pad output columns (num_actions) to 128 lanes with zeros.
            w2, b2 = self.linears[1]
            w2p = jnp.pad(w2, ((0, 0), (0, n_pad - num_actions))).astype(jnp.bfloat16)
            b2p = jnp.pad(b2, (0, n_pad - num_actions)).reshape(1, -1).astype(jnp.float32)
            self._fc_params = (w1p, b1.reshape(1, -1).astype(jnp.float32), w2p, b2p)

    def __call__(self, x):
        A = self.num_actions
        if self.is_mlp:
            q = mlp3(x, self._mlp_params)          # single fused pallas_call
            return q[:, :A]
        # Conv path: one NCHW->NHWC transpose + bf16 cast at entry; NHWC thereafter.
        h = jnp.transpose(x, (0, 2, 3, 1)).astype(jnp.bfloat16)
        B = h.shape[0]
        for wf, b, k, s in self._conv_params:
            cols, oh, ow = im2col_nhwc(h, k, s)
            y = matmul_bias_act(cols, wf, b, relu=True)   # conv+bias+ReLU as MXU matmul
            h = y.reshape(B, oh, ow, -1)
        # nn.Flatten: NHWC flatten (FC1 weight rows were permuted at init to match).
        h = h.reshape(B, -1)
        h = jnp.pad(h, ((0, 0), (0, self._fc1_k_pad - h.shape[1])))
        w1p, b1, w2p, b2p = self._fc_params
        q = fc_tail(h, w1p, b1, w2p, b2p)          # fused FC1(K-tiled)+ReLU+FC2
        return q[:, :A]


# ------------------------ pure-JAX reference (check) -------------------------
def ref_forward(model, x):
    hp = jax.lax.Precision.HIGHEST
    if model.is_mlp:
        h = x
        for idx, (w, b) in enumerate(model.linears):
            h = jnp.dot(h, w, precision=hp) + b
            if idx < len(model.linears) - 1:
                h = jnp.maximum(h, 0.0)
        return h
    h = x
    for w, b, k, s in model.convs:
        h = jax.lax.conv_general_dilated(
            h, w, window_strides=(s, s), padding="VALID",
            dimension_numbers=("NCHW", "OIHW", "NCHW"), precision=hp)
        h = jnp.maximum(h + b.reshape(1, -1, 1, 1), 0.0)
    h = h.reshape(h.shape[0], -1)
    h = jnp.maximum(jnp.dot(h, model.linears[0][0], precision=hp) + model.linears[0][1], 0.0)
    return jnp.dot(h, model.linears[1][0], precision=hp) + model.linears[1][1]


if __name__ == "__main__":
    key = jax.random.PRNGKey(0)
    k_model_c, k_model_m, k_xc, k_xm = jax.random.split(key, 4)

    # Image-state branch: spatial 84x84 is forced by the hard-coded Linear(64*7*7, 512).
    conv_dqn = DQN(num_actions=6, input_shape=(4, 84, 84), key=k_model_c)
    x_img = jax.random.uniform(k_xc, (2, 4, 84, 84), jnp.float32)
    q_img = jax.block_until_ready(jax.jit(conv_dqn.__call__)(x_img))

    # Vector-state branch: Linear(8,128)->ReLU->Linear(128,128)->ReLU->Linear(128,4).
    mlp_dqn = DQN(num_actions=4, input_shape=(8,), key=k_model_m)
    x_vec = jax.random.normal(k_xm, (2, 8), jnp.float32)
    q_vec = jax.block_until_ready(jax.jit(mlp_dqn.__call__)(x_vec))

    assert q_img.shape == (2, 6) and q_vec.shape == (2, 4)
    # Tolerance reflects bf16 MXU inputs (f32 accumulation) vs. HIGHEST-precision reference.
    np.testing.assert_allclose(np.asarray(q_img), np.asarray(ref_forward(conv_dqn, x_img)),
                               rtol=2e-2, atol=2e-2)
    np.testing.assert_allclose(np.asarray(q_vec), np.asarray(ref_forward(mlp_dqn, x_vec)),
                               rtol=2e-2, atol=2e-2)
    print("KERNEL_OK")
</pallas_src>

<mosaic_0001>
module attributes {stable_mosaic.version = 11 : i64} {
  func.func @_matmul_bias_act_kernel(%arg0: i32, %arg1: memref<256x256xbf16, #tpu.memory_space<vmem>>, %arg2: memref<256x32xbf16, #tpu.memory_space<vmem>>, %arg3: memref<1x32xf32, #tpu.memory_space<vmem>>, %arg4: memref<256x32xbf16, #tpu.memory_space<vmem>>) attributes {dimension_semantics = [#tpu.dimension_semantics<parallel>], iteration_bounds = array<i64: 4>, scalar_prefetch = 0 : i64, scratch_operands = 0 : i64, tpu.core_type = #tpu.core_type<tc>, window_params = [{transform_indices = @transform_0, window_bounds = array<i64: 256, 256>}, {pipeline_mode = #tpu.pipeline_mode<synchronous>, transform_indices = @transform_1, window_bounds = array<i64: 256, 32>}, {pipeline_mode = #tpu.pipeline_mode<synchronous>, transform_indices = @transform_2, window_bounds = array<i64: 1, 32>}, {transform_indices = @transform_3, window_bounds = array<i64: 256, 32>}]} {
    %c0 = arith.constant 0 : index
    %c0_0 = arith.constant 0 : index
    %0 = vector.load %arg1[%c0, %c0_0] : memref<256x256xbf16, #tpu.memory_space<vmem>>, vector<256x256xbf16>
    %c0_1 = arith.constant 0 : index
    %c0_2 = arith.constant 0 : index
    %1 = vector.load %arg2[%c0_1, %c0_2] : memref<256x32xbf16, #tpu.memory_space<vmem>>, vector<256x32xbf16>
    %cst = arith.constant dense<0.000000e+00> : vector<256x32xf32>
    %2 = tpu.matmul %0, %1, %cst {dimension_numbers = #tpu.dot_dimension_numbers<[1], [0], [0], [1], [0, 0, 1, 1], [], []>} : vector<256x256xbf16>, vector<256x32xbf16>, vector<256x32xf32> -> vector<256x32xf32>
    %c0_3 = arith.constant 0 : index
    %c0_4 = arith.constant 0 : index
    %3 = vector.load %arg3[%c0_3, %c0_4] : memref<1x32xf32, #tpu.memory_space<vmem>>, vector<1x32xf32>
    %4 = vector.broadcast %3 : vector<1x32xf32> to vector<256x32xf32>
    %5 = arith.addf %2, %4 : vector<256x32xf32>
    %cst_5 = arith.constant 0.000000e+00 : f32
    %6 = vector.broadcast %cst_5 : f32 to vector<256x32xf32>
    %7 = arith.maximumf %5, %6 : vector<256x32xf32>
    %8 = arith.truncf %7 : vector<256x32xf32> to vector<256x32xbf16>
    %c0_6 = arith.constant 0 : index
    %c0_7 = arith.constant 0 : index
    %9 = vector.load %arg4[%c0_6, %c0_7] : memref<256x32xbf16, #tpu.memory_space<vmem>>, vector<256x32xbf16>
    tpu.vector_store %arg4[%c0_6, %c0_7], %8 {strides = array<i32>} : memref<256x32xbf16, #tpu.memory_space<vmem>>, vector<256x32xbf16>,
    return
  }
  func.func @transform_0(%arg0: i32) -> (i32, i32) {
    %c0_i32 = arith.constant 0 : i32
    %c0_i32_0 = arith.constant 0 : i32
    return %arg0, %c0_i32 : i32, i32
  }
  func.func @transform_1(%arg0: i32) -> (i32, i32) {
    %c0_i32 = arith.constant 0 : i32
    %c0_i32_0 = arith.constant 0 : i32
    %c0_i32_1 = arith.constant 0 : i32
    return %c0_i32, %c0_i32_0 : i32, i32
  }
  func.func @transform_2(%arg0: i32) -> (i32, i32) {
    %c0_i32 = arith.constant 0 : i32
    %c0_i32_0 = arith.constant 0 : i32
    %c0_i32_1 = arith.constant 0 : i32
    return %c0_i32, %c0_i32_0 : i32, i32
  }
  func.func @transform_3(%arg0: i32) -> (i32, i32) {
    %c0_i32 = arith.constant 0 : i32
    %c0_i32_0 = arith.constant 0 : i32
    return %arg0, %c0_i32 : i32, i32
  }
}

module attributes {stable_mosaic.version = 11 : i64} {
  func.func @_matmul_bias_act_kernel(%arg0: i32, %arg1: memref<168x512xbf16, #tpu.memory_space<vmem>>, %arg2: memref<512x64xbf16, #tpu.memory_space<vmem>>, %arg3: memref<1x64xf32, #tpu.memory_space<vmem>>, %arg4: memref<168x64xbf16, #tpu.memory_space<vmem>>) attributes {dimension_semantics = [#tpu.dimension_semantics<parallel>], iteration_bounds = array<i64: 1>, scalar_prefetch = 0 : i64, scratch_operands = 0 : i64, tpu.core_type = #tpu.core_type<tc>, window_params = [{transform_indices = @transform_0, window_bounds = array<i64: 168, 512>}, {pipeline_mode = #tpu.pipeline_mode<synchronous>, transform_indices = @transform_1, window_bounds = array<i64: 512, 64>}, {pipeline_mode = #tpu.pipeline_mode<synchronous>, transform_indices = @transform_2, window_bounds = array<i64: 1, 64>}, {transform_indices = @transform_3, window_bounds = array<i64: 168, 64>}]} {
    %c0 = arith.constant 0 : index
    %c0_0 = arith.constant 0 : index
    %0 = vector.load %arg1[%c0, %c0_0] : memref<168x512xbf16, #tpu.memory_space<vmem>>, vector<168x512xbf16>
    %c0_1 = arith.constant 0 : index
    %c0_2 = arith.constant 0 : index
    %1 = vector.load %arg2[%c0_1, %c0_2] : memref<512x64xbf16, #tpu.memory_space<vmem>>, vector<512x64xbf16>
    %cst = arith.constant dense<0.000000e+00> : vector<168x64xf32>
    %2 = tpu.matmul %0, %1, %cst {dimension_numbers = #tpu.dot_dimension_numbers<[1], [0], [0], [1], [0, 0, 1, 1], [], []>} : vector<168x512xbf16>, vector<512x64xbf16>, vector<168x64xf32> -> vector<168x64xf32>
    %c0_3 = arith.constant 0 : index
    %c0_4 = arith.constant 0 : index
    %3 = vector.load %arg3[%c0_3, %c0_4] : memref<1x64xf32, #tpu.memory_space<vmem>>, vector<1x64xf32>
    %4 = vector.broadcast %3 : vector<1x64xf32> to vector<168x64xf32>
    %5 = arith.addf %2, %4 : vector<168x64xf32>
    %cst_5 = arith.constant 0.000000e+00 : f32
    %6 = vector.broadcast %cst_5 : f32 to vector<168x64xf32>
    %7 = arith.maximumf %5, %6 : vector<168x64xf32>
    %8 = arith.truncf %7 : vector<168x64xf32> to vector<168x64xbf16>
    %c0_6 = arith.constant 0 : index
    %c0_7 = arith.constant 0 : index
    %9 = vector.load %arg4[%c0_6, %c0_7] : memref<168x64xbf16, #tpu.memory_space<vmem>>, vector<168x64xbf16>
    tpu.vector_store %arg4[%c0_6, %c0_7], %8 {strides = array<i32>} : memref<168x64xbf16, #tpu.memory_space<vmem>>, vector<168x64xbf16>,
    return
  }
  func.func @transform_0(%arg0: i32) -> (i32, i32) {
    %c0_i32 = arith.constant 0 : i32
    %c0_i32_0 = arith.constant 0 : i32
    return %arg0, %c0_i32 : i32, i32
  }
  func.func @transform_1(%arg0: i32) -> (i32, i32) {
    %c0_i32 = arith.constant 0 : i32
    %c0_i32_0 = arith.constant 0 : i32
    %c0_i32_1 = arith.constant 0 : i32
    return %c0_i32, %c0_i32_0 : i32, i32
  }
  func.func @transform_2(%arg0: i32) -> (i32, i32) {
    %c0_i32 = arith.constant 0 : i32
    %c0_i32_0 = arith.constant 0 : i32
    %c0_i32_1 = arith.constant 0 : i32
    return %c0_i32, %c0_i32_0 : i32, i32
  }
  func.func @transform_3(%arg0: i32) -> (i32, i32) {
    %c0_i32 = arith.constant 0 : i32
    %c0_i32_0 = arith.constant 0 : i32
    return %arg0, %c0_i32 : i32, i32
  }
}

module attributes {stable_mosaic.version = 11 : i64} {
  func.func @_matmul_bias_act_kernel(%arg0: i32, %arg1: memref<104x576xbf16, #tpu.memory_space<vmem>>, %arg2: memref<576x64xbf16, #tpu.memory_space<vmem>>, %arg3: memref<1x64xf32, #tpu.memory_space<vmem>>, %arg4: memref<104x64xbf16, #tpu.memory_space<vmem>>) attributes {dimension_semantics = [#tpu.dimension_semantics<parallel>], iteration_bounds = array<i64: 1>, scalar_prefetch = 0 : i64, scratch_operands = 0 : i64, tpu.core_type = #tpu.core_type<tc>, window_params = [{transform_indices = @transform_0, window_bounds = array<i64: 104, 576>}, {pipeline_mode = #tpu.pipeline_mode<synchronous>, transform_indices = @transform_1, window_bounds = array<i64: 576, 64>}, {pipeline_mode = #tpu.pipeline_mode<synchronous>, transform_indices = @transform_2, window_bounds = array<i64: 1, 64>}, {transform_indices = @transform_3, window_bounds = array<i64: 104, 64>}]} {
    %c0 = arith.constant 0 : index
    %c0_0 = arith.constant 0 : index
    %0 = vector.load %arg1[%c0, %c0_0] : memref<104x576xbf16, #tpu.memory_space<vmem>>, vector<104x576xbf16>
    %c0_1 = arith.constant 0 : index
    %c0_2 = arith.constant 0 : index
    %1 = vector.load %arg2[%c0_1, %c0_2] : memref<576x64xbf16, #tpu.memory_space<vmem>>, vector<576x64xbf16>
    %cst = arith.constant dense<0.000000e+00> : vector<104x64xf32>
    %2 = tpu.matmul %0, %1, %cst {dimension_numbers = #tpu.dot_dimension_numbers<[1], [0], [0], [1], [0, 0, 1, 1], [], []>} : vector<104x576xbf16>, vector<576x64xbf16>, vector<104x64xf32> -> vector<104x64xf32>
    %c0_3 = arith.constant 0 : index
    %c0_4 = arith.constant 0 : index
    %3 = vector.load %arg3[%c0_3, %c0_4] : memref<1x64xf32, #tpu.memory_space<vmem>>, vector<1x64xf32>
    %4 = vector.broadcast %3 : vector<1x64xf32> to vector<104x64xf32>
    %5 = arith.addf %2, %4 : vector<104x64xf32>
    %cst_5 = arith.constant 0.000000e+00 : f32
    %6 = vector.broadcast %cst_5 : f32 to vector<104x64xf32>
    %7 = arith.maximumf %5, %6 : vector<104x64xf32>
    %8 = arith.truncf %7 : vector<104x64xf32> to vector<104x64xbf16>
    %c0_6 = arith.constant 0 : index
    %c0_7 = arith.constant 0 : index
    %9 = vector.load %arg4[%c0_6, %c0_7] : memref<104x64xbf16, #tpu.memory_space<vmem>>, vector<104x64xbf16>
    tpu.vector_store %arg4[%c0_6, %c0_7], %8 {strides = array<i32>} : memref<104x64xbf16, #tpu.memory_space<vmem>>, vector<104x64xbf16>,
    return
  }
  func.func @transform_0(%arg0: i32) -> (i32, i32) {
    %c0_i32 = arith.constant 0 : i32
    %c0_i32_0 = arith.constant 0 : i32
    return %arg0, %c0_i32 : i32, i32
  }
  func.func @transform_1(%arg0: i32) -> (i32, i32) {
    %c0_i32 = arith.constant 0 : i32
    %c0_i32_0 = arith.constant 0 : i32
    %c0_i32_1 = arith.constant 0 : i32
    return %c0_i32, %c0_i32_0 : i32, i32
  }
  func.func @transform_2(%arg0: i32) -> (i32, i32) {
    %c0_i32 = arith.constant 0 : i32
    %c0_i32_0 = arith.constant 0 : i32
    %c0_i32_1 = arith.constant 0 : i32
    return %c0_i32, %c0_i32_0 : i32, i32
  }
  func.func @transform_3(%arg0: i32) -> (i32, i32) {
    %c0_i32 = arith.constant 0 : i32
    %c0_i32_0 = arith.constant 0 : i32
    return %arg0, %c0_i32 : i32, i32
  }
}

module attributes {stable_mosaic.version = 11 : i64} {
  func.func @_fc_tail_kernel(%arg0: i32, %arg1: i32, %arg2: memref<8x640xbf16, #tpu.memory_space<vmem>>, %arg3: memref<640x512xbf16, #tpu.memory_space<vmem>>, %arg4: memref<1x512xf32, #tpu.memory_space<vmem>>, %arg5: memref<512x128xbf16, #tpu.memory_space<vmem>>, %arg6: memref<1x128xf32, #tpu.memory_space<vmem>>, %arg7: memref<8x128xf32, #tpu.memory_space<vmem>>, %arg8: memref<8x512xf32, #tpu.memory_space<vmem>>) attributes {dimension_semantics = [#tpu.dimension_semantics<parallel>, #tpu.dimension_semantics<arbitrary>], iteration_bounds = array<i64: 1, 5>, scalar_prefetch = 0 : i64, scratch_operands = 1 : i64, tpu.core_type = #tpu.core_type<tc>, window_params = [{transform_indices = @transform_0, window_bounds = array<i64: 8, 640>}, {transform_indices = @transform_1, window_bounds = array<i64: 640, 512>}, {pipeline_mode = #tpu.pipeline_mode<synchronous>, transform_indices = @transform_2, window_bounds = array<i64: 1, 512>}, {pipeline_mode = #tpu.pipeline_mode<synchronous>, transform_indices = @transform_3, window_bounds = array<i64: 512, 128>}, {pipeline_mode = #tpu.pipeline_mode<synchronous>, transform_indices = @transform_4, window_bounds = array<i64: 1, 128>}, {transform_indices = @transform_5, window_bounds = array<i64: 8, 128>}]} {
    %c0_i32 = arith.constant 0 : i32
    %0 = arith.cmpi eq, %arg1, %c0_i32 : i32
    %1 = arith.extui %0 : i1 to i32
    %c0_i32_0 = arith.constant 0 : i32
    %2 = arith.cmpi ne, %1, %c0_i32_0 : i32
    scf.if %2 {
      %cst_9 = arith.constant 0.000000e+00 : f32
      %12 = vector.broadcast %cst_9 : f32 to vector<8x512xf32>
      %c0_10 = arith.constant 0 : index
      %c0_11 = arith.constant 0 : index
      %13 = vector.load %arg8[%c0_10, %c0_11] : memref<8x512xf32, #tpu.memory_space<vmem>>, vector<8x512xf32>
      tpu.vector_store %arg8[%c0_10, %c0_11], %12 {strides = array<i32>} : memref<8x512xf32, #tpu.memory_space<vmem>>, vector<8x512xf32>,
    } else {
    }
    %c0 = arith.constant 0 : index
    %c0_1 = arith.constant 0 : index
    %3 = vector.load %arg8[%c0, %c0_1] : memref<8x512xf32, #tpu.memory_space<vmem>>, vector<8x512xf32>
    %c0_2 = arith.constant 0 : index
    %c0_3 = arith.constant 0 : index
    %4 = vector.load %arg2[%c0_2, %c0_3] : memref<8x640xbf16, #tpu.memory_space<vmem>>, vector<8x640xbf16>
    %c0_4 = arith.constant 0 : index
    %c0_5 = arith.constant 0 : index
    %5 = vector.load %arg3[%c0_4, %c0_5] : memref<640x512xbf16, #tpu.memory_space<vmem>>, vector<640x512xbf16>
    %cst = arith.constant dense<0.000000e+00> : vector<8x512xf32>
    %6 = tpu.matmul %4, %5, %cst {dimension_numbers = #tpu.dot_dimension_numbers<[1], [0], [0], [1], [0, 0, 1, 1], [], []>} : vector<8x640xbf16>, vector<640x512xbf16>, vector<8x512xf32> -> vector<8x512xf32>
    %7 = arith.addf %3, %6 : vector<8x512xf32>
    %c0_6 = arith.constant 0 : index
    %c0_7 = arith.constant 0 : index
    %8 = vector.load %arg8[%c0_6, %c0_7] : memref<8x512xf32, #tpu.memory_space<vmem>>, vector<8x512xf32>
    tpu.vector_store %arg8[%c0_6, %c0_7], %7 {strides = array<i32>} : memref<8x512xf32, #tpu.memory_space<vmem>>, vector<8x512xf32>,
    %c4_i32 = arith.constant 4 : i32
    %9 = arith.cmpi eq, %arg1, %c4_i32 : i32
    %10 = arith.extui %9 : i1 to i32
    %c0_i32_8 = arith.constant 0 : i32
    %11 = arith.cmpi ne, %10, %c0_i32_8 : i32
    scf.if %11 {
      %c0_9 = arith.constant 0 : index
      %c0_10 = arith.constant 0 : index
      %12 = vector.load %arg8[%c0_9, %c0_10] : memref<8x512xf32, #tpu.memory_space<vmem>>, vector<8x512xf32>
      %c0_11 = arith.constant 0 : index
      %c0_12 = arith.constant 0 : index
      %13 = vector.load %arg4[%c0_11, %c0_12] : memref<1x512xf32, #tpu.memory_space<vmem>>, vector<1x512xf32>
      %14 = vector.broadcast %13 : vector<1x512xf32> to vector<8x512xf32>
      %15 = arith.addf %12, %14 : vector<8x512xf32>
      %cst_13 = arith.constant 0.000000e+00 : f32
      %16 = vector.broadcast %cst_13 : f32 to vector<8x512xf32>
      %17 = arith.maximumf %15, %16 : vector<8x512xf32>
      %18 = arith.truncf %17 : vector<8x512xf32> to vector<8x512xbf16>
      %c0_14 = arith.constant 0 : index
      %c0_15 = arith.constant 0 : index
      %19 = vector.load %arg5[%c0_14, %c0_15] : memref<512x128xbf16, #tpu.memory_space<vmem>>, vector<512x128xbf16>
      %cst_16 = arith.constant dense<0.000000e+00> : vector<8x128xf32>
      %20 = tpu.matmul %18, %19, %cst_16 {dimension_numbers = #tpu.dot_dimension_numbers<[1], [0], [0], [1], [0, 0, 1, 1], [], []>} : vector<8x512xbf16>, vector<512x128xbf16>, vector<8x128xf32> -> vector<8x128xf32>
      %c0_17 = arith.constant 0 : index
      %c0_18 = arith.constant 0 : index
      %21 = vector.load %arg6[%c0_17, %c0_18] : memref<1x128xf32, #tpu.memory_space<vmem>>, vector<1x128xf32>
      %22 = vector.broadcast %21 : vector<1x128xf32> to vector<8x128xf32>
      %23 = arith.addf %20, %22 : vector<8x128xf32>
      %c0_19 = arith.constant 0 : index
      %c0_20 = arith.constant 0 : index
      %24 = vector.load %arg7[%c0_19, %c0_20] : memref<8x128xf32, #tpu.memory_space<vmem>>, vector<8x128xf32>
      tpu.vector_store %arg7[%c0_19, %c0_20], %23 {strides = array<i32>} : memref<8x128xf32, #tpu.memory_space<vmem>>, vector<8x128xf32>,
    } else {
    }
    return
  }
  func.func @transform_0(%arg0: i32, %arg1: i32) -> (i32, i32) {
    %c0_i32 = arith.constant 0 : i32
    return %arg0, %arg1 : i32, i32
  }
  func.func @transform_1(%arg0: i32, %arg1: i32) -> (i32, i32) {
    %c0_i32 = arith.constant 0 : i32
    %c0_i32_0 = arith.constant 0 : i32
    return %arg1, %c0_i32 : i32, i32
  }
  func.func @transform_2(%arg0: i32, %arg1: i32) -> (i32, i32) {
    %c0_i32 = arith.constant 0 : i32
    %c0_i32_0 = arith.constant 0 : i32
    %c0_i32_1 = arith.constant 0 : i32
    return %c0_i32, %c0_i32_0 : i32, i32
  }
  func.func @transform_3(%arg0: i32, %arg1: i32) -> (i32, i32) {
    %c0_i32 = arith.constant 0 : i32
    %c0_i32_0 = arith.constant 0 : i32
    %c0_i32_1 = arith.constant 0 : i32
    return %c0_i32, %c0_i32_0 : i32, i32
  }
  func.func @transform_4(%arg0: i32, %arg1: i32) -> (i32, i32) {
    %c0_i32 = arith.constant 0 : i32
    %c0_i32_0 = arith.constant 0 : i32
    %c0_i32_1 = arith.constant 0 : i32
    return %c0_i32, %c0_i32_0 : i32, i32
  }
  func.func @transform_5(%arg0: i32, %arg1: i32) -> (i32, i32) {
    %c0_i32 = arith.constant 0 : i32
    %c0_i32_0 = arith.constant 0 : i32
    return %arg0, %c0_i32 : i32, i32
  }
}

</mosaic_0001>

<bundles_post_ra>
// kernel: a_call__.4
= control target key start
LH: loop header
LB: loop body
LE: loop exit
PB: predicated region body
PF: predicated region fallthrough
CT: control target
= control target key end

     0   :  { %s1750_s12 = smov 0   ;;  %s1752_s13 = smov 0   ;;  %s2108_s0 = inlined_call_operand.vmem [shape: bf16[800,256], index: 0, kind: input, shape index: {}]   ;;  %s2109_s1 = inlined_call_operand.vmem [shape: bf16[256,32], index: 1, kind: input, shape index: {}]   ;;  %s2110_s2 = inlined_call_operand.vmem [shape: f32[1,32], index: 2, kind: input, shape index: {}]   ;;  %s2111_s3 = inlined_call_operand.vmem [shape: bf16[800,32], index: 3, kind: output, shape index: {}]  }
   0x1   :  { %s1754_s14 = smov 0  }
   0x2 LB: > { %s1763_s15 = sadd.s32 4294967295, %s1696_s14   ;;  %s1765_s16 = sadd.s32 1, %s1696_s14   ;;  %s1696_s14 = sphi %s1754_s14, %s2118_s14   ;;  %s1692_s13 = sphi %s1752_s13, %s2117_s13   ;;  %s1688_s12 = sphi %s1750_s12, %s2116_s12  }
   0x3   : > { %s85_s17 = ssub.s32 %s1696_s14, %s1765_s16  ;;  %s88_s18 = sadd.s32 1, %s1692_s13 }
   0x4   : > { %p86_p0 = scmp.eq.s32.totalorder %s85_s17, 0  ;;  %p98_p1 = scmp.ne.s32.totalorder %s1692_s13, %s1688_s12 }
   0x5   : > { %p99_p2 = scmp.eq.s32.totalorder %s1763_s15, 3  ;;  %p1223_p3 = scmp.ge.s32.totalorder %s1696_s14, 1 }
   0x6   : > { %s1773_s19 = scalar_select %p86_p0, %s1692_s13, %s88_s18  }
   0x7   : > { %p1775_p4 = por %p99_p2, %p98_p1  ;;  %p149_p5 = scmp.lt.s32.totalorder %s1696_s14, 5 }
   0x9   : > { %p150_p6 = pnand %p1223_p3, %p149_p5 }
   0xa   : > { %v1578_v0 = vld [vmem:[%s2109_s1 + $0x40] sm:$0xff] (!%p150_p6)   ;;  %s1783_s23 = sshll.u32 (!%p150_p6), %s1763_s15, 5  ;;  %v1580_v2 = vld [vmem:[%s2109_s1 + $0x48] sm:$0xff] (!%p150_p6)   ;;  %v1582_v4 = vld [vmem:[%s2109_s1 + $0x50] sm:$0xff] (!%p150_p6)   ;;  %vm849_vm0 = vcmask (!%p150_p6), 257024  }
   0xb   : > { %153 = sbr.rel (%p150_p6) target bundleno = 393 (0x189), region = 32  ;;  %v1579_v1 = vld [vmem:[%s2109_s1] sm:$0xff] (!%p150_p6)   ;;  %1362 = vmatprep.subr.bf16.mxu0 (!%p150_p6), %v1578_v0  ;;  %1474 = vmatprep.subr.bf16.mxu1 (!%p150_p6), %v1578_v0  ;;  %v1581_v3 = vld [vmem:[%s2109_s1 + $0x8] sm:$0xff] (!%p150_p6)   ;;  %p184_p7 = scmp.lt.s32.totalorder (!%p150_p6), %s1783_s23, 99  ;;  %v1583_v5 = vld [vmem:[%s2109_s1 + $0x10] sm:$0xff] (!%p150_p6)  }
   0xc   : > { %1363 = vmatpush3.bf16.msra.mxu0 (!%p150_p6), %v1579_v1  ;;  %1482 = vmatpush3.bf16.msra.mxu1 (!%p150_p6), %v1579_v1  ;;  %v1584_v6 = vld [vmem:[%s2109_s1 + $0x58] sm:$0xff] (!%p150_p6)   ;;  %v1586_v8 = vld [vmem:[%s2109_s1 + $0x60] sm:$0xff] (!%p150_p6)   ;;  %v1588_v10 = vld [vmem:[%s2109_s1 + $0x68] sm:$0xff] (!%p150_p6)  }
   0xd   : > { %1364 = vmatprep.subr.bf16.mxu0 (!%p150_p6), %v1580_v2  ;;  %1475 = vmatprep.subr.bf16.mxu1 (!%p150_p6), %v1580_v2  ;;  %v1585_v7 = vld [vmem:[%s2109_s1 + $0x18] sm:$0xff] (!%p150_p6)   ;;  %v1587_v9 = vld [vmem:[%s2109_s1 + $0x20] sm:$0xff] (!%p150_p6)   ;;  %v1589_v13 = vld [vmem:[%s2109_s1 + $0x28] sm:$0xff] (!%p150_p6)  }
   0xe   : > { %v1590_v14 = vld [vmem:[%s2109_s1 + $0x70] sm:$0xff] (!%p150_p6)   ;;  %v1592_v16 = vld [vmem:[%s2109_s1 + $0x78] sm:$0xff] (!%p150_p6)   ;;  %v1873_v50 = vld [vmem:[%s2110_s2] ss:$0 sm:$0xff] (!%p150_p6) }
   0xf   : > { %v1591_v15 = vld [vmem:[%s2109_s1 + $0x30] sm:$0xff] (!%p150_p6)   ;;  %v1593_v17 = vld [vmem:[%s2109_s1 + $0x38] sm:$0xff] (!%p150_p6)  }
  0x10   : > { %1365 = vmatpush3.bf16.msra.mxu0 (!%p150_p6), %v1581_v3  ;;  %1483 = vmatpush3.bf16.msra.mxu1 (!%p150_p6), %v1581_v3 }
  0x11   : > { %1366 = vmatprep.subr.bf16.mxu0 (!%p150_p6), %v1582_v4  ;;  %1476 = vmatprep.subr.bf16.mxu1 (!%p150_p6), %v1582_v4 }
  0x12   : > { %s185_s7 = scalar_select %p184_p7, %s1783_s23, 99 }
  0x13   : > { %s890_s22 = ssub.s32 (%p1775_p4), 100, %s1783_s23 }
  0x14   : > { %1367 = vmatpush3.bf16.msra.mxu0 %v1583_v5  ;;  %1484 = vmatpush3.bf16.msra.mxu1 %v1583_v5  ;;  %s1326_s14 = sshll.u32 %s185_s7, 3  ;;  %p891_p8 = scmp.lt.s32.totalorder (%p1775_p4), %s890_s22, 32 }
  0x15   : > { %1368 = vmatprep.subr.bf16.mxu0 %v1584_v6  ;;  %1477 = vmatprep.subr.bf16.mxu1 %v1584_v6  ;;  %s1814_s24 = scalar_lea.vmem %s2108_s0, %s1326_s14  ;;  %s175_s14 = sand.u32 1, %s1688_s12  }
  0x16   : > { %v1596_v11 = vld [vmem:[%s1814_s24 + $0x4] ss:$8 sps:$4 sm:$0xff]   ;;  %v1594_v18 = vld [vmem:[%s1814_s24] ss:$8 sps:$4 sm:$0xff]   ;;  %v1600_v20 = vld [vmem:[%s1814_s24 + $0x14] ss:$8 sps:$4 sm:$0xff]  }
  0x17   : > { %v1599_v12 = vld [vmem:[%s1814_s24 + $0x84] ss:$8 sps:$4 sm:$0xff]   ;;  %560 = vmatprep.mubr.bf16.mxu0 %v1596_v11  ;;  %v1597_v19 = vld [vmem:[%s1814_s24 + $0x80] ss:$8 sps:$4 sm:$0xff]   ;;  %v1602_v21 = vld [vmem:[%s1814_s24 + $0x94] ss:$8 sps:$4 sm:$0xff]  }
  0x18   : > { %1369 = vmatpush3.bf16.msra.mxu0 %v1585_v7  ;;  %1485 = vmatpush3.bf16.msra.mxu1 %v1585_v7  ;;  %v1604_v22 = vld [vmem:[%s1814_s24 + $0x10] ss:$8 sps:$4 sm:$0xff]   ;;  %v1606_v24 = vld [vmem:[%s1814_s24 + $0x24] ss:$8 sps:$4 sm:$0xff]   ;;  %v1610_v26 = vld [vmem:[%s1814_s24 + $0x20] ss:$8 sps:$4 sm:$0xff]  }
  0x19   : > { %1370 = vmatprep.subr.bf16.mxu0 %v1586_v8  ;;  %1478 = vmatprep.subr.bf16.mxu1 %v1586_v8  ;;  %v1605_v23 = vld [vmem:[%s1814_s24 + $0x90] ss:$8 sps:$4 sm:$0xff]   ;;  %v1608_v25 = vld [vmem:[%s1814_s24 + $0xa4] ss:$8 sps:$4 sm:$0xff]   ;;  %v1611_v27 = vld [vmem:[%s1814_s24 + $0xa0] ss:$8 sps:$4 sm:$0xff]  }
  0x1a   : > { %624 = vmatprep.mubr.bf16.mxu1 %v1599_v12  ;;  %v1612_v28 = vld [vmem:[%s1814_s24 + $0x34] ss:$8 sps:$4 sm:$0xff]   ;;  %v1616_v30 = vld [vmem:[%s1814_s24 + $0x30] ss:$8 sps:$4 sm:$0xff]   ;;  %v1618_v32 = vld [vmem:[%s1814_s24 + $0x44] ss:$8 sps:$4 sm:$0xff]  }
  0x1b   : > { %v1614_v29 = vld [vmem:[%s1814_s24 + $0xb4] ss:$8 sps:$4 sm:$0xff]   ;;  %v1617_v31 = vld [vmem:[%s1814_s24 + $0xb0] ss:$8 sps:$4 sm:$0xff]   ;;  %v1620_v33 = vld [vmem:[%s1814_s24 + $0xc4] ss:$8 sps:$4 sm:$0xff]  }
  0x1c   : > { %1371 = vmatpush3.bf16.msra.mxu0 %v1587_v9  ;;  %1486 = vmatpush3.bf16.msra.mxu1 %v1587_v9  ;;  %v1622_v34 = vld [vmem:[%s1814_s24 + $0x40] ss:$8 sps:$4 sm:$0xff]   ;;  %v1624_v36 = vld [vmem:[%s1814_s24 + $0x54] ss:$8 sps:$4 sm:$0xff]   ;;  %v1628_v38 = vld [vmem:[%s1814_s24 + $0x50] ss:$8 sps:$4 sm:$0xff]  }
  0x1d   : > { %1372 = vmatprep.subr.bf16.mxu0 %v1588_v10  ;;  %1479 = vmatprep.subr.bf16.mxu1 %v1588_v10  ;;  %v1623_v35 = vld [vmem:[%s1814_s24 + $0xc0] ss:$8 sps:$4 sm:$0xff]   ;;  %v1626_v37 = vld [vmem:[%s1814_s24 + $0xd4] ss:$8 sps:$4 sm:$0xff]   ;;  %v1629_v39 = vld [vmem:[%s1814_s24 + $0xd0] ss:$8 sps:$4 sm:$0xff]  }
  0x1e   : > { %v1630_v40 = vld [vmem:[%s1814_s24 + $0x64] ss:$8 sps:$4 sm:$0xff]   ;;  %v1634_v42 = vld [vmem:[%s1814_s24 + $0x60] ss:$8 sps:$4 sm:$0xff]   ;;  %v1636_v44 = vld [vmem:[%s1814_s24 + $0x74] ss:$8 sps:$4 sm:$0xff]  }
  0x1f   : > { %v1632_v41 = vld [vmem:[%s1814_s24 + $0xe4] ss:$8 sps:$4 sm:$0xff]   ;;  %v1635_v43 = vld [vmem:[%s1814_s24 + $0xe0] ss:$8 sps:$4 sm:$0xff]   ;;  %v1638_v45 = vld [vmem:[%s1814_s24 + $0xf4] ss:$8 sps:$4 sm:$0xff]  }
  0x20   : > { %1373 = vmatpush3.bf16.msra.mxu0 %v1589_v13  ;;  %1487 = vmatpush3.bf16.msra.mxu1 %v1589_v13  ;;  %v1640_v46 = vld [vmem:[%s1814_s24 + $0x70] ss:$8 sps:$4 sm:$0xff]   ;;  %s1224_s21 = sshll.u32 %s175_s14, 7 }
  0x21   : > { %1374 = vmatprep.subr.bf16.mxu0 %v1590_v14  ;;  %1480 = vmatprep.subr.bf16.mxu1 %v1590_v14  ;;  %v1641_v47 = vld [vmem:[%s1814_s24 + $0xf0] ss:$8 sps:$4 sm:$0xff]   ;;  %s1879_s12 = scalar_lea.vmem [#allocation2], %s1224_s21   ;;  %s1359_s24 = sshll.u32 (%p1775_p4), %s1763_s15, 7 }
  0x22   : > { %s1980_s27 = scalar_lea.vmem (%p1775_p4), %s2111_s3, %s1359_s24  }
  0x24   : > { %1375 = vmatpush3.bf16.msra.mxu0 %v1591_v15  ;;  %1488 = vmatpush3.bf16.msra.mxu1 %v1591_v15 }
  0x25   : > { %1376 = vmatprep.subr.bf16.mxu0 %v1592_v16  ;;  %1481 = vmatprep.subr.bf16.mxu1 %v1592_v16 }
  0x28   : > { %1377 = vmatpush3.bf16.msra.mxu0 %v1593_v17  ;;  %1489 = vmatpush3.bf16.msra.mxu1 %v1593_v17 }
  0x2b   : > { %561 = vmatmul.mubr.bf16.vlgmr.msra.gmra.mrb[0].mxu0 %v1594_v18  ;;  %625 = vmatmul.mubr.bf16.vlgmr.msra.gmra.mrb[0].mxu1 %v1597_v19 }
  0x2c   : > { %568 = vmatprep.mubr.bf16.mxu0 %v1600_v20  ;;  %632 = vmatprep.mubr.bf16.mxu1 %v1602_v21 }
  0x33   : > { %569 = vmatmul.mubr.bf16.gmra.mrb[4].mxu0 %v1604_v22  ;;  %633 = vmatmul.mubr.bf16.gmra.mrb[4].mxu1 %v1605_v23 }
  0x34   : > { %576 = vmatprep.mubr.bf16.mxu0 %v1606_v24  ;;  %640 = vmatprep.mubr.bf16.mxu1 %v1608_v25 }
  0x3b   : > { %577 = vmatmul.mubr.bf16.gmra.mrb[8].mxu0 %v1610_v26  ;;  %641 = vmatmul.mubr.bf16.gmra.mrb[8].mxu1 %v1611_v27 }
  0x3c   : > { %584 = vmatprep.mubr.bf16.mxu0 %v1612_v28  ;;  %648 = vmatprep.mubr.bf16.mxu1 %v1614_v29 }
  0x43   : > { %585 = vmatmul.mubr.bf16.gmra.mrb[12].mxu0 %v1616_v30  ;;  %649 = vmatmul.mubr.bf16.gmra.mrb[12].mxu1 %v1617_v31 }
  0x44   : > { %592 = vmatprep.mubr.bf16.mxu0 %v1618_v32  ;;  %656 = vmatprep.mubr.bf16.mxu1 %v1620_v33 }
  0x4b   : > { %593 = vmatmul.mubr.bf16.gmra.mrb[16].mxu0 %v1622_v34  ;;  %657 = vmatmul.mubr.bf16.gmra.mrb[16].mxu1 %v1623_v35 }
  0x4c   : > { %600 = vmatprep.mubr.bf16.mxu0 %v1624_v36  ;;  %664 = vmatprep.mubr.bf16.mxu1 %v1626_v37 }
  0x53   : > { %601 = vmatmul.mubr.bf16.gmra.mrb[20].mxu0 %v1628_v38  ;;  %665 = vmatmul.mubr.bf16.gmra.mrb[20].mxu1 %v1629_v39 }
  0x54   : > { %608 = vmatprep.mubr.bf16.mxu0 %v1630_v40  ;;  %672 = vmatprep.mubr.bf16.mxu1 %v1632_v41 }
  0x5b   : > { %609 = vmatmul.mubr.bf16.gmra.mrb[24].mxu0 %v1634_v42  ;;  %673 = vmatmul.mubr.bf16.gmra.mrb[24].mxu1 %v1635_v43 }
  0x5c   : > { %616 = vmatprep.mubr.bf16.mxu0 %v1636_v44  ;;  %680 = vmatprep.mubr.bf16.mxu1 %v1638_v45 }
  0x63   : > { %617 = vmatmul.mubr.bf16.gmra.mrb[28].mxu0 %v1640_v46  ;;  %681 = vmatmul.mubr.bf16.gmra.mrb[28].mxu1 %v1641_v47 }
  0xfe   : > { %v1378_v48 = vpop.f32.mrb[0].mxu0  ;;  %v1426_v49 = vpop.f32.mrb[0].mxu1 }
  0xff   : > { %v1379_v51 = vpop.f32.mrb[1].mxu0  ;;  %v1427_v52 = vpop.f32.mrb[1].mxu1 }
 0x100   : > { %v1380_v53 = vadd.f32 %v1379_v51, %v1378_v48  ;;  %v1428_v54 = vadd.f32 %v1427_v52, %v1426_v49  ;;  %v1381_v55 = vpop.f32.mrb[2].mxu0  ;;  %v1429_v56 = vpop.f32.mrb[2].mxu1 }
 0x101   : > { %v1382_v57 = vpop.f32.mrb[3].mxu0  ;;  %v1430_v58 = vpop.f32.mrb[3].mxu1 }
 0x102   : > { %v563_v59 = vadd.f32 %v1380_v53, %v1873_v50  ;;  %v627_v60 = vadd.f32 %v1428_v54, %v1873_v50  ;;  %v1383_v61 = vadd.f32 %v1382_v57, %v1381_v55  ;;  %v1431_v62 = vadd.f32 %v1430_v58, %v1429_v56 }
 0x104   : > { %v689_v63 = vmax.f32 %v563_v59, 0.0  ;;  %v705_v0 = vmax.f32 %v627_v60, 0.0  ;;  %v566_v1 = vadd.f32 %v1383_v61, %v1873_v50  ;;  %v630_v2 = vadd.f32 %v1431_v62, %v1873_v50 }
 0x106   : > { %v1327_v3 = vpack.c.bf16 %v689_v63, %v689_v63  ;;  %v1343_v4 = vpack.c.bf16 %v705_v0, %v705_v0  ;;  %v690_v5 = vmax.f32 %v566_v1, 0.0  ;;  %v706_v6 = vmax.f32 %v630_v2, 0.0  ;;  %v1384_v7 = vpop.f32.mrb[4].mxu0  ;;  %v1432_v8 = vpop.f32.mrb[4].mxu1 }
 0x107   : > { %v1385_v9 = vpop.f32.mrb[5].mxu0  ;;  %v1433_v10 = vpop.f32.mrb[5].mxu1 }
 0x108   : > { %850 = vst.msk [vmem:[%s1879_s12] sm:$0xf] %vm849_vm0, %v1327_v3  ;;  %866 = vst.msk [vmem:[%s1879_s12 + $0x40] sm:$0xf] %vm849_vm0, %v1343_v4  ;;  %v1328_v11 = vpack.c.bf16 %v690_v5, %v690_v5  ;;  %v1344_v12 = vpack.c.bf16 %v706_v6, %v706_v6  ;;  %v1386_v13 = vadd.f32 %v1385_v9, %v1384_v7  ;;  %v1387_v15 = vpop.f32.mrb[6].mxu0  ;;  %v1435_v16 = vpop.f32.mrb[6].mxu1 }
 0x109   : > { %v1434_v14 = vadd.f32 %v1433_v10, %v1432_v8  ;;  %v1388_v17 = vpop.f32.mrb[7].mxu0  ;;  %v1436_v18 = vpop.f32.mrb[7].mxu1 }
 0x10a   : > { %851 = vst.msk [vmem:[%s1879_s12 + $0x4] sm:$0xf] %vm849_vm0, %v1328_v11  ;;  %867 = vst.msk [vmem:[%s1879_s12 + $0x44] sm:$0xf] %vm849_vm0, %v1344_v12  ;;  %v571_v19 = vadd.f32 %v1386_v13, %v1873_v50  ;;  %v1389_v21 = vadd.f32 %v1388_v17, %v1387_v15  ;;  %v1437_v22 = vadd.f32 %v1436_v18, %v1435_v16 }
 0x10b   : > { %v635_v20 = vadd.f32 %v1434_v14, %v1873_v50 }
 0x10c   : > { %v691_v23 = vmax.f32 %v571_v19, 0.0  ;;  %v574_v25 = vadd.f32 %v1389_v21, %v1873_v50  ;;  %v638_v26 = vadd.f32 %v1437_v22, %v1873_v50 }
 0x10d   : > { %v707_v24 = vmax.f32 %v635_v20, 0.0 }
 0x10e   : > { %v1329_v27 = vpack.c.bf16 %v691_v23, %v691_v23  ;;  %v692_v29 = vmax.f32 %v574_v25, 0.0  ;;  %v708_v30 = vmax.f32 %v638_v26, 0.0  ;;  %v1390_v31 = vpop.f32.mrb[8].mxu0  ;;  %v1438_v32 = vpop.f32.mrb[8].mxu1 }
 0x10f   : > { %v1345_v28 = vpack.c.bf16 %v707_v24, %v707_v24  ;;  %v1391_v33 = vpop.f32.mrb[9].mxu0  ;;  %v1439_v34 = vpop.f32.mrb[9].mxu1 }
 0x110   : > { %852 = vst.msk [vmem:[%s1879_s12 + $0x8] sm:$0xf] %vm849_vm0, %v1329_v27  ;;  %v1330_v35 = vpack.c.bf16 %v692_v29, %v692_v29  ;;  %v1346_v36 = vpack.c.bf16 %v708_v30, %v708_v30  ;;  %v1392_v37 = vadd.f32 %v1391_v33, %v1390_v31  ;;  %v1440_v38 = vadd.f32 %v1439_v34, %v1438_v32  ;;  %v1393_v39 = vpop.f32.mrb[10].mxu0  ;;  %v1441_v40 = vpop.f32.mrb[10].mxu1 }
 0x111   : > { %868 = vst.msk [vmem:[%s1879_s12 + $0x48] sm:$0xf] %vm849_vm0, %v1345_v28  ;;  %v1394_v41 = vpop.f32.mrb[11].mxu0  ;;  %v1442_v42 = vpop.f32.mrb[11].mxu1 }
 0x112   : > { %853 = vst.msk [vmem:[%s1879_s12 + $0xc] sm:$0xf] %vm849_vm0, %v1330_v35  ;;  %869 = vst.msk [vmem:[%s1879_s12 + $0x4c] sm:$0xf] %vm849_vm0, %v1346_v36  ;;  %v579_v43 = vadd.f32 %v1392_v37, %v1873_v50  ;;  %v643_v44 = vadd.f32 %v1440_v38, %v1873_v50  ;;  %v1395_v45 = vadd.f32 %v1394_v41, %v1393_v39 }
 0x113   : > { %v1443_v46 = vadd.f32 %v1442_v42, %v1441_v40 }
 0x114   : > { %v693_v47 = vmax.f32 %v579_v43, 0.0  ;;  %v709_v48 = vmax.f32 %v643_v44, 0.0  ;;  %v582_v49 = vadd.f32 %v1395_v45, %v1873_v50 }
 0x115   : > { %v646_v51 = vadd.f32 %v1443_v46, %v1873_v50 }
 0x116   : > { %v1331_v52 = vpack.c.bf16 %v693_v47, %v693_v47  ;;  %v1347_v53 = vpack.c.bf16 %v709_v48, %v709_v48  ;;  %v694_v54 = vmax.f32 %v582_v49, 0.0  ;;  %v1396_v56 = vpop.f32.mrb[12].mxu0  ;;  %v1444_v57 = vpop.f32.mrb[12].mxu1 }
 0x117   : > { %v710_v55 = vmax.f32 %v646_v51, 0.0  ;;  %v1397_v58 = vpop.f32.mrb[13].mxu0  ;;  %v1445_v59 = vpop.f32.mrb[13].mxu1 }
 0x118   : > { %854 = vst.msk [vmem:[%s1879_s12 + $0x10] sm:$0xf] %vm849_vm0, %v1331_v52  ;;  %870 = vst.msk [vmem:[%s1879_s12 + $0x50] sm:$0xf] %vm849_vm0, %v1347_v53  ;;  %v1332_v60 = vpack.c.bf16 %v694_v54, %v694_v54  ;;  %v1398_v62 = vadd.f32 %v1397_v58, %v1396_v56  ;;  %v1446_v63 = vadd.f32 %v1445_v59, %v1444_v57  ;;  %v1399_v0 = vpop.f32.mrb[14].mxu0  ;;  %v1447_v1 = vpop.f32.mrb[14].mxu1 }
 0x119   : > { %v1348_v61 = vpack.c.bf16 %v710_v55, %v710_v55  ;;  %v1400_v2 = vpop.f32.mrb[15].mxu0  ;;  %v1448_v3 = vpop.f32.mrb[15].mxu1 }
 0x11a   : > { %855 = vst.msk [vmem:[%s1879_s12 + $0x14] sm:$0xf] %vm849_vm0, %v1332_v60  ;;  %v587_v4 = vadd.f32 %v1398_v62, %v1873_v50  ;;  %v651_v5 = vadd.f32 %v1446_v63, %v1873_v50  ;;  %v1401_v6 = vadd.f32 %v1400_v2, %v1399_v0  ;;  %v1449_v7 = vadd.f32 %v1448_v3, %v1447_v1 }
 0x11b   : > { %871 = vst.msk [vmem:[%s1879_s12 + $0x54] sm:$0xf] %vm849_vm0, %v1348_v61 }
 0x11c   : > { %v695_v8 = vmax.f32 %v587_v4, 0.0  ;;  %v711_v9 = vmax.f32 %v651_v5, 0.0  ;;  %v590_v10 = vadd.f32 %v1401_v6, %v1873_v50  ;;  %v654_v11 = vadd.f32 %v1449_v7, %v1873_v50 }
 0x11e   : > { %v1333_v12 = vpack.c.bf16 %v695_v8, %v695_v8  ;;  %v1349_v13 = vpack.c.bf16 %v711_v9, %v711_v9  ;;  %v696_v14 = vmax.f32 %v590_v10, 0.0  ;;  %v712_v15 = vmax.f32 %v654_v11, 0.0  ;;  %v1402_v16 = vpop.f32.mrb[16].mxu0  ;;  %v1450_v17 = vpop.f32.mrb[16].mxu1 }
 0x11f   : > { %v1403_v18 = vpop.f32.mrb[17].mxu0  ;;  %v1451_v19 = vpop.f32.mrb[17].mxu1 }
 0x120   : > { %856 = vst.msk [vmem:[%s1879_s12 + $0x18] sm:$0xf] %vm849_vm0, %v1333_v12  ;;  %872 = vst.msk [vmem:[%s1879_s12 + $0x58] sm:$0xf] %vm849_vm0, %v1349_v13  ;;  %v1334_v20 = vpack.c.bf16 %v696_v14, %v696_v14  ;;  %v1350_v21 = vpack.c.bf16 %v712_v15, %v712_v15  ;;  %v1404_v22 = vadd.f32 %v1403_v18, %v1402_v16  ;;  %v1405_v24 = vpop.f32.mrb[18].mxu0  ;;  %v1453_v25 = vpop.f32.mrb[18].mxu1 }
 0x121   : > { %v1452_v23 = vadd.f32 %v1451_v19, %v1450_v17  ;;  %v1406_v26 = vpop.f32.mrb[19].mxu0  ;;  %v1454_v27 = vpop.f32.mrb[19].mxu1 }
 0x122   : > { %857 = vst.msk [vmem:[%s1879_s12 + $0x1c] sm:$0xf] %vm849_vm0, %v1334_v20  ;;  %873 = vst.msk [vmem:[%s1879_s12 + $0x5c] sm:$0xf] %vm849_vm0, %v1350_v21  ;;  %v595_v28 = vadd.f32 %v1404_v22, %v1873_v50  ;;  %v1407_v30 = vadd.f32 %v1406_v26, %v1405_v24  ;;  %v1455_v31 = vadd.f32 %v1454_v27, %v1453_v25 }
 0x123   : > { %v659_v29 = vadd.f32 %v1452_v23, %v1873_v50 }
 0x124   : > { %v697_v32 = vmax.f32 %v595_v28, 0.0  ;;  %v598_v34 = vadd.f32 %v1407_v30, %v1873_v50  ;;  %v662_v35 = vadd.f32 %v1455_v31, %v1873_v50 }
 0x125   : > { %v713_v33 = vmax.f32 %v659_v29, 0.0 }
 0x126   : > { %v1335_v36 = vpack.c.bf16 %v697_v32, %v697_v32  ;;  %v698_v38 = vmax.f32 %v598_v34, 0.0  ;;  %v714_v39 = vmax.f32 %v662_v35, 0.0  ;;  %v1408_v40 = vpop.f32.mrb[20].mxu0  ;;  %v1456_v41 = vpop.f32.mrb[20].mxu1 }
 0x127   : > { %v1351_v37 = vpack.c.bf16 %v713_v33, %v713_v33  ;;  %v1409_v42 = vpop.f32.mrb[21].mxu0  ;;  %v1457_v43 = vpop.f32.mrb[21].mxu1 }
 0x128   : > { %858 = vst.msk [vmem:[%s1879_s12 + $0x20] sm:$0xf] %vm849_vm0, %v1335_v36  ;;  %v1336_v44 = vpack.c.bf16 %v698_v38, %v698_v38  ;;  %v1352_v45 = vpack.c.bf16 %v714_v39, %v714_v39  ;;  %v1410_v46 = vadd.f32 %v1409_v42, %v1408_v40  ;;  %v1458_v47 = vadd.f32 %v1457_v43, %v1456_v41  ;;  %v1411_v48 = vpop.f32.mrb[22].mxu0  ;;  %v1459_v49 = vpop.f32.mrb[22].mxu1 }
 0x129   : > { %874 = vst.msk [vmem:[%s1879_s12 + $0x60] sm:$0xf] %vm849_vm0, %v1351_v37  ;;  %v1412_v51 = vpop.f32.mrb[23].mxu0  ;;  %v1460_v52 = vpop.f32.mrb[23].mxu1 }
 0x12a   : > { %859 = vst.msk [vmem:[%s1879_s12 + $0x24] sm:$0xf] %vm849_vm0, %v1336_v44  ;;  %875 = vst.msk [vmem:[%s1879_s12 + $0x64] sm:$0xf] %vm849_vm0, %v1352_v45  ;;  %v603_v53 = vadd.f32 %v1410_v46, %v1873_v50  ;;  %v667_v54 = vadd.f32 %v1458_v47, %v1873_v50  ;;  %v1413_v55 = vadd.f32 %v1412_v51, %v1411_v48 }
 0x12b   : > { %v1461_v56 = vadd.f32 %v1460_v52, %v1459_v49 }
 0x12c   : > { %v699_v57 = vmax.f32 %v603_v53, 0.0  ;;  %v715_v58 = vmax.f32 %v667_v54, 0.0  ;;  %v606_v59 = vadd.f32 %v1413_v55, %v1873_v50 }
 0x12d   : > { %v670_v60 = vadd.f32 %v1461_v56, %v1873_v50 }
 0x12e   : > { %v1337_v61 = vpack.c.bf16 %v699_v57, %v699_v57  ;;  %v1353_v62 = vpack.c.bf16 %v715_v58, %v715_v58  ;;  %v700_v63 = vmax.f32 %v606_v59, 0.0  ;;  %v1414_v1 = vpop.f32.mrb[24].mxu0  ;;  %v1462_v2 = vpop.f32.mrb[24].mxu1 }
 0x12f   : > { %v716_v0 = vmax.f32 %v670_v60, 0.0  ;;  %v1415_v3 = vpop.f32.mrb[25].mxu0  ;;  %v1463_v4 = vpop.f32.mrb[25].mxu1 }
 0x130   : > { %860 = vst.msk [vmem:[%s1879_s12 + $0x28] sm:$0xf] %vm849_vm0, %v1337_v61  ;;  %876 = vst.msk [vmem:[%s1879_s12 + $0x68] sm:$0xf] %vm849_vm0, %v1353_v62  ;;  %v1338_v5 = vpack.c.bf16 %v700_v63, %v700_v63  ;;  %v1416_v7 = vadd.f32 %v1415_v3, %v1414_v1  ;;  %v1464_v8 = vadd.f32 %v1463_v4, %v1462_v2  ;;  %v1417_v9 = vpop.f32.mrb[26].mxu0  ;;  %v1465_v10 = vpop.f32.mrb[26].mxu1 }
 0x131   : > { %v1354_v6 = vpack.c.bf16 %v716_v0, %v716_v0  ;;  %v1418_v11 = vpop.f32.mrb[27].mxu0  ;;  %v1466_v12 = vpop.f32.mrb[27].mxu1 }
 0x132   : > { %861 = vst.msk [vmem:[%s1879_s12 + $0x2c] sm:$0xf] %vm849_vm0, %v1338_v5  ;;  %v611_v13 = vadd.f32 %v1416_v7, %v1873_v50  ;;  %v675_v14 = vadd.f32 %v1464_v8, %v1873_v50  ;;  %v1419_v15 = vadd.f32 %v1418_v11, %v1417_v9  ;;  %v1467_v16 = vadd.f32 %v1466_v12, %v1465_v10 }
 0x133   : > { %877 = vst.msk [vmem:[%s1879_s12 + $0x6c] sm:$0xf] %vm849_vm0, %v1354_v6 }
 0x134   : > { %v701_v17 = vmax.f32 %v611_v13, 0.0  ;;  %v717_v18 = vmax.f32 %v675_v14, 0.0  ;;  %v614_v19 = vadd.f32 %v1419_v15, %v1873_v50  ;;  %v678_v20 = vadd.f32 %v1467_v16, %v1873_v50 }
 0x136   : > { %v1339_v21 = vpack.c.bf16 %v701_v17, %v701_v17  ;;  %v1355_v22 = vpack.c.bf16 %v717_v18, %v717_v18  ;;  %v702_v23 = vmax.f32 %v614_v19, 0.0  ;;  %v718_v24 = vmax.f32 %v678_v20, 0.0  ;;  %v1420_v25 = vpop.f32.mrb[28].mxu0  ;;  %v1468_v26 = vpop.f32.mrb[28].mxu1 }
 0x137   : > { %v1421_v27 = vpop.f32.mrb[29].mxu0  ;;  %v1469_v28 = vpop.f32.mrb[29].mxu1 }
 0x138   : > { %862 = vst.msk [vmem:[%s1879_s12 + $0x30] sm:$0xf] %vm849_vm0, %v1339_v21  ;;  %878 = vst.msk [vmem:[%s1879_s12 + $0x70] sm:$0xf] %vm849_vm0, %v1355_v22  ;;  %v1340_v29 = vpack.c.bf16 %v702_v23, %v702_v23  ;;  %v1356_v30 = vpack.c.bf16 %v718_v24, %v718_v24  ;;  %v1422_v31 = vadd.f32 %v1421_v27, %v1420_v25  ;;  %v1423_v33 = vpop.f32.mrb[30].mxu0  ;;  %v1471_v34 = vpop.f32.mrb[30].mxu1 }
 0x139   : > { %v1470_v32 = vadd.f32 %v1469_v28, %v1468_v26  ;;  %v1424_v35 = vpop.f32.mrb[31].mxu0  ;;  %v1472_v36 = vpop.f32.mrb[31].mxu1 }
 0x13a   : > { %863 = vst.msk [vmem:[%s1879_s12 + $0x34] sm:$0xf] %vm849_vm0, %v1340_v29  ;;  %879 = vst.msk [vmem:[%s1879_s12 + $0x74] sm:$0xf] %vm849_vm0, %v1356_v30  ;;  %v619_v37 = vadd.f32 %v1422_v31, %v1873_v50  ;;  %v1425_v39 = vadd.f32 %v1424_v35, %v1423_v33  ;;  %v1473_v40 = vadd.f32 %v1472_v36, %v1471_v34 }
 0x13b   : > { %v683_v38 = vadd.f32 %v1470_v32, %v1873_v50 }
 0x13c   : > { %v703_v41 = vmax.f32 %v619_v37, 0.0  ;;  %v622_v43 = vadd.f32 %v1425_v39, %v1873_v50  ;;  %v686_v44 = vadd.f32 %v1473_v40, %v1873_v50  ;;  %888 = sbr.rel (!%p1775_p4) target bundleno = 393 (0x189), region = 36 }
 0x13d   : > { %v719_v42 = vmax.f32 %v683_v38, 0.0 }
 0x13e   : > { %v1341_v45 = vpack.c.bf16 %v703_v41, %v703_v41  ;;  %v704_v47 = vmax.f32 %v622_v43, 0.0  ;;  %v720_v48 = vmax.f32 %v686_v44, 0.0 }
 0x13f   : > { %v1357_v46 = vpack.c.bf16 %v719_v42, %v719_v42 }
 0x140   : > { %864 = vst.msk [vmem:[%s1879_s12 + $0x38] sm:$0xf] %vm849_vm0, %v1341_v45  ;;  %v1342_v49 = vpack.c.bf16 %v704_v47, %v704_v47  ;;  %v1358_v51 = vpack.c.bf16 %v720_v48, %v720_v48 }
 0x141   : > { %880 = vst.msk [vmem:[%s1879_s12 + $0x78] sm:$0xf] %vm849_vm0, %v1357_v46 }
 0x142   : > { %865 = vst.msk [vmem:[%s1879_s12 + $0x3c] sm:$0xf] %vm849_vm0, %v1342_v49  ;;  %881 = vst.msk [vmem:[%s1879_s12 + $0x7c] sm:$0xf] %vm849_vm0, %v1358_v51 }
 0x143   : > { %s2120_s22 = smov (!%p891_p8, %s890_s22), 32 }
 0x144   : > { %s1311_s28 = sshll.u32 %s2120_s22, 6 }
 0x145   : > { %p1314_p9 = scmp.eq.s32.totalorder %s1311_s28, 0 }
 0x146   : > { %s1986_s29 = sshrl.u32 (!%p1314_p9), %s2120_s22, 5 }
 0x147   : > { %899 = sbr.rel (%p1314_p9) target bundleno = 393 (0x189), region = 40  ;;  %p1315_p10 = scmp.le.s32.totalorder (!%p1314_p9), %s1986_s29, 0 }
 0x14e   : > { %1176 = sbr.rel (%p1315_p10) target bundleno = 372 (0x174), region = 112  ;;  %s2113_s15 = smov (!%p1315_p10), %s1980_s27 }
 0x14f   : > { %s2114_s20 = smov (!%p1315_p10), %s1879_s12  ;;  %s1995_s23 = smov (!%p1315_p10), 0  }
 0x150   : > { %s1997_s30 = smov (!%p1315_p10), 0  }
 0x155 LB: >> { %v915_v50 = vld [vmem:[%s1704_s20] sm:$0xf]  ;;  %v917_v52 = vld [vmem:[%s1704_s20 + $0x4] sm:$0xf]  ;;  %v919_v53 = vld [vmem:[%s1704_s20 + $0x8] sm:$0xf]  ;;  %s1712_s30 = sphi %s1997_s30, %s909_s30   ;;  %s1708_s23 = sphi %s1995_s23, %s2115_s23   ;;  %s1704_s20 = sphi %s2114_s20, %s984_s20   ;;  %s1700_s15 = sphi %s2113_s15, %s985_s15  }
 0x156   : >> { %916 = vst [vmem:[%s1700_s15] sm:$0xf] %v915_v50  ;;  %918 = vst [vmem:[%s1700_s15 + $0x4] sm:$0xf] %v917_v52  ;;  %v921_v54 = vld [vmem:[%s1704_s20 + $0xc] sm:$0xf]  ;;  %s979_s4 = sadd.s32 1, %s1708_s23 }
 0x157   : >> { %920 = vst [vmem:[%s1700_s15 + $0x8] sm:$0xf] %v919_v53  ;;  %v923_v55 = vld [vmem:[%s1704_s20 + $0x10] sm:$0xf]  ;;  %v925_v56 = vld [vmem:[%s1704_s20 + $0x14] sm:$0xf]  ;;  %p980_p11 = scmp.ge.s32.totalorder %s979_s4, %s1986_s29 }
 0x158   : >> { %922 = vst [vmem:[%s1700_s15 + $0xc] sm:$0xf] %v921_v54  ;;  %924 = vst [vmem:[%s1700_s15 + $0x10] sm:$0xf] %v923_v55  ;;  %v927_v57 = vld [vmem:[%s1704_s20 + $0x18] sm:$0xf] }
 0x159   : >> { %926 = vst [vmem:[%s1700_s15 + $0x14] sm:$0xf] %v925_v56  ;;  %v929_v58 = vld [vmem:[%s1704_s20 + $0x1c] sm:$0xf]  ;;  %v931_v59 = vld [vmem:[%s1704_s20 + $0x20] sm:$0xf] }
 0x15a   : >> { %928 = vst [vmem:[%s1700_s15 + $0x18] sm:$0xf] %v927_v57  ;;  %930 = vst [vmem:[%s1700_s15 + $0x1c] sm:$0xf] %v929_v58  ;;  %v933_v60 = vld [vmem:[%s1704_s20 + $0x24] sm:$0xf] }
 0x15b   : >> { %932 = vst [vmem:[%s1700_s15 + $0x20] sm:$0xf] %v931_v59  ;;  %v935_v61 = vld [vmem:[%s1704_s20 + $0x28] sm:$0xf]  ;;  %v937_v62 = vld [vmem:[%s1704_s20 + $0x2c] sm:$0xf] }
 0x15c   : >> { %934 = vst [vmem:[%s1700_s15 + $0x24] sm:$0xf] %v933_v60  ;;  %936 = vst [vmem:[%s1700_s15 + $0x28] sm:$0xf] %v935_v61  ;;  %v939_v63 = vld [vmem:[%s1704_s20 + $0x30] sm:$0xf] }
 0x15d   : >> { %938 = vst [vmem:[%s1700_s15 + $0x2c] sm:$0xf] %v937_v62  ;;  %v941_v0 = vld [vmem:[%s1704_s20 + $0x34] sm:$0xf]  ;;  %v943_v1 = vld [vmem:[%s1704_s20 + $0x38] sm:$0xf] }
 0x15e   : >> { %940 = vst [vmem:[%s1700_s15 + $0x30] sm:$0xf] %v939_v63  ;;  %942 = vst [vmem:[%s1700_s15 + $0x34] sm:$0xf] %v941_v0  ;;  %v945_v2 = vld [vmem:[%s1704_s20 + $0x3c] sm:$0xf] }
 0x15f   : >> { %944 = vst [vmem:[%s1700_s15 + $0x38] sm:$0xf] %v943_v1  ;;  %v947_v3 = vld [vmem:[%s1704_s20 + $0x40] sm:$0xf]  ;;  %v949_v4 = vld [vmem:[%s1704_s20 + $0x44] sm:$0xf] }
 0x160   : >> { %946 = vst [vmem:[%s1700_s15 + $0x3c] sm:$0xf] %v945_v2  ;;  %948 = vst [vmem:[%s1700_s15 + $0x40] sm:$0xf] %v947_v3  ;;  %v951_v5 = vld [vmem:[%s1704_s20 + $0x48] sm:$0xf] }
 0x161   : >> { %950 = vst [vmem:[%s1700_s15 + $0x44] sm:$0xf] %v949_v4  ;;  %v953_v6 = vld [vmem:[%s1704_s20 + $0x4c] sm:$0xf]  ;;  %v955_v7 = vld [vmem:[%s1704_s20 + $0x50] sm:$0xf] }
 0x162   : >> { %952 = vst [vmem:[%s1700_s15 + $0x48] sm:$0xf] %v951_v5  ;;  %954 = vst [vmem:[%s1700_s15 + $0x4c] sm:$0xf] %v953_v6  ;;  %v957_v8 = vld [vmem:[%s1704_s20 + $0x54] sm:$0xf] }
 0x163   : >> { %956 = vst [vmem:[%s1700_s15 + $0x50] sm:$0xf] %v955_v7  ;;  %v959_v9 = vld [vmem:[%s1704_s20 + $0x58] sm:$0xf]  ;;  %v961_v10 = vld [vmem:[%s1704_s20 + $0x5c] sm:$0xf] }
 0x164   : >> { %958 = vst [vmem:[%s1700_s15 + $0x54] sm:$0xf] %v957_v8  ;;  %960 = vst [vmem:[%s1700_s15 + $0x58] sm:$0xf] %v959_v9  ;;  %v963_v11 = vld [vmem:[%s1704_s20 + $0x60] sm:$0xf] }
 0x165   : >> { %962 = vst [vmem:[%s1700_s15 + $0x5c] sm:$0xf] %v961_v10  ;;  %v965_v12 = vld [vmem:[%s1704_s20 + $0x64] sm:$0xf]  ;;  %v967_v13 = vld [vmem:[%s1704_s20 + $0x68] sm:$0xf] }
 0x166   : >> { %964 = vst [vmem:[%s1700_s15 + $0x60] sm:$0xf] %v963_v11  ;;  %966 = vst [vmem:[%s1700_s15 + $0x64] sm:$0xf] %v965_v12  ;;  %v969_v14 = vld [vmem:[%s1704_s20 + $0x6c] sm:$0xf] }
 0x167   : >> { %968 = vst [vmem:[%s1700_s15 + $0x68] sm:$0xf] %v967_v13  ;;  %v971_v15 = vld [vmem:[%s1704_s20 + $0x70] sm:$0xf]  ;;  %v973_v16 = vld [vmem:[%s1704_s20 + $0x74] sm:$0xf] }
 0x168   : >> { %970 = vst [vmem:[%s1700_s15 + $0x6c] sm:$0xf] %v969_v14  ;;  %972 = vst [vmem:[%s1700_s15 + $0x70] sm:$0xf] %v971_v15  ;;  %v975_v17 = vld [vmem:[%s1704_s20 + $0x78] sm:$0xf] }
 0x169   : >> { %974 = vst [vmem:[%s1700_s15 + $0x74] sm:$0xf] %v973_v16  ;;  %v977_v18 = vld [vmem:[%s1704_s20 + $0x7c] sm:$0xf]  ;;  %976 = vst [vmem:[%s1700_s15 + $0x78] sm:$0xf] %v975_v17 }
 0x16a   : >> { %978 = vst [vmem:[%s1700_s15 + $0x7c] sm:$0xf] %v977_v18  ;;  %s2122_s4 = smov (%p980_p11, %s979_s4), 0  ;;  %s909_s30 = sadd.s32 1, %s1712_s30  }
 0x16b   : >> { %s1316_s5 = sshll.u32 %s2122_s4, 7  ;;  %p908_p12 = scmp.ge.s32.totalorder %s909_s30, %s1986_s29 }
 0x16c   : >> { %s984_s20 = scalar_lea.vmem %s1879_s12, %s1316_s5 [#allocation2]   ;;  %s985_s15 = scalar_lea.vmem %s1980_s27, %s1316_s5  }
 0x16d   : >> { %s2115_s23 = smov %s2122_s4  ;;  %911 = sbr.rel (!%p908_p12) target bundleno = 341 (0x155), region = 118 }
 0x174 PF: > { %s2090_s6 = sand.u32 31, %s2120_s22   ;;  %s1360_s7 = sshll.u32 %s1986_s29, 7 }
 0x175   : > { %s990_s8 = scalar_lea.vmem %s1879_s12, %s1360_s7 [#allocation2]   ;;  %s992_s9 = scalar_lea.vmem %s1980_s27, %s1360_s7  }
 0x176   : > { %p1321_p13 = scmp.le.s32.totalorder %s2090_s6, 0 }
 0x177   : > { %s1714_s10 = smov (!%p1321_p13), %s992_s9   ;;  %s1718_s11 = smov (!%p1321_p13), %s990_s8  }
 0x178   : > { %1190 = sbr.rel (%p1321_p13) target bundleno = 393 (0x189), region = 123  ;;  %s1722_s14 = smov (!%p1321_p13), 0  }
 0x179   : > { %s1726_s17 = smov (!%p1321_p13), 0  }
 0x17f LB: >> { %v1002_v19 = vld [vmem:[%s1720_s11] sm:$0xf]  ;;  %s1004_s18 = sadd.s32 1, %s1724_s14  ;;  %s996_s17 = sadd.s32 1, %s1728_s17   ;;  %s1728_s17 = sphi %s1726_s17, %s996_s17   ;;  %s1724_s14 = sphi %s1722_s14, %s1723_s14   ;;  %s1720_s11 = sphi %s1718_s11, %s1009_s11   ;;  %s1716_s10 = sphi %s1714_s10, %s1010_s10  }
 0x180   : >> { %1003 = vst [vmem:[%s1716_s10] sm:$0xf] %v1002_v19  ;;  %p1005_p0 = scmp.ge.s32.totalorder %s1004_s18, %s2090_s6  ;;  %p995_p1 = scmp.ge.s32.totalorder %s996_s17, %s2090_s6 }
 0x182   : >> { %s2124_s18 = smov (%p1005_p0, %s1004_s18), 0  ;;  %998 = sbr.rel (!%p995_p1) target bundleno = 383 (0x17f), region = 129 }
 0x183   : >> { %s1322_s21 = sshll.u32 %s2124_s18, 2  ;;  %s1723_s14 = smov %s2124_s18  }
 0x184   : >> { %s1009_s11 = scalar_lea.vmem %s990_s8, %s1322_s21 [#allocation2]   ;;  %s1010_s10 = scalar_lea.vmem %s992_s9, %s1322_s21  }
 0x189 PF: > { %p10_p2 = scmp.ge.s32.totalorder %s1765_s16, 6   ;;  %s2116_s12 = smov %s1692_s13 }
 0x18a   : > { %s2117_s13 = smov %s1773_s19  ;;  %s2118_s14 = smov %s1765_s16 }
 0x18b   :  { %12 = sbr.rel (!%p10_p2) target bundleno = 2 (0x2), region = 140 }

// kernel: a_call__.5
= control target key start
LH: loop header
LB: loop body
LE: loop exit
PB: predicated region body
PF: predicated region fallthrough
CT: control target
= control target key end

     0   :  { %vm880_vm0 = vcmask 519168   ;;  %s1637_s1 = inlined_call_operand.vmem [shape: bf16[512,64], index: 1, kind: input, shape index: {}]   ;;  %s1638_s0 = inlined_call_operand.vmem [shape: bf16[162,512], index: 0, kind: input, shape index: {}]   ;;  %s1639_s2 = inlined_call_operand.vmem [shape: f32[1,64], index: 2, kind: input, shape index: {}]   ;;  %s1640_s3 = inlined_call_operand.vmem [shape: bf16[162,64], index: 3, kind: output, shape index: {}]  }
   0x1   :  { %v1189_v0 = vld [vmem:[%s1637_s1 + $0x40] sm:$0xff]   ;;  %v1193_v4 = vld [vmem:[%s1637_s1 + $0x48] sm:$0xff]   ;;  %v1197_v8 = vld [vmem:[%s1637_s1 + $0x50] sm:$0xff]  }
   0x2   :  { %v1190_v1 = vld [vmem:[%s1637_s1 + $0xc0] sm:$0xff]   ;;  %1025 = vmatprep.subr.bf16.mxu0 %v1189_v0  ;;  %v1194_v5 = vld [vmem:[%s1637_s1 + $0xc8] sm:$0xff]   ;;  %v1198_v9 = vld [vmem:[%s1637_s1 + $0xd0] sm:$0xff]  }
   0x3   :  { %v1191_v2 = vld [vmem:[%s1637_s1] sm:$0xff]   ;;  %1107 = vmatprep.subr.bf16.mxu1 %v1190_v1  ;;  %v1195_v6 = vld [vmem:[%s1637_s1 + $0x8] sm:$0xff]   ;;  %v1199_v10 = vld [vmem:[%s1637_s1 + $0x10] sm:$0xff]  }
   0x4   :  { %v1192_v3 = vld [vmem:[%s1637_s1 + $0x80] sm:$0xff]   ;;  %1026 = vmatpush3.bf16.msra.mxu0 %v1191_v2  ;;  %v1196_v7 = vld [vmem:[%s1637_s1 + $0x88] sm:$0xff]   ;;  %v1200_v11 = vld [vmem:[%s1637_s1 + $0x90] sm:$0xff]  }
   0x5   :  { %1108 = vmatpush3.bf16.msra.mxu1 %v1192_v3  ;;  %1027 = vmatprep.subr.bf16.mxu0 %v1193_v4  ;;  %v1201_v12 = vld [vmem:[%s1637_s1 + $0x58] sm:$0xff]   ;;  %v1205_v16 = vld [vmem:[%s1637_s1 + $0x60] sm:$0xff]   ;;  %v1209_v20 = vld [vmem:[%s1637_s1 + $0x68] sm:$0xff]  }
   0x6   :  { %1109 = vmatprep.subr.bf16.mxu1 %v1194_v5  ;;  %v1202_v13 = vld [vmem:[%s1637_s1 + $0xd8] sm:$0xff]   ;;  %v1206_v17 = vld [vmem:[%s1637_s1 + $0xe0] sm:$0xff]   ;;  %v1210_v21 = vld [vmem:[%s1637_s1 + $0xe8] sm:$0xff]  }
   0x7   :  { %v1203_v14 = vld [vmem:[%s1637_s1 + $0x18] sm:$0xff]   ;;  %v1207_v18 = vld [vmem:[%s1637_s1 + $0x20] sm:$0xff]   ;;  %v1211_v22 = vld [vmem:[%s1637_s1 + $0x28] sm:$0xff]  }
   0x8   :  { %1028 = vmatpush3.bf16.msra.mxu0 %v1195_v6  ;;  %v1204_v15 = vld [vmem:[%s1637_s1 + $0x98] sm:$0xff]   ;;  %v1208_v19 = vld [vmem:[%s1637_s1 + $0xa0] sm:$0xff]   ;;  %v1212_v23 = vld [vmem:[%s1637_s1 + $0xa8] sm:$0xff]  }
   0x9   :  { %1110 = vmatpush3.bf16.msra.mxu1 %v1196_v7  ;;  %1029 = vmatprep.subr.bf16.mxu0 %v1197_v8  ;;  %v1213_v24 = vld [vmem:[%s1637_s1 + $0x70] sm:$0xff]   ;;  %v1217_v28 = vld [vmem:[%s1637_s1 + $0x78] sm:$0xff]   ;;  %v55_v6 = vld [vmem:[%s1638_s0 + $0x140] sm:$0xff] }
   0xa   :  { %1111 = vmatprep.subr.bf16.mxu1 %v1198_v9  ;;  %v1214_v25 = vld [vmem:[%s1637_s1 + $0xf0] sm:$0xff]   ;;  %v1218_v29 = vld [vmem:[%s1637_s1 + $0xf8] sm:$0xff]   ;;  %v56_v7 = vld [vmem:[%s1638_s0 + $0x148] sm:$0xff] }
   0xb   :  { %v1215_v26 = vld [vmem:[%s1637_s1 + $0x30] sm:$0xff]   ;;  %v1219_v30 = vld [vmem:[%s1637_s1 + $0x38] sm:$0xff]  }
   0xc   :  { %1030 = vmatpush3.bf16.msra.mxu0 %v1199_v10  ;;  %v1216_v27 = vld [vmem:[%s1637_s1 + $0xb0] sm:$0xff]   ;;  %v1220_v31 = vld [vmem:[%s1637_s1 + $0xb8] sm:$0xff]   ;;  %v948_v10 = vcombine.high %v55_v6, %v55_v6 }
   0xd   :  { %1112 = vmatpush3.bf16.msra.mxu1 %v1200_v11  ;;  %1031 = vmatprep.subr.bf16.mxu0 %v1201_v12  ;;  %v1221_v32 = vld [vmem:[%s1638_s0] ss:$16 sps:$4 sm:$0xff]   ;;  %v1223_v33 = vld [vmem:[%s1638_s0 + $0x4] ss:$16 sps:$4 sm:$0xff]   ;;  %v1224_v34 = vld [vmem:[%s1638_s0 + $0x8] ss:$16 sps:$4 sm:$0xff]   ;;  %v950_v11 = vcombine.high %v56_v7, %v56_v7  ;;  %v947_v12 = vcombine.low %v55_v6, %v55_v6 }
   0xe   :  { %1113 = vmatprep.subr.bf16.mxu1 %v1202_v13  ;;  %v1226_v35 = vld [vmem:[%s1638_s0 + $0xc] ss:$16 sps:$4 sm:$0xff]   ;;  %566 = vmatprep.mubr.bf16.mxu0 %v1223_v33  ;;  %v1227_v36 = vld [vmem:[%s1638_s0 + $0x24] ss:$16 sps:$4 sm:$0xff]   ;;  %v1231_v38 = vld [vmem:[%s1638_s0 + $0x20] ss:$16 sps:$4 sm:$0xff]   ;;  %v949_v13 = vcombine.low %v56_v7, %v56_v7 }
   0xf   :  { %686 = vmatprep.mubr.bf16.mxu1 %v1226_v35  ;;  %v1229_v37 = vld [vmem:[%s1638_s0 + $0x2c] ss:$16 sps:$4 sm:$0xff]   ;;  %v1232_v39 = vld [vmem:[%s1638_s0 + $0x28] ss:$16 sps:$4 sm:$0xff]   ;;  %v1233_v40 = vld [vmem:[%s1638_s0 + $0x44] ss:$16 sps:$4 sm:$0xff]  }
  0x10   :  { %1032 = vmatpush3.bf16.msra.mxu0 %v1203_v14  ;;  %v1235_v41 = vld [vmem:[%s1638_s0 + $0x4c] ss:$16 sps:$4 sm:$0xff]   ;;  %v1237_v42 = vld [vmem:[%s1638_s0 + $0x40] ss:$16 sps:$4 sm:$0xff]   ;;  %v1238_v43 = vld [vmem:[%s1638_s0 + $0x48] ss:$16 sps:$4 sm:$0xff]  }
  0x11   :  { %1114 = vmatpush3.bf16.msra.mxu1 %v1204_v15  ;;  %1033 = vmatprep.subr.bf16.mxu0 %v1205_v16  ;;  %v1239_v44 = vld [vmem:[%s1638_s0 + $0x64] ss:$16 sps:$4 sm:$0xff]   ;;  %v1241_v45 = vld [vmem:[%s1638_s0 + $0x6c] ss:$16 sps:$4 sm:$0xff]   ;;  %v1243_v46 = vld [vmem:[%s1638_s0 + $0x60] ss:$16 sps:$4 sm:$0xff]  }
  0x12   :  { %1115 = vmatprep.subr.bf16.mxu1 %v1206_v17  ;;  %v1244_v47 = vld [vmem:[%s1638_s0 + $0x68] ss:$16 sps:$4 sm:$0xff]   ;;  %v1245_v48 = vld [vmem:[%s1638_s0 + $0x84] ss:$16 sps:$4 sm:$0xff]   ;;  %v1247_v49 = vld [vmem:[%s1638_s0 + $0x8c] ss:$16 sps:$4 sm:$0xff]  }
  0x13   :  { %v1249_v50 = vld [vmem:[%s1638_s0 + $0x80] ss:$16 sps:$4 sm:$0xff]   ;;  %v1250_v51 = vld [vmem:[%s1638_s0 + $0x88] ss:$16 sps:$4 sm:$0xff]   ;;  %v1251_v52 = vld [vmem:[%s1638_s0 + $0xa4] ss:$16 sps:$4 sm:$0xff]  }
  0x14   :  { %1034 = vmatpush3.bf16.msra.mxu0 %v1207_v18  ;;  %v1253_v53 = vld [vmem:[%s1638_s0 + $0xac] ss:$16 sps:$4 sm:$0xff]   ;;  %v1255_v54 = vld [vmem:[%s1638_s0 + $0xa0] ss:$16 sps:$4 sm:$0xff]   ;;  %v1256_v55 = vld [vmem:[%s1638_s0 + $0xa8] ss:$16 sps:$4 sm:$0xff]  }
  0x15   :  { %1116 = vmatpush3.bf16.msra.mxu1 %v1208_v19  ;;  %1035 = vmatprep.subr.bf16.mxu0 %v1209_v20  ;;  %v1257_v56 = vld [vmem:[%s1638_s0 + $0xc4] ss:$16 sps:$4 sm:$0xff]   ;;  %v1259_v57 = vld [vmem:[%s1638_s0 + $0xcc] ss:$16 sps:$4 sm:$0xff]   ;;  %v1261_v58 = vld [vmem:[%s1638_s0 + $0xc0] ss:$16 sps:$4 sm:$0xff]  }
  0x16   :  { %1117 = vmatprep.subr.bf16.mxu1 %v1210_v21  ;;  %v1262_v59 = vld [vmem:[%s1638_s0 + $0xc8] ss:$16 sps:$4 sm:$0xff]   ;;  %v1263_v60 = vld [vmem:[%s1638_s0 + $0xe4] ss:$16 sps:$4 sm:$0xff]   ;;  %v1265_v61 = vld [vmem:[%s1638_s0 + $0xec] ss:$16 sps:$4 sm:$0xff]  }
  0x17   :  { %v1267_v62 = vld [vmem:[%s1638_s0 + $0xe0] ss:$16 sps:$4 sm:$0xff]   ;;  %v1268_v63 = vld [vmem:[%s1638_s0 + $0xe8] ss:$16 sps:$4 sm:$0xff]   ;;  %v1269_v0 = vld [vmem:[%s1638_s0 + $0x104] ss:$16 sps:$4 sm:$0xff]  }
  0x18   :  { %1036 = vmatpush3.bf16.msra.mxu0 %v1211_v22  ;;  %v1271_v1 = vld [vmem:[%s1638_s0 + $0x10c] ss:$16 sps:$4 sm:$0xff]   ;;  %v1273_v2 = vld [vmem:[%s1638_s0 + $0x100] ss:$16 sps:$4 sm:$0xff]   ;;  %v1274_v3 = vld [vmem:[%s1638_s0 + $0x108] ss:$16 sps:$4 sm:$0xff]  }
  0x19   :  { %1118 = vmatpush3.bf16.msra.mxu1 %v1212_v23  ;;  %1037 = vmatprep.subr.bf16.mxu0 %v1213_v24  ;;  %v1275_v4 = vld [vmem:[%s1638_s0 + $0x124] ss:$16 sps:$4 sm:$0xff]   ;;  %v1277_v5 = vld [vmem:[%s1638_s0 + $0x12c] ss:$16 sps:$4 sm:$0xff]   ;;  %v1279_v8 = vld [vmem:[%s1638_s0 + $0x120] ss:$16 sps:$4 sm:$0xff]  }
  0x1a   :  { %1119 = vmatprep.subr.bf16.mxu1 %v1214_v25  ;;  %v1280_v9 = vld [vmem:[%s1638_s0 + $0x128] ss:$16 sps:$4 sm:$0xff]   ;;  %v1530_v16 = vld [vmem:[%s1639_s2] ss:$0 sm:$0xff] }
  0x1c   :  { %1038 = vmatpush3.bf16.msra.mxu0 %v1215_v26 }
  0x1d   :  { %1120 = vmatpush3.bf16.msra.mxu1 %v1216_v27  ;;  %1039 = vmatprep.subr.bf16.mxu0 %v1217_v28 }
  0x1e   :  { %1121 = vmatprep.subr.bf16.mxu1 %v1218_v29 }
  0x20   :  { %1040 = vmatpush3.bf16.msra.mxu0 %v1219_v30 }
  0x21   :  { %1122 = vmatpush3.bf16.msra.mxu1 %v1220_v31 }
  0x23   :  { %567 = vmatmul.mubr.bf16.vlgmr.msra.gmra.mrb[0].mxu0 %v1221_v32 }
  0x24   :  { %687 = vmatmul.mubr.bf16.vlgmr.msra.gmra.mrb[0].mxu1 %v1224_v34  ;;  %574 = vmatprep.mubr.bf16.mxu0 %v1227_v36 }
  0x25   :  { %694 = vmatprep.mubr.bf16.mxu1 %v1229_v37 }
  0x2b   :  { %575 = vmatmul.mubr.bf16.gmra.mrb[4].mxu0 %v1231_v38 }
  0x2c   :  { %695 = vmatmul.mubr.bf16.gmra.mrb[4].mxu1 %v1232_v39  ;;  %582 = vmatprep.mubr.bf16.mxu0 %v1233_v40 }
  0x2d   :  { %702 = vmatprep.mubr.bf16.mxu1 %v1235_v41 }
  0x33   :  { %583 = vmatmul.mubr.bf16.gmra.mrb[8].mxu0 %v1237_v42 }
  0x34   :  { %703 = vmatmul.mubr.bf16.gmra.mrb[8].mxu1 %v1238_v43  ;;  %590 = vmatprep.mubr.bf16.mxu0 %v1239_v44 }
  0x35   :  { %710 = vmatprep.mubr.bf16.mxu1 %v1241_v45 }
  0x3b   :  { %591 = vmatmul.mubr.bf16.gmra.mrb[12].mxu0 %v1243_v46 }
  0x3c   :  { %711 = vmatmul.mubr.bf16.gmra.mrb[12].mxu1 %v1244_v47  ;;  %598 = vmatprep.mubr.bf16.mxu0 %v1245_v48 }
  0x3d   :  { %718 = vmatprep.mubr.bf16.mxu1 %v1247_v49 }
  0x43   :  { %599 = vmatmul.mubr.bf16.gmra.mrb[16].mxu0 %v1249_v50 }
  0x44   :  { %719 = vmatmul.mubr.bf16.gmra.mrb[16].mxu1 %v1250_v51  ;;  %606 = vmatprep.mubr.bf16.mxu0 %v1251_v52 }
  0x45   :  { %726 = vmatprep.mubr.bf16.mxu1 %v1253_v53 }
  0x4b   :  { %607 = vmatmul.mubr.bf16.gmra.mrb[20].mxu0 %v1255_v54 }
  0x4c   :  { %727 = vmatmul.mubr.bf16.gmra.mrb[20].mxu1 %v1256_v55  ;;  %614 = vmatprep.mubr.bf16.mxu0 %v1257_v56 }
  0x4d   :  { %734 = vmatprep.mubr.bf16.mxu1 %v1259_v57 }
  0x53   :  { %615 = vmatmul.mubr.bf16.gmra.mrb[24].mxu0 %v1261_v58 }
  0x54   :  { %735 = vmatmul.mubr.bf16.gmra.mrb[24].mxu1 %v1262_v59  ;;  %622 = vmatprep.mubr.bf16.mxu0 %v1263_v60 }
  0x55   :  { %742 = vmatprep.mubr.bf16.mxu1 %v1265_v61 }
  0x5b   :  { %623 = vmatmul.mubr.bf16.gmra.mrb[28].mxu0 %v1267_v62 }
  0x5c   :  { %743 = vmatmul.mubr.bf16.gmra.mrb[28].mxu1 %v1268_v63  ;;  %630 = vmatprep.mubr.bf16.mxu0 %v1269_v0 }
  0x5d   :  { %750 = vmatprep.mubr.bf16.mxu1 %v1271_v1 }
  0x63   :  { %631 = vmatmul.mubr.bf16.gmra.mrb[32].mxu0 %v1273_v2 }
  0x64   :  { %751 = vmatmul.mubr.bf16.gmra.mrb[32].mxu1 %v1274_v3  ;;  %638 = vmatprep.mubr.bf16.mxu0 %v1275_v4 }
  0x65   :  { %758 = vmatprep.mubr.bf16.mxu1 %v1277_v5 }
  0x6b   :  { %639 = vmatmul.mubr.bf16.gmra.mrb[36].mxu0 %v1279_v8 }
  0x6c   :  { %759 = vmatmul.mubr.bf16.gmra.mrb[36].mxu1 %v1280_v9  ;;  %646 = vmatprep.mubr.bf16.mxu0 %v948_v10 }
  0x6d   :  { %766 = vmatprep.mubr.bf16.mxu1 %v950_v11 }
  0x73   :  { %647 = vmatmul.mubr.bf16.gmra.mrb[40].mxu0 %v947_v12 }
  0x74   :  { %767 = vmatmul.mubr.bf16.gmra.mrb[40].mxu1 %v949_v13 }
  0xf6   :  { %v1041_v14 = vpop.f32.mrb[0].mxu0 }
  0xf7   :  { %v1123_v15 = vpop.f32.mrb[0].mxu1  ;;  %v1042_v17 = vpop.f32.mrb[1].mxu0 }
  0xf8   :  { %v1043_v18 = vadd.f32 %v1042_v17, %v1041_v14  ;;  %v1124_v19 = vpop.f32.mrb[1].mxu1  ;;  %v1044_v20 = vpop.f32.mrb[2].mxu0 }
  0xf9   :  { %v1125_v21 = vadd.f32 %v1124_v19, %v1123_v15  ;;  %v1126_v22 = vpop.f32.mrb[2].mxu1  ;;  %v1045_v23 = vpop.f32.mrb[3].mxu0 }
  0xfa   :  { %v569_v24 = vadd.f32 %v1043_v18, %v1530_v16  ;;  %v1046_v25 = vadd.f32 %v1045_v23, %v1044_v20  ;;  %v1127_v26 = vpop.f32.mrb[3].mxu1 }
  0xfb   :  { %v1128_v27 = vadd.f32 %v1127_v26, %v1126_v22 }
  0xfc   :  { %v689_v28 = vadd.f32 %v1125_v21, %v569_v24  ;;  %v572_v29 = vadd.f32 %v1046_v25, %v1530_v16 }
  0xfe   :  { %v774_v30 = vmax.f32 %v689_v28, 0.0  ;;  %v692_v31 = vadd.f32 %v1128_v27, %v572_v29  ;;  %v1047_v32 = vpop.f32.mrb[4].mxu0 }
  0xff   :  { %v1129_v33 = vpop.f32.mrb[4].mxu1  ;;  %v1048_v34 = vpop.f32.mrb[5].mxu0 }
 0x100   :  { %v1004_v35 = vpack.c.bf16 %v774_v30, %v774_v30  ;;  %v775_v36 = vmax.f32 %v692_v31, 0.0  ;;  %v1049_v37 = vadd.f32 %v1048_v34, %v1047_v32  ;;  %v1130_v38 = vpop.f32.mrb[5].mxu1  ;;  %v1050_v39 = vpop.f32.mrb[6].mxu0 }
 0x101   :  { %v1131_v40 = vadd.f32 %v1130_v38, %v1129_v33  ;;  %v1132_v41 = vpop.f32.mrb[6].mxu1  ;;  %v1051_v42 = vpop.f32.mrb[7].mxu0 }
 0x102   :  { %881 = vst.msk [vmem:[%s1640_s3] sm:$0xf] %vm880_vm0, %v1004_v35  ;;  %v1005_v43 = vpack.c.bf16 %v775_v36, %v775_v36  ;;  %v577_v44 = vadd.f32 %v1049_v37, %v1530_v16  ;;  %v1052_v45 = vadd.f32 %v1051_v42, %v1050_v39  ;;  %v1133_v46 = vpop.f32.mrb[7].mxu1 }
 0x103   :  { %v1134_v47 = vadd.f32 %v1133_v46, %v1132_v41 }
 0x104   :  { %882 = vst.msk [vmem:[%s1640_s3 + $0x4] sm:$0xf] %vm880_vm0, %v1005_v43  ;;  %v697_v48 = vadd.f32 %v1131_v40, %v577_v44  ;;  %v580_v49 = vadd.f32 %v1052_v45, %v1530_v16 }
 0x106   :  { %v776_v50 = vmax.f32 %v697_v48, 0.0  ;;  %v700_v51 = vadd.f32 %v1134_v47, %v580_v49  ;;  %v1053_v52 = vpop.f32.mrb[8].mxu0 }
 0x107   :  { %v1135_v53 = vpop.f32.mrb[8].mxu1  ;;  %v1054_v54 = vpop.f32.mrb[9].mxu0 }
 0x108   :  { %v1006_v55 = vpack.c.bf16 %v776_v50, %v776_v50  ;;  %v777_v56 = vmax.f32 %v700_v51, 0.0  ;;  %v1055_v57 = vadd.f32 %v1054_v54, %v1053_v52  ;;  %v1136_v58 = vpop.f32.mrb[9].mxu1  ;;  %v1056_v59 = vpop.f32.mrb[10].mxu0 }
 0x109   :  { %v1137_v60 = vadd.f32 %v1136_v58, %v1135_v53  ;;  %v1138_v61 = vpop.f32.mrb[10].mxu1  ;;  %v1057_v62 = vpop.f32.mrb[11].mxu0 }
 0x10a   :  { %883 = vst.msk [vmem:[%s1640_s3 + $0x8] sm:$0xf] %vm880_vm0, %v1006_v55  ;;  %v1007_v63 = vpack.c.bf16 %v777_v56, %v777_v56  ;;  %v585_v0 = vadd.f32 %v1055_v57, %v1530_v16  ;;  %v1058_v1 = vadd.f32 %v1057_v62, %v1056_v59  ;;  %v1139_v2 = vpop.f32.mrb[11].mxu1 }
 0x10b   :  { %v1140_v3 = vadd.f32 %v1139_v2, %v1138_v61 }
 0x10c   :  { %884 = vst.msk [vmem:[%s1640_s3 + $0xc] sm:$0xf] %vm880_vm0, %v1007_v63  ;;  %v705_v4 = vadd.f32 %v1137_v60, %v585_v0  ;;  %v588_v5 = vadd.f32 %v1058_v1, %v1530_v16 }
 0x10e   :  { %v778_v6 = vmax.f32 %v705_v4, 0.0  ;;  %v708_v7 = vadd.f32 %v1140_v3, %v588_v5  ;;  %v1059_v8 = vpop.f32.mrb[12].mxu0 }
 0x10f   :  { %v1141_v9 = vpop.f32.mrb[12].mxu1  ;;  %v1060_v10 = vpop.f32.mrb[13].mxu0 }
 0x110   :  { %v1008_v11 = vpack.c.bf16 %v778_v6, %v778_v6  ;;  %v779_v12 = vmax.f32 %v708_v7, 0.0  ;;  %v1061_v13 = vadd.f32 %v1060_v10, %v1059_v8  ;;  %v1142_v14 = vpop.f32.mrb[13].mxu1  ;;  %v1062_v15 = vpop.f32.mrb[14].mxu0 }
 0x111   :  { %v1143_v17 = vadd.f32 %v1142_v14, %v1141_v9  ;;  %v1144_v18 = vpop.f32.mrb[14].mxu1  ;;  %v1063_v19 = vpop.f32.mrb[15].mxu0 }
 0x112   :  { %885 = vst.msk [vmem:[%s1640_s3 + $0x10] sm:$0xf] %vm880_vm0, %v1008_v11  ;;  %v1009_v20 = vpack.c.bf16 %v779_v12, %v779_v12  ;;  %v593_v21 = vadd.f32 %v1061_v13, %v1530_v16  ;;  %v1064_v22 = vadd.f32 %v1063_v19, %v1062_v15  ;;  %v1145_v23 = vpop.f32.mrb[15].mxu1 }
 0x113   :  { %v1146_v24 = vadd.f32 %v1145_v23, %v1144_v18 }
 0x114   :  { %886 = vst.msk [vmem:[%s1640_s3 + $0x14] sm:$0xf] %vm880_vm0, %v1009_v20  ;;  %v713_v25 = vadd.f32 %v1143_v17, %v593_v21  ;;  %v596_v26 = vadd.f32 %v1064_v22, %v1530_v16 }
 0x116   :  { %v780_v27 = vmax.f32 %v713_v25, 0.0  ;;  %v716_v28 = vadd.f32 %v1146_v24, %v596_v26  ;;  %v1065_v29 = vpop.f32.mrb[16].mxu0 }
 0x117   :  { %v1147_v30 = vpop.f32.mrb[16].mxu1  ;;  %v1066_v31 = vpop.f32.mrb[17].mxu0 }
 0x118   :  { %v1010_v32 = vpack.c.bf16 %v780_v27, %v780_v27  ;;  %v781_v33 = vmax.f32 %v716_v28, 0.0  ;;  %v1067_v34 = vadd.f32 %v1066_v31, %v1065_v29  ;;  %v1148_v35 = vpop.f32.mrb[17].mxu1  ;;  %v1068_v36 = vpop.f32.mrb[18].mxu0 }
 0x119   :  { %v1149_v37 = vadd.f32 %v1148_v35, %v1147_v30  ;;  %v1150_v38 = vpop.f32.mrb[18].mxu1  ;;  %v1069_v39 = vpop.f32.mrb[19].mxu0 }
 0x11a   :  { %887 = vst.msk [vmem:[%s1640_s3 + $0x18] sm:$0xf] %vm880_vm0, %v1010_v32  ;;  %v1011_v40 = vpack.c.bf16 %v781_v33, %v781_v33  ;;  %v601_v41 = vadd.f32 %v1067_v34, %v1530_v16  ;;  %v1070_v42 = vadd.f32 %v1069_v39, %v1068_v36  ;;  %v1151_v43 = vpop.f32.mrb[19].mxu1 }
 0x11b   :  { %v1152_v44 = vadd.f32 %v1151_v43, %v1150_v38 }
 0x11c   :  { %888 = vst.msk [vmem:[%s1640_s3 + $0x1c] sm:$0xf] %vm880_vm0, %v1011_v40  ;;  %v721_v45 = vadd.f32 %v1149_v37, %v601_v41  ;;  %v604_v46 = vadd.f32 %v1070_v42, %v1530_v16 }
 0x11e   :  { %v782_v47 = vmax.f32 %v721_v45, 0.0  ;;  %v724_v48 = vadd.f32 %v1152_v44, %v604_v46  ;;  %v1071_v49 = vpop.f32.mrb[20].mxu0 }
 0x11f   :  { %v1153_v50 = vpop.f32.mrb[20].mxu1  ;;  %v1072_v51 = vpop.f32.mrb[21].mxu0 }
 0x120   :  { %v1012_v52 = vpack.c.bf16 %v782_v47, %v782_v47  ;;  %v783_v53 = vmax.f32 %v724_v48, 0.0  ;;  %v1073_v54 = vadd.f32 %v1072_v51, %v1071_v49  ;;  %v1154_v55 = vpop.f32.mrb[21].mxu1  ;;  %v1074_v56 = vpop.f32.mrb[22].mxu0 }
 0x121   :  { %v1155_v57 = vadd.f32 %v1154_v55, %v1153_v50  ;;  %v1156_v58 = vpop.f32.mrb[22].mxu1  ;;  %v1075_v59 = vpop.f32.mrb[23].mxu0 }
 0x122   :  { %889 = vst.msk [vmem:[%s1640_s3 + $0x20] sm:$0xf] %vm880_vm0, %v1012_v52  ;;  %v1013_v60 = vpack.c.bf16 %v783_v53, %v783_v53  ;;  %v609_v61 = vadd.f32 %v1073_v54, %v1530_v16  ;;  %v1076_v62 = vadd.f32 %v1075_v59, %v1074_v56  ;;  %v1157_v63 = vpop.f32.mrb[23].mxu1 }
 0x123   :  { %v1158_v0 = vadd.f32 %v1157_v63, %v1156_v58 }
 0x124   :  { %890 = vst.msk [vmem:[%s1640_s3 + $0x24] sm:$0xf] %vm880_vm0, %v1013_v60  ;;  %v729_v1 = vadd.f32 %v1155_v57, %v609_v61  ;;  %v612_v2 = vadd.f32 %v1076_v62, %v1530_v16 }
 0x126   :  { %v784_v3 = vmax.f32 %v729_v1, 0.0  ;;  %v732_v4 = vadd.f32 %v1158_v0, %v612_v2  ;;  %v1077_v5 = vpop.f32.mrb[24].mxu0 }
 0x127   :  { %v1159_v6 = vpop.f32.mrb[24].mxu1  ;;  %v1078_v7 = vpop.f32.mrb[25].mxu0 }
 0x128   :  { %v1014_v8 = vpack.c.bf16 %v784_v3, %v784_v3  ;;  %v785_v9 = vmax.f32 %v732_v4, 0.0  ;;  %v1079_v10 = vadd.f32 %v1078_v7, %v1077_v5  ;;  %v1160_v11 = vpop.f32.mrb[25].mxu1  ;;  %v1080_v12 = vpop.f32.mrb[26].mxu0 }
 0x129   :  { %v1161_v13 = vadd.f32 %v1160_v11, %v1159_v6  ;;  %v1162_v14 = vpop.f32.mrb[26].mxu1  ;;  %v1081_v15 = vpop.f32.mrb[27].mxu0 }
 0x12a   :  { %891 = vst.msk [vmem:[%s1640_s3 + $0x28] sm:$0xf] %vm880_vm0, %v1014_v8  ;;  %v1015_v17 = vpack.c.bf16 %v785_v9, %v785_v9  ;;  %v617_v18 = vadd.f32 %v1079_v10, %v1530_v16  ;;  %v1082_v19 = vadd.f32 %v1081_v15, %v1080_v12  ;;  %v1163_v20 = vpop.f32.mrb[27].mxu1 }
 0x12b   :  { %v1164_v21 = vadd.f32 %v1163_v20, %v1162_v14 }
 0x12c   :  { %892 = vst.msk [vmem:[%s1640_s3 + $0x2c] sm:$0xf] %vm880_vm0, %v1015_v17  ;;  %v737_v22 = vadd.f32 %v1161_v13, %v617_v18  ;;  %v620_v23 = vadd.f32 %v1082_v19, %v1530_v16 }
 0x12e   :  { %v786_v24 = vmax.f32 %v737_v22, 0.0  ;;  %v740_v25 = vadd.f32 %v1164_v21, %v620_v23  ;;  %v1083_v26 = vpop.f32.mrb[28].mxu0 }
 0x12f   :  { %v1165_v27 = vpop.f32.mrb[28].mxu1  ;;  %v1084_v28 = vpop.f32.mrb[29].mxu0 }
 0x130   :  { %v1016_v29 = vpack.c.bf16 %v786_v24, %v786_v24  ;;  %v787_v30 = vmax.f32 %v740_v25, 0.0  ;;  %v1085_v31 = vadd.f32 %v1084_v28, %v1083_v26  ;;  %v1166_v32 = vpop.f32.mrb[29].mxu1  ;;  %v1086_v33 = vpop.f32.mrb[30].mxu0 }
 0x131   :  { %v1167_v34 = vadd.f32 %v1166_v32, %v1165_v27  ;;  %v1168_v35 = vpop.f32.mrb[30].mxu1  ;;  %v1087_v36 = vpop.f32.mrb[31].mxu0 }
 0x132   :  { %893 = vst.msk [vmem:[%s1640_s3 + $0x30] sm:$0xf] %vm880_vm0, %v1016_v29  ;;  %v1017_v37 = vpack.c.bf16 %v787_v30, %v787_v30  ;;  %v625_v38 = vadd.f32 %v1085_v31, %v1530_v16  ;;  %v1088_v39 = vadd.f32 %v1087_v36, %v1086_v33  ;;  %v1169_v40 = vpop.f32.mrb[31].mxu1 }
 0x133   :  { %v1170_v41 = vadd.f32 %v1169_v40, %v1168_v35 }
 0x134   :  { %894 = vst.msk [vmem:[%s1640_s3 + $0x34] sm:$0xf] %vm880_vm0, %v1017_v37  ;;  %v745_v42 = vadd.f32 %v1167_v34, %v625_v38  ;;  %v628_v43 = vadd.f32 %v1088_v39, %v1530_v16 }
 0x136   :  { %v788_v44 = vmax.f32 %v745_v42, 0.0  ;;  %v748_v45 = vadd.f32 %v1170_v41, %v628_v43  ;;  %v1089_v46 = vpop.f32.mrb[32].mxu0 }
 0x137   :  { %v1171_v47 = vpop.f32.mrb[32].mxu1  ;;  %v1090_v48 = vpop.f32.mrb[33].mxu0 }
 0x138   :  { %v1018_v49 = vpack.c.bf16 %v788_v44, %v788_v44  ;;  %v789_v50 = vmax.f32 %v748_v45, 0.0  ;;  %v1091_v51 = vadd.f32 %v1090_v48, %v1089_v46  ;;  %v1172_v52 = vpop.f32.mrb[33].mxu1  ;;  %v1092_v53 = vpop.f32.mrb[34].mxu0 }
 0x139   :  { %v1173_v54 = vadd.f32 %v1172_v52, %v1171_v47  ;;  %v1174_v55 = vpop.f32.mrb[34].mxu1  ;;  %v1093_v56 = vpop.f32.mrb[35].mxu0 }
 0x13a   :  { %895 = vst.msk [vmem:[%s1640_s3 + $0x38] sm:$0xf] %vm880_vm0, %v1018_v49  ;;  %v1019_v57 = vpack.c.bf16 %v789_v50, %v789_v50  ;;  %v633_v58 = vadd.f32 %v1091_v51, %v1530_v16  ;;  %v1094_v59 = vadd.f32 %v1093_v56, %v1092_v53  ;;  %v1175_v60 = vpop.f32.mrb[35].mxu1 }
 0x13b   :  { %v1176_v61 = vadd.f32 %v1175_v60, %v1174_v55 }
 0x13c   :  { %896 = vst.msk [vmem:[%s1640_s3 + $0x3c] sm:$0xf] %vm880_vm0, %v1019_v57  ;;  %v753_v62 = vadd.f32 %v1173_v54, %v633_v58  ;;  %v636_v63 = vadd.f32 %v1094_v59, %v1530_v16 }
 0x13e   :  { %v790_v0 = vmax.f32 %v753_v62, 0.0  ;;  %v756_v1 = vadd.f32 %v1176_v61, %v636_v63  ;;  %v1095_v2 = vpop.f32.mrb[36].mxu0 }
 0x13f   :  { %v1177_v3 = vpop.f32.mrb[36].mxu1  ;;  %v1096_v4 = vpop.f32.mrb[37].mxu0 }
 0x140   :  { %v1020_v5 = vpack.c.bf16 %v790_v0, %v790_v0  ;;  %v791_v6 = vmax.f32 %v756_v1, 0.0  ;;  %v1097_v7 = vadd.f32 %v1096_v4, %v1095_v2  ;;  %v1178_v8 = vpop.f32.mrb[37].mxu1  ;;  %v1098_v9 = vpop.f32.mrb[38].mxu0 }
 0x141   :  { %v1179_v10 = vadd.f32 %v1178_v8, %v1177_v3  ;;  %v1180_v11 = vpop.f32.mrb[38].mxu1  ;;  %v1099_v12 = vpop.f32.mrb[39].mxu0 }
 0x142   :  { %897 = vst.msk [vmem:[%s1640_s3 + $0x40] sm:$0xf] %vm880_vm0, %v1020_v5  ;;  %v1021_v13 = vpack.c.bf16 %v791_v6, %v791_v6  ;;  %v641_v14 = vadd.f32 %v1097_v7, %v1530_v16  ;;  %v1100_v15 = vadd.f32 %v1099_v12, %v1098_v9  ;;  %v1181_v17 = vpop.f32.mrb[39].mxu1 }
 0x143   :  { %v1182_v18 = vadd.f32 %v1181_v17, %v1180_v11 }
 0x144   :  { %898 = vst.msk [vmem:[%s1640_s3 + $0x44] sm:$0xf] %vm880_vm0, %v1021_v13  ;;  %v761_v19 = vadd.f32 %v1179_v10, %v641_v14  ;;  %v644_v20 = vadd.f32 %v1100_v15, %v1530_v16 }
 0x146   :  { %v792_v21 = vmax.f32 %v761_v19, 0.0  ;;  %v764_v22 = vadd.f32 %v1182_v18, %v644_v20  ;;  %v1101_v23 = vpop.f32.mrb[40].mxu0 }
 0x147   :  { %v1183_v24 = vpop.f32.mrb[40].mxu1  ;;  %v1102_v25 = vpop.f32.mrb[41].mxu0 }
 0x148   :  { %v1022_v26 = vpack.c.bf16 %v792_v21, %v792_v21  ;;  %v793_v27 = vmax.f32 %v764_v22, 0.0  ;;  %v1103_v28 = vadd.f32 %v1102_v25, %v1101_v23  ;;  %v1184_v29 = vpop.f32.mrb[41].mxu1  ;;  %v1104_v30 = vpop.f32.mrb[42].mxu0 }
 0x149   :  { %v1185_v31 = vadd.f32 %v1184_v29, %v1183_v24  ;;  %v1186_v32 = vpop.f32.mrb[42].mxu1  ;;  %v1105_v33 = vpop.f32.mrb[43].mxu0 }
 0x14a   :  { %899 = vst.msk [vmem:[%s1640_s3 + $0x48] sm:$0xf] %vm880_vm0, %v1022_v26  ;;  %v1023_v34 = vpack.c.bf16 %v793_v27, %v793_v27  ;;  %v649_v35 = vadd.f32 %v1103_v28, %v1530_v16  ;;  %v1187_v36 = vpop.f32.mrb[43].mxu1 }
 0x14c   :  { %900 = vst.msk [vmem:[%s1640_s3 + $0x4c] sm:$0xf] %vm880_vm0, %v1023_v34  ;;  %v769_v37 = vadd.f32 %v1185_v31, %v649_v35 }
 0x14e   :  { %v794_v38 = vmax.f32 %v769_v37, 0.0 }
 0x150   :  { %v1024_v39 = vpack.c.bf16 %v794_v38, %v794_v38 }
 0x152   :  { %901 = vst.msk [vmem:[%s1640_s3 + $0x50] sm:$0xf] %vm880_vm0, %v1024_v39 }

// kernel: a_call__.6
= control target key start
LH: loop header
LB: loop body
LE: loop exit
PB: predicated region body
PF: predicated region fallthrough
CT: control target
= control target key end

     0   :  { %v1247_v34 = vmov 0.0   ;;  %vm1248_vm0 = vmmov 0   ;;  %vm516_vm1 = vcmask 523264   ;;  %vm868_vm2 = vcmask 519168   ;;  %s1599_s1 = inlined_call_operand.vmem [shape: bf16[576,64], index: 1, kind: input, shape index: {}]   ;;  %s1600_s0 = inlined_call_operand.vmem [shape: bf16[98,576], index: 0, kind: input, shape index: {}]   ;;  %s1601_s2 = inlined_call_operand.vmem [shape: f32[1,64], index: 2, kind: input, shape index: {}]   ;;  %s1602_s3 = inlined_call_operand.vmem [shape: bf16[98,64], index: 3, kind: output, shape index: {}]  }
   0x1   :  { %v1164_v0 = vld [vmem:[%s1599_s1 + $0x40] sm:$0xff]   ;;  %v1168_v4 = vld [vmem:[%s1599_s1 + $0x48] sm:$0xff]   ;;  %v1172_v8 = vld [vmem:[%s1599_s1 + $0x50] sm:$0xff]  }
   0x2   :  { %v1165_v1 = vld [vmem:[%s1599_s1 + $0xc0] sm:$0xff]   ;;  %991 = vmatprep.subr.bf16.mxu0 %v1164_v0  ;;  %v1169_v5 = vld [vmem:[%s1599_s1 + $0xc8] sm:$0xff]   ;;  %v1173_v9 = vld [vmem:[%s1599_s1 + $0xd0] sm:$0xff]  }
   0x3   :  { %v1166_v2 = vld [vmem:[%s1599_s1] sm:$0xff]   ;;  %1049 = vmatprep.subr.bf16.mxu1 %v1165_v1  ;;  %v1170_v6 = vld [vmem:[%s1599_s1 + $0x8] sm:$0xff]   ;;  %v1174_v10 = vld [vmem:[%s1599_s1 + $0x10] sm:$0xff]  }
   0x4   :  { %v1167_v3 = vld [vmem:[%s1599_s1 + $0x80] sm:$0xff]   ;;  %992 = vmatpush3.bf16.msra.mxu0 %v1166_v2  ;;  %v1171_v7 = vld [vmem:[%s1599_s1 + $0x88] sm:$0xff]   ;;  %v1175_v11 = vld [vmem:[%s1599_s1 + $0x90] sm:$0xff]  }
   0x5   :  { %1050 = vmatpush3.bf16.msra.mxu1 %v1167_v3  ;;  %993 = vmatprep.subr.bf16.mxu0 %v1168_v4  ;;  %v1176_v12 = vld [vmem:[%s1599_s1 + $0x58] sm:$0xff]   ;;  %v1180_v16 = vld [vmem:[%s1599_s1 + $0x60] sm:$0xff]   ;;  %v1184_v20 = vld [vmem:[%s1599_s1 + $0x68] sm:$0xff]  }
   0x6   :  { %1051 = vmatprep.subr.bf16.mxu1 %v1169_v5  ;;  %v1177_v13 = vld [vmem:[%s1599_s1 + $0xd8] sm:$0xff]   ;;  %v1181_v17 = vld [vmem:[%s1599_s1 + $0xe0] sm:$0xff]   ;;  %v1185_v21 = vld [vmem:[%s1599_s1 + $0xe8] sm:$0xff]  }
   0x7   :  { %v1178_v14 = vld [vmem:[%s1599_s1 + $0x18] sm:$0xff]   ;;  %v1182_v18 = vld [vmem:[%s1599_s1 + $0x20] sm:$0xff]   ;;  %v1186_v22 = vld [vmem:[%s1599_s1 + $0x28] sm:$0xff]  }
   0x8   :  { %994 = vmatpush3.bf16.msra.mxu0 %v1170_v6  ;;  %v1179_v15 = vld [vmem:[%s1599_s1 + $0x98] sm:$0xff]   ;;  %v1183_v19 = vld [vmem:[%s1599_s1 + $0xa0] sm:$0xff]   ;;  %v1187_v23 = vld [vmem:[%s1599_s1 + $0xa8] sm:$0xff]  }
   0x9   :  { %1052 = vmatpush3.bf16.msra.mxu1 %v1171_v7  ;;  %995 = vmatprep.subr.bf16.mxu0 %v1172_v8  ;;  %v1188_v24 = vld [vmem:[%s1599_s1 + $0x70] sm:$0xff]   ;;  %v1192_v28 = vld [vmem:[%s1599_s1 + $0x78] sm:$0xff]   ;;  %v1201_v36 = vld [vmem:[%s1600_s0 + $0xc] ss:$20 sps:$4 sm:$0xff]  }
   0xa   :  { %1053 = vmatprep.subr.bf16.mxu1 %v1173_v9  ;;  %v1189_v25 = vld [vmem:[%s1599_s1 + $0xf0] sm:$0xff]   ;;  %v1193_v29 = vld [vmem:[%s1599_s1 + $0xf8] sm:$0xff]   ;;  %v1202_v37 = vld [vmem:[%s1599_s1 + $0x100] sm:$0xff]   ;;  %658 = vmatprep.mubr.bf16.mxu1 %v1201_v36 }
   0xb   :  { %v1190_v26 = vld [vmem:[%s1599_s1 + $0x30] sm:$0xff]   ;;  %v1194_v30 = vld [vmem:[%s1599_s1 + $0x38] sm:$0xff]   ;;  %v1203_v38 = vld [vmem:[%s1600_s0 + $0x2c] ss:$20 sps:$4 sm:$0xff]  }
   0xc   :  { %996 = vmatpush3.bf16.msra.mxu0 %v1174_v10  ;;  %v1191_v27 = vld [vmem:[%s1599_s1 + $0xb0] sm:$0xff]   ;;  %v1195_v31 = vld [vmem:[%s1599_s1 + $0xb8] sm:$0xff]   ;;  %v1213_v43 = vld [vmem:[%s1599_s1 + $0x108] sm:$0xff]  }
   0xd   :  { %1054 = vmatpush3.bf16.msra.mxu1 %v1175_v11  ;;  %997 = vmatprep.subr.bf16.mxu0 %v1176_v12  ;;  %v1196_v32 = vld [vmem:[%s1600_s0] ss:$20 sps:$4 sm:$0xff]   ;;  %v1198_v33 = vld [vmem:[%s1600_s0 + $0x4] ss:$20 sps:$4 sm:$0xff]   ;;  %v1199_v35 = vld [vmem:[%s1600_s0 + $0x8] ss:$20 sps:$4 sm:$0xff]  }
   0xe   :  { %1055 = vmatprep.subr.bf16.mxu1 %v1177_v13  ;;  %570 = vmatprep.mubr.bf16.mxu0 %v1198_v33  ;;  %v1205_v39 = vld [vmem:[%s1600_s0 + $0x34] ss:$20 sps:$4 sm:$0xff]   ;;  %v1208_v41 = vld [vmem:[%s1600_s0 + $0x30] ss:$20 sps:$4 sm:$0xff]   ;;  %v1215_v47 = vld [vmem:[%s1600_s0 + $0x58] ss:$20 sps:$4 sm:$0xff]  }
   0xf   :  { %v1207_v40 = vld [vmem:[%s1600_s0 + $0x28] ss:$20 sps:$4 sm:$0xff]   ;;  %v1222_v45 = vld [vmem:[%s1599_s1 + $0x110] sm:$0xff]   ;;  %v1218_v49 = vld [vmem:[%s1600_s0 + $0x84] ss:$20 sps:$4 sm:$0xff]  }
  0x10   :  { %998 = vmatpush3.bf16.msra.mxu0 %v1178_v14  ;;  %v1209_v42 = vld [vmem:[%s1600_s0 + $0x54] ss:$20 sps:$4 sm:$0xff]   ;;  %v1211_v44 = vld [vmem:[%s1600_s0 + $0x5c] ss:$20 sps:$4 sm:$0xff]   ;;  %v1220_v51 = vld [vmem:[%s1600_s0 + $0x78] ss:$20 sps:$4 sm:$0xff]  }
  0x11   :  { %1056 = vmatpush3.bf16.msra.mxu1 %v1179_v15  ;;  %999 = vmatprep.subr.bf16.mxu0 %v1180_v16  ;;  %v1214_v46 = vld [vmem:[%s1600_s0 + $0x50] ss:$20 sps:$4 sm:$0xff]   ;;  %v1235_v50 = vld [vmem:[%s1599_s1 + $0x118] sm:$0xff]   ;;  %v1221_v52 = vld [vmem:[%s1600_s0 + $0x80] ss:$20 sps:$4 sm:$0xff]  }
  0x12   :  { %1057 = vmatprep.subr.bf16.mxu1 %v1181_v17  ;;  %v1216_v48 = vld [vmem:[%s1600_s0 + $0x7c] ss:$20 sps:$4 sm:$0xff]   ;;  %v1223_v53 = vld [vmem:[%s1600_s0 + $0xa4] ss:$20 sps:$4 sm:$0xff]   ;;  %v1225_v54 = vld [vmem:[%s1600_s0 + $0xac] ss:$20 sps:$4 sm:$0xff]  }
  0x13   :  { %v1227_v55 = vld [vmem:[%s1600_s0 + $0xa0] ss:$20 sps:$4 sm:$0xff]   ;;  %v1228_v56 = vld [vmem:[%s1600_s0 + $0xa8] ss:$20 sps:$4 sm:$0xff]   ;;  %v1234_v62 = vld [vmem:[%s1600_s0 + $0xd0] ss:$20 sps:$4 sm:$0xff]  }
  0x14   :  { %1000 = vmatpush3.bf16.msra.mxu0 %v1182_v18  ;;  %v1229_v57 = vld [vmem:[%s1600_s0 + $0xcc] ss:$20 sps:$4 sm:$0xff]   ;;  %v1231_v58 = vld [vmem:[%s1600_s0 + $0xd4] ss:$20 sps:$4 sm:$0xff]   ;;  %v52_v60 = vld [vmem:[%s1600_s0 + $0xf8] sm:$0xff] }
  0x15   :  { %1058 = vmatpush3.bf16.msra.mxu1 %v1183_v19  ;;  %1001 = vmatprep.subr.bf16.mxu0 %v1184_v20  ;;  %v51_v59 = vld [vmem:[%s1600_s0 + $0xf0] sm:$0xff]  ;;  %v1233_v61 = vld [vmem:[%s1600_s0 + $0xc8] ss:$20 sps:$4 sm:$0xff]   ;;  %v920_v0 = vcombine.high %v52_v60, %v52_v60  ;;  %v919_v2 = vcombine.low %v52_v60, %v52_v60  ;;  %v1242_v5 = vld [vmem:[%s1600_s0 + $0x38] ss:$20 sps:$4 sm:$0xff]  }
  0x16   :  { %1059 = vmatprep.subr.bf16.mxu1 %v1185_v21  ;;  %v918_v63 = vcombine.high %v51_v59, %v51_v59  ;;  %v917_v1 = vcombine.low %v51_v59, %v51_v59  ;;  %v1240_v3 = vld [vmem:[%s1600_s0 + $0x10] ss:$20 sps:$4 sm:$0xff]   ;;  %v1243_v6 = vld [vmem:[%s1600_s0 + $0xd8] ss:$20 sps:$4 sm:$0xff]   ;;  %v1244_v7 = vld [vmem:[%s1600_s0 + $0x60] ss:$20 sps:$4 sm:$0xff]  }
  0x17   :  { %v1241_v4 = vld [vmem:[%s1600_s0 + $0xb0] ss:$20 sps:$4 sm:$0xff]   ;;  %v1245_v8 = vld [vmem:[%s1600_s0 + $0x100] ss:$0 sps:$4 sm:$0xff]   ;;  %v1246_v9 = vld [vmem:[%s1600_s0 + $0x88] ss:$20 sps:$4 sm:$0xff]  }
  0x18   :  { %1002 = vmatpush3.bf16.msra.mxu0 %v1186_v22  ;;  %v1508_v11 = vld [vmem:[%s1601_s2] ss:$0 sm:$0xff] }
  0x19   :  { %1060 = vmatpush3.bf16.msra.mxu1 %v1187_v23  ;;  %1003 = vmatprep.subr.bf16.mxu0 %v1188_v24 }
  0x1a   :  { %1061 = vmatprep.subr.bf16.mxu1 %v1189_v25 }
  0x1c   :  { %1004 = vmatpush3.bf16.msra.mxu0 %v1190_v26 }
  0x1d   :  { %1062 = vmatpush3.bf16.msra.mxu1 %v1191_v27  ;;  %1005 = vmatprep.subr.bf16.mxu0 %v1192_v28 }
  0x1e   :  { %1063 = vmatprep.subr.bf16.mxu1 %v1193_v29 }
  0x20   :  { %1006 = vmatpush3.bf16.msra.mxu0 %v1194_v30 }
  0x21   :  { %1064 = vmatpush3.bf16.msra.mxu1 %v1195_v31  ;;  %1118 = vmatprep.subr.bf16.mxu0 %v1247_v34 }
  0x22   :  { %1154 = vmatprep.subr.bf16.mxu1 %v1247_v34 }
  0x23   :  { %571 = vmatmul.mubr.bf16.vlgmr.msra.gmra.mrb[0].mxu0 %v1196_v32 }
  0x24   :  { %659 = vmatmul.mubr.bf16.vlgmr.msra.gmra.mrb[0].mxu1 %v1199_v35  ;;  %1119 = vmatpush3.bf16.msra.mxu0 %v1202_v37 }
  0x25   :  { %578 = vmatprep.mubr.bf16.mxu0 %v1203_v38  ;;  %1158 = vmatpush3.bf16.msra.mxu1 %v1202_v37 }
  0x26   :  { %666 = vmatprep.mubr.bf16.mxu1 %v1205_v39  ;;  %1120 = vmatprep.subr.bf16.mxu0 %v1247_v34 }
  0x27   :  { %1155 = vmatprep.subr.bf16.mxu1 %v1247_v34 }
  0x28   :  { %1121 = vmatpush3.bf16.msra.mxu0 %v1213_v43 }
  0x29   :  { %1159 = vmatpush3.bf16.msra.mxu1 %v1213_v43  ;;  %1122 = vmatprep.subr.bf16.mxu0 %v1247_v34 }
  0x2a   :  { %1156 = vmatprep.subr.bf16.mxu1 %v1247_v34 }
  0x2b   :  { %579 = vmatmul.mubr.bf16.gmra.mrb[4].mxu0 %v1207_v40 }
  0x2c   :  { %667 = vmatmul.mubr.bf16.gmra.mrb[4].mxu1 %v1208_v41  ;;  %586 = vmatprep.mubr.bf16.mxu0 %v1209_v42 }
  0x2d   :  { %674 = vmatprep.mubr.bf16.mxu1 %v1211_v44  ;;  %1123 = vmatpush3.bf16.msra.mxu0 %v1222_v45 }
  0x2e   :  { %1160 = vmatpush3.bf16.msra.mxu1 %v1222_v45  ;;  %1124 = vmatprep.subr.bf16.mxu0 %v1247_v34 }
  0x2f   :  { %1157 = vmatprep.subr.bf16.mxu1 %v1247_v34 }
  0x31   :  { %1125 = vmatpush3.bf16.msra.mxu0 %v1235_v50 }
  0x32   :  { %1161 = vmatpush3.bf16.msra.mxu1 %v1235_v50 }
  0x33   :  { %587 = vmatmul.mubr.bf16.gmra.mrb[8].mxu0 %v1214_v46 }
  0x34   :  { %675 = vmatmul.mubr.bf16.gmra.mrb[8].mxu1 %v1215_v47  ;;  %594 = vmatprep.mubr.bf16.mxu0 %v1216_v48 }
  0x35   :  { %682 = vmatprep.mubr.bf16.mxu1 %v1218_v49 }
  0x3b   :  { %595 = vmatmul.mubr.bf16.gmra.mrb[12].mxu0 %v1220_v51 }
  0x3c   :  { %683 = vmatmul.mubr.bf16.gmra.mrb[12].mxu1 %v1221_v52  ;;  %602 = vmatprep.mubr.bf16.mxu0 %v1223_v53 }
  0x3d   :  { %690 = vmatprep.mubr.bf16.mxu1 %v1225_v54 }
  0x43   :  { %603 = vmatmul.mubr.bf16.gmra.mrb[16].mxu0 %v1227_v55 }
  0x44   :  { %691 = vmatmul.mubr.bf16.gmra.mrb[16].mxu1 %v1228_v56  ;;  %610 = vmatprep.mubr.bf16.mxu0 %v1229_v57 }
  0x45   :  { %698 = vmatprep.mubr.bf16.mxu1 %v1231_v58 }
  0x4b   :  { %611 = vmatmul.mubr.bf16.gmra.mrb[20].mxu0 %v1233_v61 }
  0x4c   :  { %699 = vmatmul.mubr.bf16.gmra.mrb[20].mxu1 %v1234_v62  ;;  %618 = vmatprep.mubr.bf16.mxu0 %v918_v63 }
  0x4d   :  { %706 = vmatprep.mubr.bf16.mxu1 %v920_v0 }
  0x53   :  { %619 = vmatmul.mubr.bf16.gmra.mrb[24].mxu0 %v917_v1 }
  0x54   :  { %707 = vmatmul.mubr.bf16.gmra.mrb[24].mxu1 %v919_v2  ;;  %1126 = vmatprep.mubr.msk.bf16.mxu0 %vm1248_vm0, %v1247_v34 }
  0x55   :  { %1142 = vmatprep.mubr.msk.bf16.mxu1 %vm1248_vm0, %v1247_v34 }
  0x5b   :  { %1127 = vmatmul.mubr.msk.bf16.vlgmr.msra.gmra.mrb[28].mxu0 %vm516_vm1, %v1240_v3 }
  0x5c   :  { %1143 = vmatmul.mubr.msk.bf16.vlgmr.msra.gmra.mrb[28].mxu1 %vm516_vm1, %v1241_v4  ;;  %1130 = vmatprep.mubr.msk.bf16.mxu0 %vm1248_vm0, %v1247_v34 }
  0x5d   :  { %1146 = vmatprep.mubr.msk.bf16.mxu1 %vm1248_vm0, %v1247_v34 }
  0x63   :  { %1131 = vmatmul.mubr.msk.bf16.gmra.mrb[32].mxu0 %vm516_vm1, %v1242_v5 }
  0x64   :  { %1147 = vmatmul.mubr.msk.bf16.gmra.mrb[32].mxu1 %vm516_vm1, %v1243_v6  ;;  %1134 = vmatprep.mubr.msk.bf16.mxu0 %vm1248_vm0, %v1247_v34 }
  0x65   :  { %1150 = vmatprep.mubr.msk.bf16.mxu1 %vm1248_vm0, %v1247_v34 }
  0x6b   :  { %1135 = vmatmul.mubr.msk.bf16.gmra.mrb[36].mxu0 %vm516_vm1, %v1244_v7 }
  0x6c   :  { %1151 = vmatmul.mubr.msk.bf16.gmra.mrb[36].mxu1 %vm516_vm1, %v1245_v8  ;;  %1138 = vmatprep.mubr.msk.bf16.mxu0 %vm1248_vm0, %v1247_v34 }
  0x73   :  { %1139 = vmatmul.mubr.msk.bf16.gmra.mrb[40].mxu0 %vm516_vm1, %v1246_v9 }
  0xf6   :  { %v1007_v10 = vpop.f32.mrb[0].mxu0 }
  0xf7   :  { %v1008_v12 = vpop.f32.mrb[1].mxu0  ;;  %v1065_v13 = vpop.f32.mrb[0].mxu1 }
  0xf8   :  { %v1009_v14 = vadd.f32 %v1008_v12, %v1007_v10  ;;  %v1010_v15 = vpop.f32.mrb[2].mxu0  ;;  %v1066_v16 = vpop.f32.mrb[1].mxu1 }
  0xf9   :  { %v1011_v17 = vpop.f32.mrb[3].mxu0  ;;  %v1067_v18 = vadd.f32 %v1066_v16, %v1065_v13  ;;  %v1068_v19 = vpop.f32.mrb[2].mxu1 }
  0xfa   :  { %v573_v20 = vadd.f32 %v1009_v14, %v1508_v11  ;;  %v1012_v21 = vadd.f32 %v1011_v17, %v1010_v15  ;;  %v1069_v22 = vpop.f32.mrb[3].mxu1 }
  0xfb   :  { %v1070_v23 = vadd.f32 %v1069_v22, %v1068_v19 }
  0xfc   :  { %v576_v24 = vadd.f32 %v1012_v21, %v1508_v11  ;;  %v1512_v25 = vadd.f32 %v1067_v18, %v573_v20 }
  0xfe   :  { %v1013_v26 = vpop.f32.mrb[4].mxu0  ;;  %v1514_v27 = vadd.f32 %v1070_v23, %v576_v24 }
  0xff   :  { %v1014_v28 = vpop.f32.mrb[5].mxu0  ;;  %v1071_v29 = vpop.f32.mrb[4].mxu1 }
 0x100   :  { %v1015_v30 = vadd.f32 %v1014_v28, %v1013_v26  ;;  %v1016_v31 = vpop.f32.mrb[6].mxu0  ;;  %v1072_v32 = vpop.f32.mrb[5].mxu1 }
 0x101   :  { %v1017_v33 = vpop.f32.mrb[7].mxu0  ;;  %v1073_v34 = vadd.f32 %v1072_v32, %v1071_v29  ;;  %v1074_v35 = vpop.f32.mrb[6].mxu1 }
 0x102   :  { %v581_v36 = vadd.f32 %v1015_v30, %v1508_v11  ;;  %v1018_v37 = vadd.f32 %v1017_v33, %v1016_v31  ;;  %v1075_v38 = vpop.f32.mrb[7].mxu1 }
 0x103   :  { %v1076_v39 = vadd.f32 %v1075_v38, %v1074_v35 }
 0x104   :  { %v584_v40 = vadd.f32 %v1018_v37, %v1508_v11  ;;  %v1518_v41 = vadd.f32 %v1073_v34, %v581_v36 }
 0x106   :  { %v1019_v42 = vpop.f32.mrb[8].mxu0  ;;  %v1520_v43 = vadd.f32 %v1076_v39, %v584_v40 }
 0x107   :  { %v1020_v44 = vpop.f32.mrb[9].mxu0  ;;  %v1077_v45 = vpop.f32.mrb[8].mxu1 }
 0x108   :  { %v1021_v46 = vadd.f32 %v1020_v44, %v1019_v42  ;;  %v1022_v47 = vpop.f32.mrb[10].mxu0  ;;  %v1078_v48 = vpop.f32.mrb[9].mxu1 }
 0x109   :  { %v1023_v49 = vpop.f32.mrb[11].mxu0  ;;  %v1079_v50 = vadd.f32 %v1078_v48, %v1077_v45  ;;  %v1080_v51 = vpop.f32.mrb[10].mxu1 }
 0x10a   :  { %v589_v52 = vadd.f32 %v1021_v46, %v1508_v11  ;;  %v1024_v53 = vadd.f32 %v1023_v49, %v1022_v47  ;;  %v1081_v54 = vpop.f32.mrb[11].mxu1 }
 0x10b   :  { %v1082_v55 = vadd.f32 %v1081_v54, %v1080_v51 }
 0x10c   :  { %v592_v56 = vadd.f32 %v1024_v53, %v1508_v11  ;;  %v1524_v57 = vadd.f32 %v1079_v50, %v589_v52 }
 0x10e   :  { %v1025_v58 = vpop.f32.mrb[12].mxu0  ;;  %v1526_v59 = vadd.f32 %v1082_v55, %v592_v56 }
 0x10f   :  { %v1026_v60 = vpop.f32.mrb[13].mxu0  ;;  %v1083_v61 = vpop.f32.mrb[12].mxu1 }
 0x110   :  { %v1027_v62 = vadd.f32 %v1026_v60, %v1025_v58  ;;  %v1028_v63 = vpop.f32.mrb[14].mxu0  ;;  %v1084_v0 = vpop.f32.mrb[13].mxu1 }
 0x111   :  { %v1029_v1 = vpop.f32.mrb[15].mxu0  ;;  %v1085_v2 = vadd.f32 %v1084_v0, %v1083_v61  ;;  %v1086_v3 = vpop.f32.mrb[14].mxu1 }
 0x112   :  { %v597_v4 = vadd.f32 %v1027_v62, %v1508_v11  ;;  %v1030_v5 = vadd.f32 %v1029_v1, %v1028_v63  ;;  %v1087_v6 = vpop.f32.mrb[15].mxu1 }
 0x113   :  { %v1088_v7 = vadd.f32 %v1087_v6, %v1086_v3 }
 0x114   :  { %v600_v8 = vadd.f32 %v1030_v5, %v1508_v11  ;;  %v1530_v9 = vadd.f32 %v1085_v2, %v597_v4 }
 0x116   :  { %v1031_v10 = vpop.f32.mrb[16].mxu0  ;;  %v1532_v12 = vadd.f32 %v1088_v7, %v600_v8 }
 0x117   :  { %v1032_v13 = vpop.f32.mrb[17].mxu0  ;;  %v1089_v14 = vpop.f32.mrb[16].mxu1 }
 0x118   :  { %v1033_v15 = vadd.f32 %v1032_v13, %v1031_v10  ;;  %v1034_v16 = vpop.f32.mrb[18].mxu0  ;;  %v1090_v17 = vpop.f32.mrb[17].mxu1 }
 0x119   :  { %v1035_v18 = vpop.f32.mrb[19].mxu0  ;;  %v1091_v19 = vadd.f32 %v1090_v17, %v1089_v14  ;;  %v1092_v20 = vpop.f32.mrb[18].mxu1 }
 0x11a   :  { %v605_v21 = vadd.f32 %v1033_v15, %v1508_v11  ;;  %v1036_v22 = vadd.f32 %v1035_v18, %v1034_v16  ;;  %v1093_v23 = vpop.f32.mrb[19].mxu1 }
 0x11b   :  { %v1094_v24 = vadd.f32 %v1093_v23, %v1092_v20 }
 0x11c   :  { %v608_v26 = vadd.f32 %v1036_v22, %v1508_v11  ;;  %v693_v28 = vadd.f32 %v1091_v19, %v605_v21 }
 0x11e   :  { %v1037_v29 = vpop.f32.mrb[20].mxu0  ;;  %v696_v30 = vadd.f32 %v1094_v24, %v608_v26 }
 0x11f   :  { %v1038_v31 = vpop.f32.mrb[21].mxu0  ;;  %v1095_v32 = vpop.f32.mrb[20].mxu1 }
 0x120   :  { %v1039_v33 = vadd.f32 %v1038_v31, %v1037_v29  ;;  %v1040_v34 = vpop.f32.mrb[22].mxu0  ;;  %v1096_v35 = vpop.f32.mrb[21].mxu1 }
 0x121   :  { %v1041_v36 = vpop.f32.mrb[23].mxu0  ;;  %v1097_v37 = vadd.f32 %v1096_v35, %v1095_v32  ;;  %v1098_v38 = vpop.f32.mrb[22].mxu1 }
 0x122   :  { %v613_v39 = vadd.f32 %v1039_v33, %v1508_v11  ;;  %v1042_v40 = vadd.f32 %v1041_v36, %v1040_v34  ;;  %v1099_v42 = vpop.f32.mrb[23].mxu1 }
 0x123   :  { %v1100_v44 = vadd.f32 %v1099_v42, %v1098_v38 }
 0x124   :  { %v616_v45 = vadd.f32 %v1042_v40, %v1508_v11  ;;  %v701_v46 = vadd.f32 %v1097_v37, %v613_v39 }
 0x126   :  { %v1043_v47 = vpop.f32.mrb[24].mxu0  ;;  %v704_v48 = vadd.f32 %v1100_v44, %v616_v45 }
 0x127   :  { %v1044_v49 = vpop.f32.mrb[25].mxu0  ;;  %v1101_v50 = vpop.f32.mrb[24].mxu1 }
 0x128   :  { %v1045_v51 = vadd.f32 %v1044_v49, %v1043_v47  ;;  %v1046_v52 = vpop.f32.mrb[26].mxu0  ;;  %v1102_v53 = vpop.f32.mrb[25].mxu1 }
 0x129   :  { %v1047_v54 = vpop.f32.mrb[27].mxu0  ;;  %v1103_v55 = vadd.f32 %v1102_v53, %v1101_v50  ;;  %v1104_v56 = vpop.f32.mrb[26].mxu1 }
 0x12a   :  { %v621_v58 = vadd.f32 %v1045_v51, %v1508_v11  ;;  %v1105_v60 = vpop.f32.mrb[27].mxu1 }
 0x12c   :  { %v709_v61 = vadd.f32 %v1103_v55, %v621_v58 }
 0x12e   :  { %v748_v62 = vpop.f32.mrb[28].mxu0 }
 0x12f   :  { %v749_v63 = vadd.f32 %v748_v62, %v1512_v25  ;;  %v780_v0 = vpop.f32.mrb[28].mxu1  ;;  %v1128_v1 = vpop.f32.mrb[29].mxu0 }
 0x130   :  { %v781_v2 = vadd.f32 %v780_v0, %v693_v28  ;;  %v1144_v3 = vpop.f32.mrb[29].mxu1  ;;  %v751_v4 = vpop.f32.mrb[30].mxu0 }
 0x131   :  { %v802_v5 = vmax.f32 %v749_v63, 0.0  ;;  %v752_v6 = vadd.f32 %v751_v4, %v1514_v27  ;;  %v783_v7 = vpop.f32.mrb[30].mxu1  ;;  %v1129_v8 = vpop.f32.mrb[31].mxu0 }
 0x132   :  { %v810_v10 = vmax.f32 %v781_v2, 0.0  ;;  %v784_v13 = vadd.f32 %v783_v7, %v696_v30  ;;  %v1145_v14 = vpop.f32.mrb[31].mxu1 }
 0x133   :  { %v978_v11 = vpack.c.bf16 %v802_v5, %v802_v5  ;;  %v803_v15 = vmax.f32 %v752_v6, 0.0 }
 0x134   :  { %v986_v16 = vpack.c.bf16 %v810_v10, %v810_v10  ;;  %v811_v17 = vmax.f32 %v784_v13, 0.0 }
 0x135   :  { %869 = vst.msk [vmem:[%s1602_s3] sm:$0xf] %vm868_vm2, %v978_v11  ;;  %v979_v25 = vpack.c.bf16 %v803_v15, %v803_v15 }
 0x136   :  { %877 = vst.msk [vmem:[%s1602_s3 + $0x20] sm:$0xf] %vm868_vm2, %v986_v16  ;;  %v987_v27 = vpack.c.bf16 %v811_v17, %v811_v17  ;;  %v756_v18 = vpop.f32.mrb[32].mxu0 }
 0x137   :  { %870 = vst.msk [vmem:[%s1602_s3 + $0x4] sm:$0xf] %vm868_vm2, %v979_v25  ;;  %v757_v19 = vadd.f32 %v756_v18, %v1518_v41  ;;  %v788_v20 = vpop.f32.mrb[32].mxu1  ;;  %v1132_v21 = vpop.f32.mrb[33].mxu0 }
 0x138   :  { %878 = vst.msk [vmem:[%s1602_s3 + $0x24] sm:$0xf] %vm868_vm2, %v987_v27  ;;  %v789_v22 = vadd.f32 %v788_v20, %v701_v46  ;;  %v1148_v23 = vpop.f32.mrb[33].mxu1  ;;  %v759_v24 = vpop.f32.mrb[34].mxu0 }
 0x139   :  { %v804_v26 = vmax.f32 %v757_v19, 0.0  ;;  %v760_v28 = vadd.f32 %v759_v24, %v1520_v43  ;;  %v791_v29 = vpop.f32.mrb[34].mxu1  ;;  %v1133_v30 = vpop.f32.mrb[35].mxu0 }
 0x13a   :  { %v812_v31 = vmax.f32 %v789_v22, 0.0  ;;  %v792_v32 = vadd.f32 %v791_v29, %v704_v48  ;;  %v1149_v33 = vpop.f32.mrb[35].mxu1 }
 0x13b   :  { %v980_v34 = vpack.c.bf16 %v804_v26, %v804_v26  ;;  %v805_v41 = vmax.f32 %v760_v28, 0.0 }
 0x13c   :  { %v988_v35 = vpack.c.bf16 %v812_v31, %v812_v31  ;;  %v813_v36 = vmax.f32 %v792_v32, 0.0 }
 0x13d   :  { %871 = vst.msk [vmem:[%s1602_s3 + $0x8] sm:$0xf] %vm868_vm2, %v980_v34  ;;  %v981_v37 = vpack.c.bf16 %v805_v41, %v805_v41 }
 0x13e   :  { %879 = vst.msk [vmem:[%s1602_s3 + $0x28] sm:$0xf] %vm868_vm2, %v988_v35  ;;  %v989_v43 = vpack.c.bf16 %v813_v36, %v813_v36  ;;  %v764_v38 = vpop.f32.mrb[36].mxu0 }
 0x13f   :  { %872 = vst.msk [vmem:[%s1602_s3 + $0xc] sm:$0xf] %vm868_vm2, %v981_v37  ;;  %v765_v39 = vadd.f32 %v764_v38, %v1524_v57  ;;  %v796_v40 = vpop.f32.mrb[36].mxu1  ;;  %v1136_v42 = vpop.f32.mrb[37].mxu0 }
 0x140   :  { %880 = vst.msk [vmem:[%s1602_s3 + $0x2c] sm:$0xf] %vm868_vm2, %v989_v43  ;;  %v797_v44 = vadd.f32 %v796_v40, %v709_v61  ;;  %v767_v45 = vpop.f32.mrb[38].mxu0  ;;  %v1152_v46 = vpop.f32.mrb[37].mxu1 }
 0x141   :  { %v806_v47 = vmax.f32 %v765_v39, 0.0  ;;  %v768_v48 = vadd.f32 %v767_v45, %v1526_v59  ;;  %v1137_v49 = vpop.f32.mrb[39].mxu0  ;;  %v799_v50 = vpop.f32.mrb[38].mxu1 }
 0x142   :  { %v814_v51 = vmax.f32 %v797_v44, 0.0  ;;  %v1153_v52 = vpop.f32.mrb[39].mxu1 }
 0x143   :  { %v982_v53 = vpack.c.bf16 %v806_v47, %v806_v47  ;;  %v807_v54 = vmax.f32 %v768_v48, 0.0 }
 0x144   :  { %v990_v57 = vpack.c.bf16 %v814_v51, %v814_v51 }
 0x145   :  { %873 = vst.msk [vmem:[%s1602_s3 + $0x10] sm:$0xf] %vm868_vm2, %v982_v53  ;;  %v983_v55 = vpack.c.bf16 %v807_v54, %v807_v54 }
 0x146   :  { %881 = vst.msk [vmem:[%s1602_s3 + $0x30] sm:$0xf] %vm868_vm2, %v990_v57  ;;  %v772_v56 = vpop.f32.mrb[40].mxu0 }
 0x147   :  { %874 = vst.msk [vmem:[%s1602_s3 + $0x14] sm:$0xf] %vm868_vm2, %v983_v55  ;;  %v773_v59 = vadd.f32 %v772_v56, %v1530_v9  ;;  %v1140_v58 = vpop.f32.mrb[41].mxu0 }
 0x148   :  { %v775_v60 = vpop.f32.mrb[42].mxu0 }
 0x149   :  { %v808_v61 = vmax.f32 %v773_v59, 0.0  ;;  %v776_v62 = vadd.f32 %v775_v60, %v1532_v12  ;;  %v1141_v63 = vpop.f32.mrb[43].mxu0 }
 0x14b   :  { %v984_v0 = vpack.c.bf16 %v808_v61, %v808_v61  ;;  %v809_v1 = vmax.f32 %v776_v62, 0.0 }
 0x14d   :  { %875 = vst.msk [vmem:[%s1602_s3 + $0x18] sm:$0xf] %vm868_vm2, %v984_v0  ;;  %v985_v2 = vpack.c.bf16 %v809_v1, %v809_v1 }
 0x14f   :  { %876 = vst.msk [vmem:[%s1602_s3 + $0x1c] sm:$0xf] %vm868_vm2, %v985_v2 }

// kernel: a_call__.7
= control target key start
LH: loop header
LB: loop body
LE: loop exit
PB: predicated region body
PF: predicated region fallthrough
CT: control target
= control target key end

     0   :  { %10 = vsyncpa [#allocation5], 0  ;;  %s2841_s18 = smov 0   ;;  %s2843_s19 = smov 0   ;;  %s3231_s0 = inlined_call_operand.vmem [shape: bf16[2,3200], index: 0, kind: input, shape index: {}]   ;;  %s3232_s1 = inlined_call_operand.vmem [shape: bf16[3200,512], index: 1, kind: input, shape index: {}]   ;;  %s3233_s2 = inlined_call_operand.vmem [shape: f32[1,512], index: 2, kind: input, shape index: {}]   ;;  %s3234_s3 = inlined_call_operand.vmem [shape: bf16[512,128], index: 3, kind: input, shape index: {}]   ;;  %s3235_s4 = inlined_call_operand.vmem [shape: f32[1,128], index: 4, kind: input, shape index: {}]   ;;  %s3236_s5 = inlined_call_operand.hbm [shape: f32[2,128], index: 5, kind: output, shape index: {}]  }
   0x1   :  { %s2845_s20 = smov 0   ;;  %s2847_s21 = smov 0  }
   0x2   :  { %s2849_s22 = smov 0  }
   0x3 LB: > { %s2108_s23 = sadd.s32 4294967295, %s2799_s22   ;;  %s25_s24 = sadd.s32 1, %s2795_s21  ;;  %s2799_s22 = sphi %s2849_s22, %s16_s22   ;;  %s2795_s21 = sphi %s2847_s21, %s3240_s21   ;;  %s2791_s20 = sphi %s2845_s20, %s3239_s20   ;;  %s2787_s19 = sphi %s2843_s19, %s3238_s19   ;;  %s2783_s18 = sphi %s2841_s18, %s3237_s18  }
   0x4   : > { %p26_p0 = scmp.ge.s32.totalorder %s25_s24, 5  ;;  %p44_p1 = scmp.ne.s32.totalorder %s2787_s19, %s2783_s18 }
   0x5   : > { %p45_p2 = scmp.eq.s32.totalorder %s2799_s22, 0  ;;  %s37_s26 = sadd.s32 1, %s2787_s19 }
   0x6   : > { %s3242_s24 = smov (%p26_p0, %s25_s24), 0  ;;  %p2110_p5 = scmp.ge.s32.totalorder %s2799_s22, 5 }
   0x7   : > { %p46_p3 = por %p45_p2, %p44_p1  ;;  %s33_s25 = ssub.s32 %s2795_s21, %s3242_s24 }
   0x8   : > { %p35_p4 = scmp.eq.s32.totalorder %s33_s25, 0  ;;  %194 = sbr.rel (%p2110_p5) target bundleno = 32 (0x20), region = 28 }
   0xa   : > { %s2877_s27 = scalar_select %p35_p4, %s2787_s19, %s37_s26  }
   0xf   : > { %197 = sbr.rel (!%p46_p3) target bundleno = 32 (0x20), region = 32  ;;  %s199_s28 = sand.u32 (%p46_p3), 1, %s2787_s19  }
  0x10   : > { %s203_s29 = smul.u32 (%p46_p3), 5, %s2795_s21  ;;  %s2801_s10 = smov (%p46_p3), 0  }
  0x11   : > { %s2358_s30 = smul.u32 (%p46_p3), 20, %s199_s28 }
  0x12   : > { %s210_s8 = scalar_lea.vmem (%p46_p3), %s3231_s0, %s203_s29  }
  0x13   : > { %s201_s9 = scalar_lea.vmem (%p46_p3), [#allocation3], %s2358_s30  }
  0x16 LB: >> { %v228_v0 = vld [vmem:[%s210_s8] sm:$0x1f]  ;;  %s222_s10 = sadd.s32 1, %s2803_s10   ;;  %s2803_s10 = sphi %s2801_s10, %s222_s10  }
  0x17   : >> { %229 = vst [vmem:[%s201_s9] sm:$0x1f] %v228_v0  ;;  %p221_p6 = scmp.ge.s32.totalorder %s222_s10, 1 }
  0x19   : > { %224 = sbr.rel (!%p221_p6) target bundleno = 22 (0x16), region = 118 }
  0x20 PF: > { %p2111_p7 = scmp.ge.s32.totalorder %s2799_s22, 1  ;;  %p270_p8 = scmp.lt.s32.totalorder %s2799_s22, 6 }
  0x22   : > { %p271_p9 = pnand %p2111_p7, %p270_p8 }
  0x23   : > { %s277_s11 = sand.u32 (!%p271_p9), 1, %s2783_s18   ;;  %s310_s12 = smul.u32 (!%p271_p9), 80, %s2791_s20 }
  0x24   : > { %274 = sbr.rel (%p271_p9) target bundleno = 695 (0x2b7), region = 70  ;;  %p2114_p11 = scmp.ne.s32.totalorder (!%p271_p9), %s2791_s20, 0 }
  0x25   : > { %s2359_s13 = smul.u32 (!%p271_p9), 20, %s277_s11  ;;  %p311_p10 = scmp.lt.s32.totalorder (!%p271_p9), %s310_s12, 399 }
  0x27   : > { %s2894_s25 = scalar_lea.vmem (!%p271_p9), [#allocation3], %s2359_s13 }
  0x2b   : > { %s3244_s12 = smov (!%p311_p10, %s310_s12), 399  ;;  %324 = sbr.rel (%p2114_p11) target bundleno = 50 (0x32), region = 78 }
  0x2c   : > { %s2313_s14 = sshll.u32 %s3244_s12, 4  ;;  %v2805_v1 = vmov (!%p2114_p11), 0.0  }
  0x2d   : > { %s2892_s17 = scalar_lea.vmem %s3232_s1, %s2313_s14  ;;  %325 = vst [vmem:[#allocation2] sm:$0xff] (!%p2114_p11), %v2805_v1  ;;  %326 = vst [vmem:[#allocation2 + $0x8] sm:$0xff] (!%p2114_p11), %v2805_v1 }
  0x2e   : > { %327 = vst [vmem:[#allocation2 + $0x10] sm:$0xff] (!%p2114_p11), %v2805_v1  ;;  %328 = vst [vmem:[#allocation2 + $0x18] sm:$0xff] (!%p2114_p11), %v2805_v1 }
  0x32 PF: > { %v2441_v2 = vld [vmem:[%s2892_s17 + $0x4] ss:$16 sps:$4 sm:$0xff]   ;;  %v2445_v4 = vld [vmem:[%s2892_s17] ss:$16 sps:$4 sm:$0xff]   ;;  %v2806_v40 = vmov 1966171168   ;;  %v508_v42 = vlaneseq }
  0x33   : > { %v2443_v3 = vld [vmem:[%s2892_s17 + $0x204] ss:$16 sps:$4 sm:$0xff]   ;;  %1364 = vmatprep.subr.bf16.mxu0 %v2441_v2  ;;  %v2446_v5 = vld [vmem:[%s2892_s17 + $0x200] ss:$16 sps:$4 sm:$0xff]   ;;  %v506_v41 = vunpack.c.l.s4 %v2806_v40  ;;  %p2275_p12 = scmp.ne.s32.totalorder %s2791_s20, 4 }
  0x34   : > { %1405 = vmatprep.subr.bf16.mxu1 %v2443_v3  ;;  %v2447_v6 = vld [vmem:[%s2892_s17 + $0x24] ss:$16 sps:$4 sm:$0xff]   ;;  %1365 = vmatpush1.bf16.msra.mxu0 %v2445_v4  ;;  %v2451_v8 = vld [vmem:[%s2892_s17 + $0x20] ss:$16 sps:$4 sm:$0xff]   ;;  %v2939_v48 = vshrl.u32 %v508_v42, 7 }
  0x35   : > { %1406 = vmatpush1.bf16.msra.mxu1 %v2446_v5  ;;  %v2449_v7 = vld [vmem:[%s2892_s17 + $0x224] ss:$16 sps:$4 sm:$0xff]   ;;  %1366 = vmatprep.subr.bf16.mxu0 %v2447_v6  ;;  %v2452_v9 = vld [vmem:[%s2892_s17 + $0x220] ss:$16 sps:$4 sm:$0xff]   ;;  %v507_v47 = vunpack.c.0.s8 %v506_v41  ;;  %v2578_v41 = vld [vmem:[%s2892_s17 + $0xac] ss:$16 sps:$4 sm:$0xff]  }
  0x36   : > { %1407 = vmatprep.subr.bf16.mxu1 %v2449_v7  ;;  %v2453_v10 = vld [vmem:[%s2892_s17 + $0x44] ss:$16 sps:$4 sm:$0xff]   ;;  %v2457_v12 = vld [vmem:[%s2892_s17 + $0x40] ss:$16 sps:$4 sm:$0xff]  }
  0x37   : > { %v2455_v11 = vld [vmem:[%s2892_s17 + $0x244] ss:$16 sps:$4 sm:$0xff]   ;;  %v2458_v13 = vld [vmem:[%s2892_s17 + $0x240] ss:$16 sps:$4 sm:$0xff]   ;;  %v2948_v55 = vsub.s32 %v507_v47, %v2939_v48 }
  0x38   : > { %1367 = vmatpush1.bf16.msra.mxu0 %v2451_v8  ;;  %v2459_v14 = vld [vmem:[%s2892_s17 + $0x64] ss:$16 sps:$4 sm:$0xff]   ;;  %v2463_v16 = vld [vmem:[%s2892_s17 + $0x60] ss:$16 sps:$4 sm:$0xff]  }
  0x39   : > { %1408 = vmatpush1.bf16.msra.mxu1 %v2452_v9  ;;  %1368 = vmatprep.subr.bf16.mxu0 %v2453_v10  ;;  %v2461_v15 = vld [vmem:[%s2892_s17 + $0x264] ss:$16 sps:$4 sm:$0xff]   ;;  %v2464_v17 = vld [vmem:[%s2892_s17 + $0x260] ss:$16 sps:$4 sm:$0xff]  }
  0x3a   : > { %1409 = vmatprep.subr.bf16.mxu1 %v2455_v11  ;;  %v2465_v18 = vld [vmem:[%s2892_s17 + $0x84] ss:$16 sps:$4 sm:$0xff]   ;;  %v2469_v20 = vld [vmem:[%s2892_s17 + $0x80] ss:$16 sps:$4 sm:$0xff]  }
  0x3b   : > { %v2467_v19 = vld [vmem:[%s2892_s17 + $0x284] ss:$16 sps:$4 sm:$0xff]   ;;  %v2470_v21 = vld [vmem:[%s2892_s17 + $0x280] ss:$16 sps:$4 sm:$0xff]  }
  0x3c   : > { %1369 = vmatpush1.bf16.msra.mxu0 %v2457_v12  ;;  %v2471_v22 = vld [vmem:[%s2892_s17 + $0xa4] ss:$16 sps:$4 sm:$0xff]   ;;  %v2475_v24 = vld [vmem:[%s2892_s17 + $0xa0] ss:$16 sps:$4 sm:$0xff]  }
  0x3d   : > { %1410 = vmatpush1.bf16.msra.mxu1 %v2458_v13  ;;  %1370 = vmatprep.subr.bf16.mxu0 %v2459_v14  ;;  %v2473_v23 = vld [vmem:[%s2892_s17 + $0x2a4] ss:$16 sps:$4 sm:$0xff]   ;;  %v2476_v25 = vld [vmem:[%s2892_s17 + $0x2a0] ss:$16 sps:$4 sm:$0xff]  }
  0x3e   : > { %1411 = vmatprep.subr.bf16.mxu1 %v2461_v15  ;;  %v2477_v26 = vld [vmem:[%s2892_s17 + $0xc4] ss:$16 sps:$4 sm:$0xff]   ;;  %v2481_v28 = vld [vmem:[%s2892_s17 + $0xc0] ss:$16 sps:$4 sm:$0xff]  }
  0x3f   : > { %v2479_v27 = vld [vmem:[%s2892_s17 + $0x2c4] ss:$16 sps:$4 sm:$0xff]   ;;  %v2482_v29 = vld [vmem:[%s2892_s17 + $0x2c0] ss:$16 sps:$4 sm:$0xff]  }
  0x40   : > { %1371 = vmatpush1.bf16.msra.mxu0 %v2463_v16  ;;  %v2483_v30 = vld [vmem:[%s2892_s17 + $0xe4] ss:$16 sps:$4 sm:$0xff]   ;;  %v2487_v32 = vld [vmem:[%s2892_s17 + $0xe0] ss:$16 sps:$4 sm:$0xff]  }
  0x41   : > { %1412 = vmatpush1.bf16.msra.mxu1 %v2464_v17  ;;  %1372 = vmatprep.subr.bf16.mxu0 %v2465_v18  ;;  %v2485_v31 = vld [vmem:[%s2892_s17 + $0x2e4] ss:$16 sps:$4 sm:$0xff]   ;;  %v2488_v33 = vld [vmem:[%s2892_s17 + $0x2e0] ss:$16 sps:$4 sm:$0xff]   ;;  %v2548_v18 = vld [vmem:[%s2892_s17 + $0xc] ss:$16 sps:$4 sm:$0xff]  }
  0x42   : > { %1413 = vmatprep.subr.bf16.mxu1 %v2467_v19  ;;  %v2489_v34 = vld [vmem:[%s2892_s17 + $0x104] ss:$16 sps:$4 sm:$0xff]   ;;  %v2493_v36 = vld [vmem:[%s2892_s17 + $0x100] ss:$16 sps:$4 sm:$0xff]  }
  0x43   : > { %v2491_v35 = vld [vmem:[%s2892_s17 + $0x304] ss:$16 sps:$4 sm:$0xff]   ;;  %v2494_v37 = vld [vmem:[%s2892_s17 + $0x300] ss:$16 sps:$4 sm:$0xff]  }
  0x44   : > { %1373 = vmatpush1.bf16.msra.mxu0 %v2469_v20  ;;  %v2495_v38 = vld [vmem:[%s2892_s17 + $0x124] ss:$16 sps:$4 sm:$0xff]   ;;  %v2499_v43 = vld [vmem:[%s2892_s17 + $0x120] ss:$16 sps:$4 sm:$0xff]  }
  0x45   : > { %1414 = vmatpush1.bf16.msra.mxu1 %v2470_v21  ;;  %1374 = vmatprep.subr.bf16.mxu0 %v2471_v22  ;;  %v2497_v39 = vld [vmem:[%s2892_s17 + $0x324] ss:$16 sps:$4 sm:$0xff]   ;;  %v2500_v44 = vld [vmem:[%s2892_s17 + $0x320] ss:$16 sps:$4 sm:$0xff]   ;;  %v2546_v21 = vld [vmem:[%s2892_s17 + $0x8] ss:$16 sps:$4 sm:$0xff]  }
  0x46   : > { %1415 = vmatprep.subr.bf16.mxu1 %v2473_v23  ;;  %v2501_v45 = vld [vmem:[%s2892_s17 + $0x144] ss:$16 sps:$4 sm:$0xff]   ;;  %v2505_v49 = vld [vmem:[%s2892_s17 + $0x140] ss:$16 sps:$4 sm:$0xff]   ;;  %v2554_v23 = vld [vmem:[%s2892_s17 + $0x2c] ss:$16 sps:$4 sm:$0xff]  }
  0x47   : > { %v2503_v46 = vld [vmem:[%s2892_s17 + $0x344] ss:$16 sps:$4 sm:$0xff]   ;;  %v2506_v50 = vld [vmem:[%s2892_s17 + $0x340] ss:$16 sps:$4 sm:$0xff]  }
  0x48   : > { %1375 = vmatpush1.bf16.msra.mxu0 %v2475_v24  ;;  %v2507_v51 = vld [vmem:[%s2892_s17 + $0x164] ss:$16 sps:$4 sm:$0xff]   ;;  %v2511_v53 = vld [vmem:[%s2892_s17 + $0x160] ss:$16 sps:$4 sm:$0xff]  }
  0x49   : > { %1416 = vmatpush1.bf16.msra.mxu1 %v2476_v25  ;;  %1376 = vmatprep.subr.bf16.mxu0 %v2477_v26  ;;  %v2509_v52 = vld [vmem:[%s2892_s17 + $0x364] ss:$16 sps:$4 sm:$0xff]   ;;  %v2512_v54 = vld [vmem:[%s2892_s17 + $0x360] ss:$16 sps:$4 sm:$0xff]   ;;  %v2552_v25 = vld [vmem:[%s2892_s17 + $0x28] ss:$16 sps:$4 sm:$0xff]  }
  0x4a   : > { %1417 = vmatprep.subr.bf16.mxu1 %v2479_v27  ;;  %v2513_v56 = vld [vmem:[%s2892_s17 + $0x184] ss:$16 sps:$4 sm:$0xff]   ;;  %v2517_v61 = vld [vmem:[%s2892_s17 + $0x180] ss:$16 sps:$4 sm:$0xff]   ;;  %v2560_v27 = vld [vmem:[%s2892_s17 + $0x4c] ss:$16 sps:$4 sm:$0xff]  }
  0x4b   : > { %v2537_v57 = vld [vmem:[%s2894_s25] ss:$5 sps:$4 sm:$0xff]   ;;  %v2540_v59 = vld [vmem:[%s2894_s25 + $0xa] ss:$5 sps:$4 sm:$0xff]  }
  0x4c   : > { %1377 = vmatpush1.bf16.msra.mxu0 %v2481_v28  ;;  %v2515_v58 = vld [vmem:[%s2892_s17 + $0x384] ss:$16 sps:$4 sm:$0xff]   ;;  %v511_v60 = vrot.slane %v2537_v57, %v2948_v55  ;;  %v2518_v62 = vld [vmem:[%s2892_s17 + $0x380] ss:$16 sps:$4 sm:$0xff]   ;;  %v525_v63 = vrot.slane %v2540_v59, %v2948_v55  ;;  %v2807_v28 = vmov 0  }
  0x4d   : > { %1418 = vmatpush1.bf16.msra.mxu1 %v2482_v29  ;;  %1378 = vmatprep.subr.bf16.mxu0 %v2483_v30  ;;  %v2519_v0 = vld [vmem:[%s2892_s17 + $0x1a4] ss:$16 sps:$4 sm:$0xff]   ;;  %v2523_v3 = vld [vmem:[%s2892_s17 + $0x1a0] ss:$16 sps:$4 sm:$0xff]   ;;  %v2558_v30 = vld [vmem:[%s2892_s17 + $0x48] ss:$16 sps:$4 sm:$0xff]  }
  0x4e   : > { %1419 = vmatprep.subr.bf16.mxu1 %v2485_v31  ;;  %v2521_v1 = vld [vmem:[%s2892_s17 + $0x3a4] ss:$16 sps:$4 sm:$0xff]   ;;  %v534_v2 = vcombine.high %v511_v60, %v525_v63  ;;  %v2524_v4 = vld [vmem:[%s2892_s17 + $0x3a0] ss:$16 sps:$4 sm:$0xff]   ;;  %v533_v11 = vcombine.low %v511_v60, %v525_v63  ;;  %v2596_v59 = vld [vmem:[%s2892_s17 + $0x20c] ss:$16 sps:$4 sm:$0xff]  }
  0x4f   : > { %v2525_v6 = vld [vmem:[%s2892_s17 + $0x1c4] ss:$16 sps:$4 sm:$0xff]   ;;  %v2529_v9 = vld [vmem:[%s2892_s17 + $0x1c0] ss:$16 sps:$4 sm:$0xff]   ;;  %v2599_v63 = vld [vmem:[%s2892_s17 + $0x12c] ss:$16 sps:$4 sm:$0xff]  }
  0x50   : > { %1379 = vmatpush1.bf16.msra.mxu0 %v2487_v32  ;;  %v556_v5 = vrot.slane %v534_v2, %v2948_v55  ;;  %v2527_v7 = vld [vmem:[%s2892_s17 + $0x3c4] ss:$16 sps:$4 sm:$0xff]   ;;  %v2530_v10 = vld [vmem:[%s2892_s17 + $0x3c0] ss:$16 sps:$4 sm:$0xff]   ;;  %v2975_v16 = vrot.slane %v533_v11, %v2948_v55  ;;  %v2566_v32 = vld [vmem:[%s2892_s17 + $0x6c] ss:$16 sps:$4 sm:$0xff]  }
  0x51   : > { %1420 = vmatpush1.bf16.msra.mxu1 %v2488_v33  ;;  %1380 = vmatprep.subr.bf16.mxu0 %v2489_v34  ;;  %v2531_v12 = vld [vmem:[%s2892_s17 + $0x1e4] ss:$16 sps:$4 sm:$0xff]   ;;  %v2535_v14 = vld [vmem:[%s2892_s17 + $0x1e0] ss:$16 sps:$4 sm:$0xff]   ;;  %v2564_v34 = vld [vmem:[%s2892_s17 + $0x68] ss:$16 sps:$4 sm:$0xff]  }
  0x52   : > { %1421 = vmatprep.subr.bf16.mxu1 %v2491_v35  ;;  %v2965_v8 = vcombine.high %v556_v5, %v556_v5  ;;  %1396 = vmatprep.mubr.bf16.mxu0 %v556_v5  ;;  %v2533_v13 = vld [vmem:[%s2892_s17 + $0x3e4] ss:$16 sps:$4 sm:$0xff]   ;;  %v2536_v15 = vld [vmem:[%s2892_s17 + $0x3e0] ss:$16 sps:$4 sm:$0xff]   ;;  %v2981_v19 = vcombine.high %v2975_v16, %v2975_v16  ;;  %v2600_v2 = vld [vmem:[%s2892_s17 + $0x228] ss:$16 sps:$4 sm:$0xff]  }
  0x53   : > { %v2545_v17 = vld [vmem:[%s2892_s17 + $0x404] ss:$16 sps:$4 sm:$0xff]   ;;  %v2543_v20 = vld [vmem:[%s2892_s17 + $0x400] ss:$16 sps:$4 sm:$0xff]   ;;  %v2620_v11 = vld [vmem:[%s2892_s17 + $0x28c] ss:$16 sps:$4 sm:$0xff]  }
  0x54   : > { %1381 = vmatpush1.bf16.msra.mxu0 %v2493_v36  ;;  %1437 = vmatprep.mubr.bf16.mxu1 %v2965_v8  ;;  %v2551_v22 = vld [vmem:[%s2892_s17 + $0x424] ss:$16 sps:$4 sm:$0xff]   ;;  %v2549_v24 = vld [vmem:[%s2892_s17 + $0x420] ss:$16 sps:$4 sm:$0xff]   ;;  %v2572_v36 = vld [vmem:[%s2892_s17 + $0x8c] ss:$16 sps:$4 sm:$0xff]  }
  0x55   : > { %1422 = vmatpush1.bf16.msra.mxu1 %v2494_v37  ;;  %1382 = vmatprep.subr.bf16.mxu0 %v2495_v38  ;;  %v2557_v26 = vld [vmem:[%s2892_s17 + $0x444] ss:$16 sps:$4 sm:$0xff]   ;;  %v2555_v29 = vld [vmem:[%s2892_s17 + $0x440] ss:$16 sps:$4 sm:$0xff]   ;;  %v2570_v38 = vld [vmem:[%s2892_s17 + $0x88] ss:$16 sps:$4 sm:$0xff]  }
  0x56   : > { %1423 = vmatprep.subr.bf16.mxu1 %v2497_v39  ;;  %v2563_v31 = vld [vmem:[%s2892_s17 + $0x464] ss:$16 sps:$4 sm:$0xff]   ;;  %v2561_v33 = vld [vmem:[%s2892_s17 + $0x460] ss:$16 sps:$4 sm:$0xff]  }
  0x57   : > { %v2569_v35 = vld [vmem:[%s2892_s17 + $0x484] ss:$16 sps:$4 sm:$0xff]   ;;  %v2567_v37 = vld [vmem:[%s2892_s17 + $0x480] ss:$16 sps:$4 sm:$0xff]  }
  0x58   : > { %1383 = vmatpush1.bf16.msra.mxu0 %v2499_v43  ;;  %v2575_v39 = vld [vmem:[%s2892_s17 + $0x4a4] ss:$16 sps:$4 sm:$0xff]   ;;  %v2573_v43 = vld [vmem:[%s2892_s17 + $0x4a0] ss:$16 sps:$4 sm:$0xff]  }
  0x59   : > { %1424 = vmatpush1.bf16.msra.mxu1 %v2500_v44  ;;  %1384 = vmatprep.subr.bf16.mxu0 %v2501_v45  ;;  %v2539_v40 = vld [vmem:[%s2894_s25 + $0x4] ss:$5 sps:$4 sm:$0x11]   ;;  %v2542_v42 = vld [vmem:[%s2894_s25 + $0xe] ss:$5 sps:$4 sm:$0x11]  }
  0x5a   : > { %1425 = vmatprep.subr.bf16.mxu1 %v2503_v46  ;;  %v2576_v44 = vld [vmem:[%s2892_s17 + $0xa8] ss:$16 sps:$4 sm:$0xff]   ;;  %v2581_v45 = vld [vmem:[%s2892_s17 + $0x4c4] ss:$16 sps:$4 sm:$0xff]   ;;  %v2584_v46 = vld [vmem:[%s2892_s17 + $0xcc] ss:$16 sps:$4 sm:$0xff]  }
  0x5b   : > { %v2579_v47 = vld [vmem:[%s2892_s17 + $0x4c0] ss:$16 sps:$4 sm:$0xff]  }
  0x5c   : > { %1385 = vmatpush1.bf16.msra.mxu0 %v2505_v49  ;;  %v2582_v49 = vld [vmem:[%s2892_s17 + $0xc8] ss:$16 sps:$4 sm:$0xff]  }
  0x5d   : > { %1426 = vmatpush1.bf16.msra.mxu1 %v2506_v50  ;;  %1386 = vmatprep.subr.bf16.mxu0 %v2507_v51  ;;  %v518_v50 = vrot.slane %v2539_v40, %v2948_v55  ;;  %v532_v51 = vrot.slane %v2542_v42, %v2948_v55  ;;  %v2659_v40 = vld [vmem:[%s2892_s17 + $0x36c] ss:$16 sps:$4 sm:$0xff]   ;;  %v2657_v42 = vld [vmem:[%s2892_s17 + $0x368] ss:$16 sps:$4 sm:$0xff]  }
  0x5e   : > { %1427 = vmatprep.subr.bf16.mxu1 %v2509_v52  ;;  %v2587_v52 = vld [vmem:[%s2892_s17 + $0x4e4] ss:$16 sps:$4 sm:$0xff]  }
  0x5f   : > { %v535_v57 = vcombine.low %v518_v50, %v532_v51  ;;  %v2669_v50 = vld [vmem:[%s2892_s17 + $0x3a8] ss:$16 sps:$4 sm:$0xff]  }
  0x60   : > { %1387 = vmatpush1.bf16.msra.mxu0 %v2511_v53  ;;  %v2590_v53 = vld [vmem:[%s2892_s17 + $0xec] ss:$16 sps:$4 sm:$0xff]   ;;  %v2672_v51 = vld [vmem:[%s2892_s17 + $0x4a8] ss:$16 sps:$4 sm:$0xff]  }
  0x61   : > { %1428 = vmatpush1.bf16.msra.mxu1 %v2512_v54  ;;  %1388 = vmatprep.subr.bf16.mxu0 %v2513_v56  ;;  %v2585_v54 = vld [vmem:[%s2892_s17 + $0x4e0] ss:$16 sps:$4 sm:$0xff]   ;;  %v2588_v56 = vld [vmem:[%s2892_s17 + $0xe8] ss:$16 sps:$4 sm:$0xff]   ;;  %v3023_v60 = vrot.slane %v535_v57, %v2948_v55  ;;  %v2605_v55 = vld [vmem:[%s2892_s17 + $0x14c] ss:$16 sps:$4 sm:$0xff]  }
  0x62   : > { %1429 = vmatprep.subr.bf16.mxu1 %v2515_v58  ;;  %v2593_v58 = vld [vmem:[%s2892_s17 + $0x10c] ss:$16 sps:$4 sm:$0xff]  }
  0x63   : > { %v2683_v57 = vld [vmem:[%s2892_s17 + $0x3ec] ss:$16 sps:$4 sm:$0xff]  }
  0x64   : > { %1389 = vmatpush1.bf16.msra.mxu0 %v2517_v61  ;;  %v2591_v61 = vld [vmem:[%s2892_s17 + $0x108] ss:$16 sps:$4 sm:$0xff]  }
  0x65   : > { %1430 = vmatpush1.bf16.msra.mxu1 %v2518_v62  ;;  %1390 = vmatprep.subr.bf16.mxu0 %v2519_v0  ;;  %v2594_v62 = vld [vmem:[%s2892_s17 + $0x208] ss:$16 sps:$4 sm:$0xff]   ;;  %v2602_v0 = vld [vmem:[%s2892_s17 + $0x22c] ss:$16 sps:$4 sm:$0xff]  }
  0x66   : > { %1431 = vmatprep.subr.bf16.mxu1 %v2521_v1  ;;  %v2597_v1 = vld [vmem:[%s2892_s17 + $0x128] ss:$16 sps:$4 sm:$0xff]  }
  0x68   : > { %1391 = vmatpush1.bf16.msra.mxu0 %v2523_v3  ;;  %v2608_v3 = vld [vmem:[%s2892_s17 + $0x24c] ss:$16 sps:$4 sm:$0xff]  }
  0x69   : > { %1432 = vmatpush1.bf16.msra.mxu1 %v2524_v4  ;;  %1392 = vmatprep.subr.bf16.mxu0 %v2525_v6  ;;  %v2603_v4 = vld [vmem:[%s2892_s17 + $0x148] ss:$16 sps:$4 sm:$0xff]   ;;  %v2611_v6 = vld [vmem:[%s2892_s17 + $0x16c] ss:$16 sps:$4 sm:$0xff]  }
  0x6a   : > { %1433 = vmatprep.subr.bf16.mxu1 %v2527_v7  ;;  %v2614_v7 = vld [vmem:[%s2892_s17 + $0x26c] ss:$16 sps:$4 sm:$0xff]  }
  0x6c   : > { %1393 = vmatpush1.bf16.msra.mxu0 %v2529_v9  ;;  %v2609_v9 = vld [vmem:[%s2892_s17 + $0x168] ss:$16 sps:$4 sm:$0xff]  }
  0x6d   : > { %1434 = vmatpush1.bf16.msra.mxu1 %v2530_v10  ;;  %1394 = vmatprep.subr.bf16.mxu0 %v2531_v12  ;;  %v2612_v10 = vld [vmem:[%s2892_s17 + $0x268] ss:$16 sps:$4 sm:$0xff]  }
  0x6e   : > { %1435 = vmatprep.subr.bf16.mxu1 %v2533_v13  ;;  %v2615_v12 = vld [vmem:[%s2892_s17 + $0x188] ss:$16 sps:$4 sm:$0xff]  }
  0x6f   : > { %v2618_v13 = vld [vmem:[%s2892_s17 + $0x288] ss:$16 sps:$4 sm:$0xff]  }
  0x70   : > { %1395 = vmatpush1.bf16.msra.mxu0 %v2535_v14  ;;  %v2623_v14 = vld [vmem:[%s2892_s17 + $0x1ac] ss:$16 sps:$4 sm:$0xff]  }
  0x71   : > { %1436 = vmatpush1.bf16.msra.mxu1 %v2536_v15  ;;  %1446 = vmatprep.subr.bf16.mxu0 %v2545_v17  ;;  %v2626_v15 = vld [vmem:[%s2892_s17 + $0x2ac] ss:$16 sps:$4 sm:$0xff]   ;;  %v2621_v17 = vld [vmem:[%s2892_s17 + $0x1a8] ss:$16 sps:$4 sm:$0xff]  }
  0x72   : > { %1487 = vmatprep.subr.bf16.mxu1 %v2548_v18  ;;  %v2624_v18 = vld [vmem:[%s2892_s17 + $0x2a8] ss:$16 sps:$4 sm:$0xff]  }
  0x73   : > { %1397 = vmatmul.mubr.bf16.vlgmr.msra.gmra.mrb[0].mxu0 %v2975_v16 }
  0x74   : > { %1438 = vmatmul.mubr.bf16.vlgmr.msra.gmra.mrb[0].mxu1 %v2981_v19  ;;  %1447 = vmatpush1.bf16.msra.mxu0 %v2543_v20  ;;  %v2629_v20 = vld [vmem:[%s2892_s17 + $0x1cc] ss:$16 sps:$4 sm:$0xff]  }
  0x75   : > { %1488 = vmatpush1.bf16.msra.mxu1 %v2546_v21  ;;  %1448 = vmatprep.subr.bf16.mxu0 %v2551_v22  ;;  %v2632_v21 = vld [vmem:[%s2892_s17 + $0x2cc] ss:$16 sps:$4 sm:$0xff]   ;;  %v2627_v22 = vld [vmem:[%s2892_s17 + $0x1c8] ss:$16 sps:$4 sm:$0xff]  }
  0x76   : > { %1489 = vmatprep.subr.bf16.mxu1 %v2554_v23  ;;  %1478 = vmatprep.mubr.bf16.mxu0 %v2807_v28  ;;  %v2630_v23 = vld [vmem:[%s2892_s17 + $0x2c8] ss:$16 sps:$4 sm:$0xff]  }
  0x77   : > { %1519 = vmatprep.mubr.bf16.mxu1 %v556_v5  ;;  %v2606_v5 = vld [vmem:[%s2892_s17 + $0x248] ss:$16 sps:$4 sm:$0xff]  }
  0x78   : > { %1449 = vmatpush1.bf16.msra.mxu0 %v2549_v24  ;;  %v2635_v24 = vld [vmem:[%s2892_s17 + $0x1ec] ss:$16 sps:$4 sm:$0xff]  }
  0x79   : > { %1490 = vmatpush1.bf16.msra.mxu1 %v2552_v25  ;;  %1450 = vmatprep.subr.bf16.mxu0 %v2557_v26  ;;  %v2638_v25 = vld [vmem:[%s2892_s17 + $0x2ec] ss:$16 sps:$4 sm:$0xff]   ;;  %v2633_v26 = vld [vmem:[%s2892_s17 + $0x1e8] ss:$16 sps:$4 sm:$0xff]  }
  0x7a   : > { %1491 = vmatprep.subr.bf16.mxu1 %v2560_v27  ;;  %v2636_v27 = vld [vmem:[%s2892_s17 + $0x2e8] ss:$16 sps:$4 sm:$0xff]  }
  0x7c   : > { %1451 = vmatpush1.bf16.msra.mxu0 %v2555_v29  ;;  %v2641_v29 = vld [vmem:[%s2892_s17 + $0x30c] ss:$16 sps:$4 sm:$0xff]  }
  0x7d   : > { %1492 = vmatpush1.bf16.msra.mxu1 %v2558_v30  ;;  %1452 = vmatprep.subr.bf16.mxu0 %v2563_v31  ;;  %v2644_v30 = vld [vmem:[%s2892_s17 + $0x40c] ss:$16 sps:$4 sm:$0xff]   ;;  %v2639_v31 = vld [vmem:[%s2892_s17 + $0x308] ss:$16 sps:$4 sm:$0xff]  }
  0x7e   : > { %1493 = vmatprep.subr.bf16.mxu1 %v2566_v32  ;;  %v2642_v32 = vld [vmem:[%s2892_s17 + $0x408] ss:$16 sps:$4 sm:$0xff]  }
  0x80   : > { %1453 = vmatpush1.bf16.msra.mxu0 %v2561_v33  ;;  %v2647_v33 = vld [vmem:[%s2892_s17 + $0x32c] ss:$16 sps:$4 sm:$0xff]  }
  0x81   : > { %1494 = vmatpush1.bf16.msra.mxu1 %v2564_v34  ;;  %1454 = vmatprep.subr.bf16.mxu0 %v2569_v35  ;;  %v2650_v34 = vld [vmem:[%s2892_s17 + $0x42c] ss:$16 sps:$4 sm:$0xff]   ;;  %v2645_v35 = vld [vmem:[%s2892_s17 + $0x328] ss:$16 sps:$4 sm:$0xff]  }
  0x82   : > { %1495 = vmatprep.subr.bf16.mxu1 %v2572_v36  ;;  %v2648_v36 = vld [vmem:[%s2892_s17 + $0x428] ss:$16 sps:$4 sm:$0xff]  }
  0x84   : > { %1455 = vmatpush1.bf16.msra.mxu0 %v2567_v37  ;;  %v2653_v37 = vld [vmem:[%s2892_s17 + $0x34c] ss:$16 sps:$4 sm:$0xff]  }
  0x85   : > { %1496 = vmatpush1.bf16.msra.mxu1 %v2570_v38  ;;  %1456 = vmatprep.subr.bf16.mxu0 %v2575_v39  ;;  %v2656_v38 = vld [vmem:[%s2892_s17 + $0x44c] ss:$16 sps:$4 sm:$0xff]   ;;  %v2651_v39 = vld [vmem:[%s2892_s17 + $0x348] ss:$16 sps:$4 sm:$0xff]  }
  0x86   : > { %1497 = vmatprep.subr.bf16.mxu1 %v2578_v41  ;;  %v2662_v41 = vld [vmem:[%s2892_s17 + $0x46c] ss:$16 sps:$4 sm:$0xff]  }
  0x88   : > { %1457 = vmatpush1.bf16.msra.mxu0 %v2573_v43  ;;  %v2660_v43 = vld [vmem:[%s2892_s17 + $0x468] ss:$16 sps:$4 sm:$0xff]  }
  0x89   : > { %1498 = vmatpush1.bf16.msra.mxu1 %v2576_v44  ;;  %1458 = vmatprep.subr.bf16.mxu0 %v2581_v45  ;;  %v2668_v44 = vld [vmem:[%s2892_s17 + $0x48c] ss:$16 sps:$4 sm:$0xff]   ;;  %v2663_v45 = vld [vmem:[%s2892_s17 + $0x388] ss:$16 sps:$4 sm:$0xff]  }
  0x8a   : > { %1499 = vmatprep.subr.bf16.mxu1 %v2584_v46  ;;  %v2666_v46 = vld [vmem:[%s2892_s17 + $0x488] ss:$16 sps:$4 sm:$0xff]  }
  0x8c   : > { %1459 = vmatpush1.bf16.msra.mxu0 %v2579_v47  ;;  %v2671_v47 = vld [vmem:[%s2892_s17 + $0x3ac] ss:$16 sps:$4 sm:$0xff]  }
  0x8d   : > { %1500 = vmatpush1.bf16.msra.mxu1 %v2582_v49  ;;  %1460 = vmatprep.subr.bf16.mxu0 %v2587_v52  ;;  %v2674_v49 = vld [vmem:[%s2892_s17 + $0x4ac] ss:$16 sps:$4 sm:$0xff]  }
  0x8e   : > { %1501 = vmatprep.subr.bf16.mxu1 %v2590_v53  ;;  %v2677_v52 = vld [vmem:[%s2892_s17 + $0x3cc] ss:$16 sps:$4 sm:$0xff]  }
  0x8f   : > { %v2680_v53 = vld [vmem:[%s2892_s17 + $0x4cc] ss:$16 sps:$4 sm:$0xff]  }
  0x90   : > { %1461 = vmatpush1.bf16.msra.mxu0 %v2585_v54  ;;  %v2675_v54 = vld [vmem:[%s2892_s17 + $0x3c8] ss:$16 sps:$4 sm:$0xff]  }
  0x91   : > { %1502 = vmatpush1.bf16.msra.mxu1 %v2588_v56  ;;  %1528 = vmatprep.subr.bf16.mxu0 %v2596_v59  ;;  %v2678_v56 = vld [vmem:[%s2892_s17 + $0x4c8] ss:$16 sps:$4 sm:$0xff]  }
  0x92   : > { %1503 = vmatprep.subr.bf16.mxu1 %v2593_v58  ;;  %v2686_v58 = vld [vmem:[%s2892_s17 + $0x4ec] ss:$16 sps:$4 sm:$0xff]   ;;  %v2681_v59 = vld [vmem:[%s2892_s17 + $0x3e8] ss:$16 sps:$4 sm:$0xff]  }
  0x93   : > { %1479 = vmatmul.mubr.bf16.vlgmr.msra.gmra.mrb[4].mxu0 %v3023_v60 }
  0x94   : > { %1529 = vmatpush1.bf16.msra.mxu0 %v2594_v62  ;;  %1560 = vmatprep.mubr.bf16.mxu0 %v2965_v8  ;;  %v2617_v8 = vld [vmem:[%s2892_s17 + $0x18c] ss:$16 sps:$4 sm:$0xff]  }
  0x95   : > { %1504 = vmatpush1.bf16.msra.mxu1 %v2591_v61  ;;  %1530 = vmatprep.subr.bf16.mxu0 %v2602_v0  ;;  %v2684_v61 = vld [vmem:[%s2892_s17 + $0x4e8] ss:$16 sps:$4 sm:$0xff]  }
  0x96   : > { %1505 = vmatprep.subr.bf16.mxu1 %v2599_v63 }
  0x98   : > { %1531 = vmatpush1.bf16.msra.mxu0 %v2600_v2 }
  0x99   : > { %1506 = vmatpush1.bf16.msra.mxu1 %v2597_v1  ;;  %1532 = vmatprep.subr.bf16.mxu0 %v2608_v3 }
  0x9a   : > { %1507 = vmatprep.subr.bf16.mxu1 %v2605_v55 }
  0x9c   : > { %1533 = vmatpush1.bf16.msra.mxu0 %v2606_v5 }
  0x9d   : > { %1508 = vmatpush1.bf16.msra.mxu1 %v2603_v4  ;;  %1534 = vmatprep.subr.bf16.mxu0 %v2614_v7  ;;  %v329_v7 = vld [vmem:[#allocation2] sm:$0xff] }
  0x9e   : > { %1509 = vmatprep.subr.bf16.mxu1 %v2611_v6 }
  0xa0   : > { %1535 = vmatpush1.bf16.msra.mxu0 %v2612_v10 }
  0xa1   : > { %1510 = vmatpush1.bf16.msra.mxu1 %v2609_v9  ;;  %1536 = vmatprep.subr.bf16.mxu0 %v2620_v11 }
  0xa2   : > { %1511 = vmatprep.subr.bf16.mxu1 %v2617_v8  ;;  %v330_v8 = vld [vmem:[#allocation2 + $0x8] sm:$0xff] }
  0xa4   : > { %1537 = vmatpush1.bf16.msra.mxu0 %v2618_v13 }
  0xa5   : > { %1512 = vmatpush1.bf16.msra.mxu1 %v2615_v12  ;;  %1538 = vmatprep.subr.bf16.mxu0 %v2626_v15 }
  0xa6   : > { %1513 = vmatprep.subr.bf16.mxu1 %v2623_v14 }
  0xa8   : > { %1539 = vmatpush1.bf16.msra.mxu0 %v2624_v18 }
  0xa9   : > { %1514 = vmatpush1.bf16.msra.mxu1 %v2621_v17  ;;  %1540 = vmatprep.subr.bf16.mxu0 %v2632_v21 }
  0xaa   : > { %1515 = vmatprep.subr.bf16.mxu1 %v2629_v20 }
  0xac   : > { %1541 = vmatpush1.bf16.msra.mxu0 %v2630_v23 }
  0xad   : > { %1516 = vmatpush1.bf16.msra.mxu1 %v2627_v22  ;;  %1542 = vmatprep.subr.bf16.mxu0 %v2638_v25 }
  0xae   : > { %1517 = vmatprep.subr.bf16.mxu1 %v2635_v24 }
  0xb0   : > { %1543 = vmatpush1.bf16.msra.mxu0 %v2636_v27 }
  0xb1   : > { %1518 = vmatpush1.bf16.msra.mxu1 %v2633_v26  ;;  %1544 = vmatprep.subr.bf16.mxu0 %v2641_v29  ;;  %v331_v26 = vld [vmem:[#allocation2 + $0x10] sm:$0xff] }
  0xb2   : > { %1569 = vmatprep.subr.bf16.mxu1 %v2644_v30 }
  0xb4   : > { %1520 = vmatmul.mubr.bf16.vlgmr.msra.gmra.mrb[4].mxu1 %v2975_v16  ;;  %1545 = vmatpush1.bf16.msra.mxu0 %v2639_v31  ;;  %v2654_v16 = vld [vmem:[%s2892_s17 + $0x448] ss:$16 sps:$4 sm:$0xff]  }
  0xb5   : > { %1570 = vmatpush1.bf16.msra.mxu1 %v2642_v32  ;;  %1546 = vmatprep.subr.bf16.mxu0 %v2647_v33  ;;  %v332_v32 = vld [vmem:[#allocation2 + $0x18] sm:$0xff] }
  0xb6   : > { %1571 = vmatprep.subr.bf16.mxu1 %v2650_v34  ;;  %1601 = vmatprep.mubr.bf16.mxu1 %v2807_v28  ;;  %v2665_v28 = vld [vmem:[%s2892_s17 + $0x38c] ss:$16 sps:$4 sm:$0xff]  }
  0xb8   : > { %1547 = vmatpush1.bf16.msra.mxu0 %v2645_v35 }
  0xb9   : > { %1572 = vmatpush1.bf16.msra.mxu1 %v2648_v36  ;;  %1548 = vmatprep.subr.bf16.mxu0 %v2653_v37 }
  0xba   : > { %1573 = vmatprep.subr.bf16.mxu1 %v2656_v38  ;;  %v2687_v38 = vld [vmem:[%s3234_s3 + $0x40] sm:$0xff] (!%p2275_p12)  }
  0xbc   : > { %1549 = vmatpush1.bf16.msra.mxu0 %v2651_v39  ;;  %v2688_v39 = vld [vmem:[%s3234_s3 + $0xc0] sm:$0xff] (!%p2275_p12)  }
  0xbd   : > { %1574 = vmatpush1.bf16.msra.mxu1 %v2654_v16  ;;  %1550 = vmatprep.subr.bf16.mxu0 %v2659_v40  ;;  %v2689_v16 = vld [vmem:[%s3234_s3] sm:$0xff] (!%p2275_p12)  }
  0xbe   : > { %1575 = vmatprep.subr.bf16.mxu1 %v2662_v41  ;;  %v2690_v40 = vld [vmem:[%s3234_s3 + $0x80] sm:$0xff] (!%p2275_p12)   ;;  %v2691_v41 = vld [vmem:[%s3234_s3 + $0x48] sm:$0xff] (!%p2275_p12)  }
  0xc0   : > { %1551 = vmatpush1.bf16.msra.mxu0 %v2657_v42  ;;  %v2692_v42 = vld [vmem:[%s3234_s3 + $0xc8] sm:$0xff] (!%p2275_p12)  }
  0xc1   : > { %1576 = vmatpush1.bf16.msra.mxu1 %v2660_v43  ;;  %1552 = vmatprep.subr.bf16.mxu0 %v2665_v28  ;;  %v2693_v43 = vld [vmem:[%s3234_s3 + $0x8] sm:$0xff] (!%p2275_p12)  }
  0xc2   : > { %1577 = vmatprep.subr.bf16.mxu1 %v2668_v44  ;;  %v2694_v28 = vld [vmem:[%s3234_s3 + $0x88] sm:$0xff] (!%p2275_p12)   ;;  %v2695_v44 = vld [vmem:[%s3234_s3 + $0x50] sm:$0xff] (!%p2275_p12)  }
  0xc4   : > { %1553 = vmatpush1.bf16.msra.mxu0 %v2663_v45  ;;  %v2696_v45 = vld [vmem:[%s3234_s3 + $0xd0] sm:$0xff] (!%p2275_p12)  }
  0xc5   : > { %1578 = vmatpush1.bf16.msra.mxu1 %v2666_v46  ;;  %1554 = vmatprep.subr.bf16.mxu0 %v2671_v47  ;;  %v2697_v46 = vld [vmem:[%s3234_s3 + $0x10] sm:$0xff] (!%p2275_p12)  }
  0xc6   : > { %1579 = vmatprep.subr.bf16.mxu1 %v2674_v49  ;;  %v2698_v47 = vld [vmem:[%s3234_s3 + $0x90] sm:$0xff] (!%p2275_p12)   ;;  %v2699_v49 = vld [vmem:[%s3234_s3 + $0x58] sm:$0xff] (!%p2275_p12)  }
  0xc8   : > { %1555 = vmatpush1.bf16.msra.mxu0 %v2669_v50  ;;  %v2700_v50 = vld [vmem:[%s3234_s3 + $0xd8] sm:$0xff] (!%p2275_p12)  }
  0xc9   : > { %1580 = vmatpush1.bf16.msra.mxu1 %v2672_v51  ;;  %1556 = vmatprep.subr.bf16.mxu0 %v2677_v52  ;;  %v2701_v51 = vld [vmem:[%s3234_s3 + $0x18] sm:$0xff] (!%p2275_p12)  }
  0xca   : > { %1581 = vmatprep.subr.bf16.mxu1 %v2680_v53  ;;  %v2702_v52 = vld [vmem:[%s3234_s3 + $0x98] sm:$0xff] (!%p2275_p12)   ;;  %v2703_v53 = vld [vmem:[%s3234_s3 + $0x60] sm:$0xff] (!%p2275_p12)  }
  0xcc   : > { %1557 = vmatpush1.bf16.msra.mxu0 %v2675_v54  ;;  %v2704_v54 = vld [vmem:[%s3234_s3 + $0xe0] sm:$0xff] (!%p2275_p12)  }
  0xcd   : > { %1582 = vmatpush1.bf16.msra.mxu1 %v2678_v56  ;;  %1558 = vmatprep.subr.bf16.mxu0 %v2683_v57  ;;  %v2705_v56 = vld [vmem:[%s3234_s3 + $0x20] sm:$0xff] (!%p2275_p12)  }
  0xce   : > { %1583 = vmatprep.subr.bf16.mxu1 %v2686_v58  ;;  %v2706_v57 = vld [vmem:[%s3234_s3 + $0xa0] sm:$0xff] (!%p2275_p12)   ;;  %v2707_v58 = vld [vmem:[%s3234_s3 + $0x68] sm:$0xff] (!%p2275_p12)  }
  0xd0   : > { %1559 = vmatpush1.bf16.msra.mxu0 %v2681_v59  ;;  %v2708_v59 = vld [vmem:[%s3234_s3 + $0xe8] sm:$0xff] (!%p2275_p12)  }
  0xd1   : > { %1584 = vmatpush1.bf16.msra.mxu1 %v2684_v61  ;;  %2314 = vmatprep.subr.bf16.mxu0 (!%p2275_p12), %v2687_v38  ;;  %v2709_v61 = vld [vmem:[%s3234_s3 + $0x28] sm:$0xff] (!%p2275_p12)  }
  0xd2   : > { %2336 = vmatprep.subr.bf16.mxu1 (!%p2275_p12), %v2688_v39 }
  0xd3   : > { %1561 = vmatmul.mubr.bf16.vlgmr.msra.gmra.mrb[8].mxu0 %v2981_v19 }
  0xd4   : > { %1602 = vmatmul.mubr.bf16.vlgmr.msra.gmra.mrb[8].mxu1 %v3023_v60  ;;  %2315 = vmatpush3.bf16.msra.mxu0 (!%p2275_p12), %v2689_v16 }
  0xd5   : > { %2337 = vmatpush3.bf16.msra.mxu1 (!%p2275_p12), %v2690_v40  ;;  %2316 = vmatprep.subr.bf16.mxu0 (!%p2275_p12), %v2691_v41 }
  0xd6   : > { %2338 = vmatprep.subr.bf16.mxu1 (!%p2275_p12), %v2692_v42 }
  0xd8   : > { %2317 = vmatpush3.bf16.msra.mxu0 (!%p2275_p12), %v2693_v43 }
  0xd9   : > { %2339 = vmatpush3.bf16.msra.mxu1 (!%p2275_p12), %v2694_v28  ;;  %2318 = vmatprep.subr.bf16.mxu0 (!%p2275_p12), %v2695_v44 }
  0xda   : > { %2340 = vmatprep.subr.bf16.mxu1 (!%p2275_p12), %v2696_v45 }
  0xdc   : > { %2319 = vmatpush3.bf16.msra.mxu0 (!%p2275_p12), %v2697_v46 }
  0xdd   : > { %2341 = vmatpush3.bf16.msra.mxu1 (!%p2275_p12), %v2698_v47  ;;  %2320 = vmatprep.subr.bf16.mxu0 (!%p2275_p12), %v2699_v49 }
  0xde   : > { %2342 = vmatprep.subr.bf16.mxu1 (!%p2275_p12), %v2700_v50 }
  0xe0   : > { %2321 = vmatpush3.bf16.msra.mxu0 (!%p2275_p12), %v2701_v51 }
  0xe1   : > { %2343 = vmatpush3.bf16.msra.mxu1 (!%p2275_p12), %v2702_v52  ;;  %2322 = vmatprep.subr.bf16.mxu0 (!%p2275_p12), %v2703_v53 }
  0xe2   : > { %2344 = vmatprep.subr.bf16.mxu1 (!%p2275_p12), %v2704_v54 }
  0xe4   : > { %2323 = vmatpush3.bf16.msra.mxu0 (!%p2275_p12), %v2705_v56 }
  0xe5   : > { %2345 = vmatpush3.bf16.msra.mxu1 (!%p2275_p12), %v2706_v57  ;;  %2324 = vmatprep.subr.bf16.mxu0 (!%p2275_p12), %v2707_v58 }
  0xe6   : > { %2346 = vmatprep.subr.bf16.mxu1 (!%p2275_p12), %v2708_v59 }
  0xe8   : > { %2325 = vmatpush3.bf16.msra.mxu0 (!%p2275_p12), %v2709_v61 }
 0x146   : > { %v1398_v62 = vpop.f32.mrb[0].mxu0 }
 0x147   : > { %v1439_v63 = vpop.f32.mrb[0].mxu1  ;;  %v1400_v1 = vpop.f32.mrb[1].mxu0 }
 0x148   : > { %v1440_v0 = vadd.f32 %v1439_v63, %v1398_v62  ;;  %v1441_v2 = vpop.f32.mrb[1].mxu1  ;;  %v1402_v3 = vpop.f32.mrb[2].mxu0  ;;  %v2710_v62 = vld [vmem:[%s3234_s3 + $0xa8] sm:$0xff] (!%p2275_p12)   ;;  %v2711_v63 = vld [vmem:[%s3234_s3 + $0x70] sm:$0xff] (!%p2275_p12)  }
 0x149   : > { %v1442_v55 = vadd.f32 %v1441_v2, %v1400_v1  ;;  %v1443_v4 = vpop.f32.mrb[2].mxu1  ;;  %v1403_v5 = vpop.f32.mrb[3].mxu0  ;;  %2347 = vmatpush3.bf16.msra.mxu1 (!%p2275_p12), %v2710_v62  ;;  %2326 = vmatprep.subr.bf16.mxu0 (!%p2275_p12), %v2711_v63  ;;  %v2713_v1 = vld [vmem:[%s3234_s3 + $0x30] sm:$0xff] (!%p2275_p12)   ;;  %v1634_v2 = vsub.s32 (!%p2275_p12), 1, %v2939_v48  ;;  %v1642_v3 = vsub.s32 (!%p2275_p12), 3, %v2939_v48 }
 0x14a   : > { %v1444_v6 = vpop.f32.mrb[3].mxu1  ;;  %2327 = vmatpush3.bf16.msra.mxu0 (!%p2275_p12), %v2713_v1  ;;  %v2715_v4 = vld [vmem:[%s3234_s3 + $0x78] sm:$0xff] (!%p2275_p12)   ;;  %v1630_v5 = vsub.s32 (!%p2275_p12), 0, %v2939_v48 }
 0x14b   : > { %v2716_v6 = vld [vmem:[%s3234_s3 + $0xf8] sm:$0xff] (!%p2275_p12)   ;;  %2328 = vmatprep.subr.bf16.mxu0 (!%p2275_p12), %v2715_v4 }
 0x166   : > { %v1480_v9 = vpop.f32.mrb[4].mxu0 }
 0x167   : > { %v1481_v10 = vadd.f32 %v1480_v9, %v1440_v0  ;;  %v1482_v11 = vpop.f32.mrb[5].mxu0  ;;  %v2712_v0 = vld [vmem:[%s3234_s3 + $0xf0] sm:$0xff] (!%p2275_p12)   ;;  %v2717_v9 = vld [vmem:[%s3234_s3 + $0x38] sm:$0xff] (!%p2275_p12)  }
 0x168   : > { %v1483_v12 = vadd.f32 %v1482_v11, %v1442_v55  ;;  %v1484_v13 = vpop.f32.mrb[6].mxu0  ;;  %2348 = vmatprep.subr.bf16.mxu1 (!%p2275_p12), %v2712_v0  ;;  %v2714_v55 = vld [vmem:[%s3234_s3 + $0xb0] sm:$0xff] (!%p2275_p12)   ;;  %2329 = vmatpush3.bf16.msra.mxu0 (!%p2275_p12), %v2717_v9  ;;  %v1626_v11 = vld [vmem:[%s3233_s2] sm:$0xf] (!%p2275_p12) }
 0x169   : > { %v1610_v19 = vadd.f32 %v1481_v10, %v329_v7  ;;  %v1485_v14 = vpop.f32.mrb[7].mxu0  ;;  %2349 = vmatpush3.bf16.msra.mxu1 (!%p2275_p12), %v2714_v55  ;;  %v1638_v7 = vsub.s32 (!%p2275_p12), 2, %v2939_v48  ;;  %v2718_v10 = vld [vmem:[%s3234_s3 + $0xb8] sm:$0xff] (!%p2275_p12)   ;;  %v1635_v13 = vrot.slane (!%p2275_p12), %v1626_v11, %v1634_v2  ;;  %v1643_v48 = vrot.slane (!%p2275_p12), %v1626_v11, %v1642_v3 }
 0x16a   : > { %v1611_v60 = vadd.f32 %v1483_v12, %v330_v8  ;;  %2350 = vmatprep.subr.bf16.mxu1 (!%p2275_p12), %v2716_v6  ;;  %v1631_v14 = vrot.slane (!%p2275_p12), %v1626_v11, %v1630_v5 }
 0x16b   : > { %1614 = vst [vmem:[#allocation2] sm:$0xff] %v1610_v19 }
 0x16c   : > { %1615 = vst [vmem:[#allocation2 + $0x8] sm:$0xff] %v1611_v60 }
 0x16d   : > { %2351 = vmatpush3.bf16.msra.mxu1 (!%p2275_p12), %v2718_v10 }
 0x172   : > { %v1622_v19 = vld [vmem:[#allocation2] sm:$0xff] (!%p2275_p12) }
 0x173   : > { %v1623_v8 = vld [vmem:[#allocation2 + $0x8] sm:$0xff] (!%p2275_p12) }
 0x187   : > { %v1521_v15 = vpop.f32.mrb[4].mxu1 }
 0x188   : > { %v1523_v17 = vpop.f32.mrb[5].mxu1 }
 0x189   : > { %v1525_v18 = vpop.f32.mrb[6].mxu1 }
 0x18a   : > { %v1526_v20 = vpop.f32.mrb[7].mxu1 }
 0x18b   : > { %v1648_v20 = vadd.f32 (!%p2275_p12), %v1631_v14, %v1622_v19 }
 0x1a6   : > { %v1562_v21 = vpop.f32.mrb[8].mxu0 }
 0x1a7   : > { %v1603_v22 = vpop.f32.mrb[8].mxu1  ;;  %v1563_v23 = vadd.f32 %v1562_v21, %v1521_v15  ;;  %v1564_v24 = vpop.f32.mrb[9].mxu0  ;;  %v1639_v15 = vrot.slane (!%p2275_p12), %v1626_v11, %v1638_v7 }
 0x1a8   : > { %v1605_v25 = vpop.f32.mrb[9].mxu1  ;;  %v1565_v27 = vadd.f32 %v1564_v24, %v1523_v17  ;;  %v1566_v29 = vpop.f32.mrb[10].mxu0  ;;  %1621 = sbr.rel (%p2275_p12) target bundleno = 663 (0x297), region = 82  ;;  %v1649_v17 = vadd.f32 (!%p2275_p12), %v1635_v13, %v1623_v8  ;;  %v1652_v24 = vmax.f32 (!%p2275_p12), %v1648_v20, 0.0 }
 0x1a9   : > { %v1607_v30 = vpop.f32.mrb[10].mxu1  ;;  %v1604_v31 = vadd.f32 %v1603_v22, %v1563_v23  ;;  %v1567_v33 = vpop.f32.mrb[11].mxu0 }
 0x1aa   : > { %v1608_v34 = vpop.f32.mrb[11].mxu1  ;;  %v1606_v35 = vadd.f32 %v1605_v25, %v1565_v27  ;;  %v1653_v22 = vmax.f32 (!%p2275_p12), %v1649_v17, 0.0  ;;  %v1656_v29 = vpack.c.bf16 (!%p2275_p12), %v1652_v24, %v1652_v24  ;;  %v2276_v33 = vld [vmem:[%s3235_s4] ss:$0 sm:$0xff] (!%p2275_p12) }
 0x1ab   : > { %v1612_v36 = vadd.f32 %v1604_v31, %v331_v26 }
 0x1ac   : > { %v1613_v37 = vadd.f32 %v1606_v35, %v332_v32  ;;  %v1657_v26 = vpack.c.bf16 (!%p2275_p12), %v1653_v22, %v1653_v22 }
 0x1ad   : > { %1616 = vst [vmem:[#allocation2 + $0x10] sm:$0xff] %v1612_v36 }
 0x1ae   : > { %1617 = vst [vmem:[#allocation2 + $0x18] sm:$0xff] %v1613_v37  ;;  %1955 = vmatprep.mubr.bf16.mxu0 (!%p2275_p12), %v1657_v26 }
 0x1af   : > { %1956 = vmatmul.mubr.bf16.vlgmr.msra.gmra.mrb[0].mxu0 %v1656_v29 }
 0x1b4   : > { %v1624_v60 = vld [vmem:[#allocation2 + $0x10] sm:$0xff] }
 0x1b5   : > { %v1625_v12 = vld [vmem:[#allocation2 + $0x18] sm:$0xff]  ;;  %v1650_v21 = vadd.f32 %v1639_v15, %v1624_v60 }
 0x1b6   : > { %v1651_v18 = vadd.f32 %v1643_v48, %v1625_v12 }
 0x1b7   : > { %v1654_v25 = vmax.f32 %v1650_v21, 0.0 }
 0x1b8   : > { %v1655_v23 = vmax.f32 %v1651_v18, 0.0 }
 0x1b9   : > { %v1658_v30 = vpack.c.bf16 %v1654_v25, %v1654_v25 }
 0x1ba   : > { %v1659_v27 = vpack.c.bf16 %v1655_v23, %v1655_v23 }
 0x1bc   : > { %1995 = vmatprep.mubr.bf16.mxu1 %v1659_v27 }
 0x1bd   : > { %1996 = vmatmul.mubr.bf16.vlgmr.msra.gmra.mrb[0].mxu1 %v1658_v30 }
 0x282   : > { %v2330_v31 = vpop.f32.mrb[0].mxu0 }
 0x283   : > { %v2331_v34 = vpop.f32.mrb[1].mxu0 }
 0x284   : > { %v2332_v36 = vadd.f32 %v2331_v34, %v2330_v31  ;;  %v2333_v38 = vpop.f32.mrb[2].mxu0 }
 0x285   : > { %v2334_v16 = vpop.f32.mrb[3].mxu0 }
 0x286   : > { %v1958_v41 = vadd.f32 %v2332_v36, %v2276_v33 }
 0x290   : > { %v2352_v32 = vpop.f32.mrb[0].mxu1 }
 0x291   : > { %v2353_v35 = vpop.f32.mrb[1].mxu1 }
 0x292   : > { %v2354_v37 = vadd.f32 %v2353_v35, %v2352_v32  ;;  %v2355_v39 = vpop.f32.mrb[2].mxu1 }
 0x293   : > { %v2356_v40 = vpop.f32.mrb[3].mxu1 }
 0x294   : > { %v1998_v42 = vadd.f32 %v2354_v37, %v1958_v41 }
 0x296   : > { %2003 = vst [vmem:[#allocation4] sm:$0xff] %v1998_v42 }
 0x297 PF: > { %p2309_p13 = scmp.ne.s32.totalorder %s2108_s23, 4 }
 0x299   : > { %2006 = sbr.rel (%p2309_p13) target bundleno = 691 (0x2b3), region = 86 }
 0x2a0   : > { %2012 = vsyncadd [#allocation5], 96  ;;  %s2808_s11 = smov [#allocation4]  }
 0x2a1   : > { %s2017_s12 = sshll.u32 %s2808_s11, 4  ;;  %s2018_s12 = int_to_ptr.vmem [resolvable:$true] %s2017_s12 }
 0x2a2   : > { %s2719_s13 = scalar_lea.vmem %s2018_s12, 32  ;;  %s2723_s14 = scalar_lea.vmem %s2018_s12, 128 }
 0x2a3   : > { %p2720_p0 = scmp.ne.s32.totalorder %s2018_s12, %s2719_s13  ;;  %p2724_p1 = scmp.lt.s32.totalorder %s2018_s12, %s2018_s12 }
 0x2a4   : > { %p2725_p2 = scmp.lt.s32.totalorder %s2723_s14, %s2719_s13 }
 0x2a6   : > { %p2726_p3 = por %p2725_p2, %p2724_p1 }
 0x2a8   : > { %p2727_p4 = pnand %p2726_p3, %p2720_p0 }
 0x2aa   : > { %2730 = shalt.err (!%p2727_p4)
}
 0x2ab   : > { %s2731_s17 = scalar_lea.hbm %s3236_s5, 32 }
 0x2ac   : > { %p2732_p5 = scmp.ne.s32.totalorder %s3236_s5, %s2731_s17  ;;  %p2735_p6 = scmp.lt.u32.totalorder %s2731_s17, %s3236_s5 }
 0x2ae   : > { %p2737_p7 = pnand %p2735_p6, %p2732_p5 }
 0x2b0   : > { %2740 = shalt.err (!%p2737_p7)
}
 0x2b1   : > { %s2809_s29 = smov 32   ;;  %s2810_s30 = smov 2  }
 0x2b2   : > { %2023 = dma.vmem_to_hbm [thread:$0]  %s2018_s12, 32, %s3236_s5, [#allocation5], %s2809_s29, %s2809_s29, %s2810_s30  }
 0x2b3 PF: > { %p2362_p8 = scmp.eq.s32.totalorder %s2108_s23, 4 }
 0x2b5   : > { %2778 = dma.done.wait (%p2362_p8), [#allocation5], 128  }
 0x2b6   : > { %2780 = vsyncadd (%p2362_p8), [#allocation5], 4294967168 }
 0x2b7 PF: > { %s16_s22 = sadd.s32 1, %s2799_s22   ;;  %s3237_s18 = smov %s2787_s19 }
 0x2b8   : > { %p13_p9 = scmp.ge.s32.totalorder %s16_s22, 7   ;;  %s3238_s19 = smov %s2877_s27 }
 0x2b9   : > { %s3239_s20 = smov %s2795_s21  ;;  %s3240_s21 = smov %s3242_s24 }
 0x2ba   :  { %15 = sbr.rel (!%p13_p9) target bundleno = 3 (0x3), region = 129 }
 0x2c1   :  { %2033 = vsyncpa [#allocation5], 1 }
 0x2c2   :  { %2035 = vsyncpa [#allocation5 + $0x1], 1 }

</bundles_post_ra>
